<compile_context>
chip_gen: v7x
topology: tpu7x:2x2x1
jax: 0.10.0
libtpu: 0.0.40
codegen_flags: <defaults>
</compile_context>

<pallas_src>
import functools
import math

import jax
import jax.numpy as jnp
from jax.experimental import pallas as pl
from jax.experimental.pallas import tpu as pltpu


MATMUL_DTYPE = jnp.bfloat16   # MXU operand dtype (accumulation stays f32)
LN_EPS = 1e-5

_BLOCK_KEYS = ("ln1_g", "ln1_b", "wqkv", "bqkv", "wo", "bo",
               "ln2_g", "ln2_b", "w1", "b1", "w2", "b2")


# ---------------------------------------------------------------------------
# In-kernel helpers (operate on values / weight refs)
# ---------------------------------------------------------------------------

def _mm(a, w):
    """MXU matmul: bf16 operands (weights are pre-cast at init), f32 accumulation."""
    return jnp.dot(a.astype(MATMUL_DTYPE), w.astype(MATMUL_DTYPE),
                   preferred_element_type=jnp.float32)


def _layernorm(x, g, b, eps):
    mean = jnp.mean(x, axis=-1, keepdims=True)
    xc = x - mean
    var = jnp.mean(xc * xc, axis=-1, keepdims=True)
    return xc * jax.lax.rsqrt(var + eps) * g + b


def _gelu_exact(x):
    """Exact (erf-based) GELU matching PyTorch nn.GELU default.

    erf via Abramowitz & Stegun 7.1.26 (max abs err ~1.5e-7), built only from
    exp + VPU arithmetic so it lowers on every TPU generation.
    """
    a1, a2, a3, a4, a5 = 0.254829592, -0.284496736, 1.421413741, -1.453152027, 1.061405429
    p = 0.3275911
    z = x * 0.7071067811865476
    az = jnp.abs(z)
    t = 1.0 / (1.0 + p * az)
    poly = ((((a5 * t + a4) * t + a3) * t + a2) * t + a1) * t
    erf_abs = 1.0 - poly * jnp.exp(-az * az)
    erf_z = jnp.where(z >= 0, erf_abs, -erf_abs)
    return 0.5 * x * (1.0 + erf_z)


def _mlp_chain(x, layer_refs):
    """MLP: [Linear + ReLU]* hidden layers -> final Linear (no norm/act)."""
    n = len(layer_refs) // 2
    h = x
    for i in range(n):
        h = _mm(h, layer_refs[2 * i][...]) + layer_refs[2 * i + 1][...]
        if i < n - 1:
            h = jnp.maximum(h, 0.0)
    return h


def _mhsa(h, wqkv, bqkv, wo, bo, num_heads):
    """Merged-head self-attention on a single [S, D] tile.

    All heads share two MXU passes: scores on a head-stacked [H*S, dh] layout
    with a block-diagonal softmax mask (H*S <= 128 lanes), then P @ V.
    """
    S, D = h.shape
    H = num_heads
    dh = D // H

    qkv = _mm(h, wqkv) + bqkv                               # [S, 3D], one fused matmul
    q = qkv[:, :D] * (1.0 / math.sqrt(dh))                  # scale folded into q
    k = qkv[:, D:2 * D]
    v = qkv[:, 2 * D:3 * D]

    # Head-major stacking: row h*S + s holds head h of token s.
    qb = jnp.concatenate([q[:, i * dh:(i + 1) * dh] for i in range(H)], axis=0)   # [HS, dh]
    kb = jnp.concatenate([k[:, i * dh:(i + 1) * dh] for i in range(H)], axis=0)
    vb = jnp.concatenate([v[:, i * dh:(i + 1) * dh] for i in range(H)], axis=0)

    s_all = jax.lax.dot_general(qb.astype(MATMUL_DTYPE), kb.astype(MATMUL_DTYPE),
                                (((1,), (1,)), ((), ())),
                                preferred_element_type=jnp.float32)               # [HS, HS]

    # Block-diagonal mask (same-head pairs only), built from splats + compares
    # (no iota / integer division needed).
    row_id = jnp.concatenate([jnp.full((S, 1), float(i), jnp.float32) for i in range(H)], axis=0)
    col_id = jnp.concatenate([jnp.full((1, S), float(i), jnp.float32) for i in range(H)], axis=1)
    s_all = jnp.where(row_id == col_id, s_all, -1e30)

    m = jnp.max(s_all, axis=-1, keepdims=True)
    p = jnp.exp(s_all - m)
    p = p / jnp.sum(p, axis=-1, keepdims=True)              # exact softmax (f32)
    ob = _mm(p, vb)                                         # [HS, dh]

    attn = jnp.concatenate([ob[i * S:(i + 1) * S, :] for i in range(H)], axis=-1)  # [S, D]
    return _mm(attn, wo) + bo


def _transformer_block(x, blk, num_heads, eps):
    ln1_g, ln1_b, wqkv, bqkv, wo, bo, ln2_g, ln2_b, w1, b1, w2, b2 = blk
    h = _layernorm(x, ln1_g[...], ln1_b[...], eps)
    x = x + _mhsa(h, wqkv[...], bqkv[...], wo[...], bo[...], num_heads)
    h = _layernorm(x, ln2_g[...], ln2_b[...], eps)
    f = _mm(h, w1[...]) + b1[...]
    f = _gelu_exact(f)
    f = _mm(f, w2[...]) + b2[...]
    return x + f


# ---------------------------------------------------------------------------
# Kernel A: embeddings + transformer stack + upsample block (per batch element)
# ---------------------------------------------------------------------------

def _encoder_kernel(*refs, num_blocks, num_heads, up_factor, n_tokens, embed_dim, eps):
    idx = 0
    xyz_ref = refs[idx]; idx += 1          # [1, N, 3]
    feat_ref = refs[idx]; idx += 1         # [1, N, in_dim]
    ctok_ref = refs[idx]; idx += 1         # [1, E]
    pe_refs = refs[idx:idx + 4]; idx += 4  # pos_embed  (w0,b0,w1,b1)
    ip_refs = refs[idx:idx + 4]; idx += 4  # input_proj (w0,b0,w1,b1)
    blk_refs = []
    for _ in range(num_blocks):
        blk_refs.append(refs[idx:idx + 12]); idx += 12
    up_refs = refs[idx:idx + 12]; idx += 12
    ups_ref = refs[idx]; idx += 1          # out: [1, N, up_factor*E]
    ctr_out_ref = refs[idx]                # out: [1, 1, E]

    E = embed_dim
    N = n_tokens

    # --- pos_embed + input_proj + center-token append, fused ---
    pos = _mlp_chain(xyz_ref[0].astype(jnp.float32), pe_refs)       # [N, E]
    fe = _mlp_chain(feat_ref[0].astype(jnp.float32), ip_refs)       # [N, E]
    # Center token: feature = learned token, positional embedding = 0 (as in reference).
    x = jnp.concatenate([pos + fe, ctok_ref[...].astype(jnp.float32)], axis=0)   # [N+1, E]

    # --- transformer blocks (all chained in-kernel) ---
    for blk in blk_refs:
        x = _transformer_block(x, blk, num_heads, eps)

    ctr_out_ref[0] = x[N:N + 1, :].astype(ctr_out_ref.dtype)        # center seed embed
    xt = x[:N, :]                                                   # [N, E]

    # --- upsample block: pre-norm MHSA + residual, FFN -> up_factor*E ---
    ln1_g, ln1_b, wqkv, bqkv, wo, bo, ln2_g, ln2_b, w1, b1, w2, b2 = up_refs
    h = _layernorm(xt, ln1_g[...], ln1_b[...], eps)
    xt = xt + _mhsa(h, wqkv[...], bqkv[...], wo[...], bo[...], num_heads)
    h = _layernorm(xt, ln2_g[...], ln2_b[...], eps)
    f = _mm(h, w1[...]) + b1[...]
    f = _gelu_exact(f)
    f = _mm(f, w2[...]) + b2[...]                                   # [N, up_factor*E]
    # Residual repeated per chunk, written with static lane slices (no lane concat).
    for u in range(up_factor):
        ups_ref[0, :, u * E:(u + 1) * E] = (xt + f[:, u * E:(u + 1) * E]).astype(ups_ref.dtype)


# ---------------------------------------------------------------------------
# Kernel B: output_proj + center_mlp + offset_mlp + glue (per batch element)
# ---------------------------------------------------------------------------

def _head_kernel(*refs, n_out, n_ctr, n_off):
    idx = 0
    ups_ref = refs[idx]; idx += 1          # [1, N*up, E]
    ctr_ref = refs[idx]; idx += 1          # [1, 1, E]
    glob_ref = refs[idx]; idx += 1         # [1, 1, G]
    op_refs = refs[idx:idx + 2 * n_out]; idx += 2 * n_out
    cm_refs = refs[idx:idx + 2 * n_ctr]; idx += 2 * n_ctr
    om_refs = refs[idx:idx + 2 * n_off]; idx += 2 * n_off
    xyz_ref = refs[idx]; idx += 1          # out: [1, N*up, 3]
    sf_ref = refs[idx]; idx += 1           # out: [1, N*up, out_dim]
    oc_ref = refs[idx]                     # out: [1, 1, 3]

    ups = ups_ref[0].astype(jnp.float32)                            # [NU, E]
    seed_features = _mlp_chain(ups, op_refs)                        # [NU, out_dim]

    center_feat = jnp.concatenate([ctr_ref[0].astype(jnp.float32),
                                   glob_ref[0].astype(jnp.float32)], axis=-1)   # [1, E+G]
    object_center = _mlp_chain(center_feat, cm_refs)                # [1, 3]

    nu = ups.shape[0]
    cf = jnp.broadcast_to(center_feat, (nu, center_feat.shape[-1]))
    offsets = _mlp_chain(jnp.concatenate([seed_features, cf], axis=-1), om_refs)  # [NU, 3]

    # TODO(synk): 3-wide outputs lower to masked (non lane-dense) stores; pack them
    #             into a 128-wide slab if N*up_factor is ever scaled up.
    sf_ref[0] = seed_features.astype(sf_ref.dtype)
    oc_ref[0] = object_center.astype(oc_ref.dtype)
    xyz_ref[0] = (object_center + offsets).astype(xyz_ref.dtype)


# ---------------------------------------------------------------------------
# Parameter initialization (deterministic, synthetic; matmul weights pre-cast bf16)
# ---------------------------------------------------------------------------

def _init_linear(key, din, dout):
    return {"w": (jax.random.normal(key, (din, dout), jnp.float32) * 0.02).astype(MATMUL_DTYPE),
            "b": jnp.zeros((1, dout), jnp.float32)}


def _init_mlp(key, in_dim, hidden_dims, out_dim):
    dims = [in_dim] + list(hidden_dims) + [out_dim]
    keys = jax.random.split(key, len(dims) - 1)
    return [_init_linear(k, a, b) for k, a, b in zip(keys, dims[:-1], dims[1:])]


def _init_block(key, dim, up_factor=1):
    k = jax.random.split(key, 4)

    def w(kk, a, b):
        return (jax.random.normal(kk, (a, b), jnp.float32) * 0.02).astype(MATMUL_DTYPE)

    return {
        "ln1_g": jnp.ones((1, dim), jnp.float32),
        "ln1_b": jnp.zeros((1, dim), jnp.float32),
        "wqkv": w(k[0], dim, 3 * dim),
        "bqkv": jnp.zeros((1, 3 * dim), jnp.float32),
        "wo": w(k[1], dim, dim),
        "bo": jnp.zeros((1, dim), jnp.float32),
        "ln2_g": jnp.ones((1, dim), jnp.float32),
        "ln2_b": jnp.zeros((1, dim), jnp.float32),
        "w1": w(k[2], dim, 4 * dim),
        "b1": jnp.zeros((1, 4 * dim), jnp.float32),
        "w2": w(k[3], 4 * dim, up_factor * dim),
        "b2": jnp.zeros((1, up_factor * dim), jnp.float32),
    }


def init_params(key, in_dim, out_dim, global_dim, embed_dim, num_blocks, up_factor):
    keys = jax.random.split(key, 8 + num_blocks)
    return {
        "center_seed_token":
            jax.random.normal(keys[0], (1, embed_dim), jnp.float32) * 0.02,
        "pos_embed": _init_mlp(keys[1], 3, [in_dim // 2], embed_dim),
        "input_proj": _init_mlp(keys[2], in_dim, [in_dim // 2], embed_dim),
        "blocks": [_init_block(keys[3 + i], embed_dim) for i in range(num_blocks)],
        "upsample": _init_block(keys[3 + num_blocks], embed_dim, up_factor),
        "output_proj": _init_mlp(keys[4 + num_blocks], embed_dim, [embed_dim // 2], out_dim),
        "center_mlp": _init_mlp(keys[5 + num_blocks], embed_dim + global_dim,
                                [embed_dim, embed_dim // 2], 3),
        "offset_mlp": _init_mlp(keys[6 + num_blocks],
                                out_dim + embed_dim + global_dim,
                                [out_dim, out_dim // 2], 3),
    }


# ---------------------------------------------------------------------------
# Forward pass: 2 pallas_calls + one trivial reshape
# ---------------------------------------------------------------------------

def _flatten_mlp(layers):
    out = []
    for lyr in layers:
        out += [lyr["w"], lyr["b"]]
    return out


def _flatten_block(blk):
    return [blk[k] for k in _BLOCK_KEYS]


def _weight_spec(w):
    # Full-extent, grid-resident weight block (all params are 2-D).
    return pl.BlockSpec(w.shape, lambda b: (0, 0))


def robust_seed_generator_forward(params, partial_xyz, partial_features,
                                  global_feature, *, num_heads, up_factor):
    B, N, in_dim = partial_features.shape
    E = params["center_seed_token"].shape[-1]
    G = global_feature.shape[-1]
    NU = N * up_factor
    out_dim = params["output_proj"][-1]["w"].shape[-1]
    num_blocks = len(params["blocks"])

    # ----- Kernel A: embed + transformer blocks + upsample block -----
    weights_a = _flatten_mlp(params["pos_embed"]) + _flatten_mlp(params["input_proj"])
    for blk in params["blocks"]:
        weights_a += _flatten_block(blk)
    weights_a += _flatten_block(params["upsample"])

    in_specs_a = [pl.BlockSpec((1, N, 3), lambda b: (b, 0, 0)),
                  pl.BlockSpec((1, N, in_dim), lambda b: (b, 0, 0)),
                  _weight_spec(params["center_seed_token"])]
    in_specs_a += [_weight_spec(w) for w in weights_a]

    ups, center_embed = pl.pallas_call(
        functools.partial(_encoder_kernel, num_blocks=num_blocks,
                          num_heads=num_heads, up_factor=up_factor,
                          n_tokens=N, embed_dim=E, eps=LN_EPS),
        out_shape=(jax.ShapeDtypeStruct((B, N, up_factor * E), jnp.float32),
                   jax.ShapeDtypeStruct((B, 1, E), jnp.float32)),
        grid=(B,),
        in_specs=in_specs_a,
        out_specs=(pl.BlockSpec((1, N, up_factor * E), lambda b: (b, 0, 0)),
                   pl.BlockSpec((1, 1, E), lambda b: (b, 0, 0))),
        compiler_params=pltpu.CompilerParams(
            dimension_semantics=("parallel",),          # B>=2 keeps both v7x TCs busy
            vmem_limit_bytes=32 * 1024 * 1024),
    )(partial_xyz, partial_features, params["center_seed_token"], *weights_a)

    # Row-major chunk split: token s, chunk u -> output row s*up_factor + u.
    # Left to XLA (trivial reshape) to avoid an in-kernel lane->sublane relayout.
    # TODO(synk): exact UpsampleTransformerBlock reshape convention assumed.
    upsampled = ups.reshape(B, NU, E)

    # ----- Kernel B: output_proj + center_mlp + offset_mlp + glue -----
    n_out = len(params["output_proj"])
    n_ctr = len(params["center_mlp"])
    n_off = len(params["offset_mlp"])
    weights_b = (_flatten_mlp(params["output_proj"]) + _flatten_mlp(params["center_mlp"])
                 + _flatten_mlp(params["offset_mlp"]))

    in_specs_b = [pl.BlockSpec((1, NU, E), lambda b: (b, 0, 0)),
                  pl.BlockSpec((1, 1, E), lambda b: (b, 0, 0)),
                  pl.BlockSpec((1, 1, G), lambda b: (b, 0, 0))]
    in_specs_b += [_weight_spec(w) for w in weights_b]

    seed_xyz, seed_features, object_center = pl.pallas_call(
        functools.partial(_head_kernel, n_out=n_out, n_ctr=n_ctr, n_off=n_off),
        out_shape=(jax.ShapeDtypeStruct((B, NU, 3), jnp.float32),
                   jax.ShapeDtypeStruct((B, NU, out_dim), jnp.float32),
                   jax.ShapeDtypeStruct((B, 1, 3), jnp.float32)),
        grid=(B,),
        in_specs=in_specs_b,
        out_specs=(pl.BlockSpec((1, NU, 3), lambda b: (b, 0, 0)),
                   pl.BlockSpec((1, NU, out_dim), lambda b: (b, 0, 0)),
                   pl.BlockSpec((1, 1, 3), lambda b: (b, 0, 0))),
        compiler_params=pltpu.CompilerParams(
            dimension_semantics=("parallel",),
            vmem_limit_bytes=32 * 1024 * 1024),
    )(upsampled, center_embed, global_feature, *weights_b)

    return seed_xyz, seed_features, object_center


# ---------------------------------------------------------------------------
# Main
# ---------------------------------------------------------------------------

if __name__ == "__main__":
    B, N = 2, 8
    in_dim, out_dim, global_dim, embed_dim = 16, 32, 16, 32
    num_blocks, num_heads, up_factor = 2, 4, 2

    root = jax.random.PRNGKey(0)
    k_param, k_xyz, k_feat, k_glob = jax.random.split(root, 4)

    params = init_params(k_param, in_dim, out_dim, global_dim, embed_dim,
                         num_blocks, up_factor)

    partial_xyz = jax.random.normal(k_xyz, (B, N, 3), jnp.float32)
    partial_features = jax.random.normal(k_feat, (B, N, in_dim), jnp.float32)
    global_feature = jax.random.normal(k_glob, (B, 1, global_dim), jnp.float32)

    fwd = jax.jit(functools.partial(robust_seed_generator_forward,
                                    num_heads=num_heads, up_factor=up_factor))
    seed_xyz, seed_features, object_center = fwd(
        params, partial_xyz, partial_features, global_feature)
    jax.block_until_ready((seed_xyz, seed_features, object_center))

    assert seed_xyz.shape == (B, N * up_factor, 3)
    assert seed_features.shape == (B, N * up_factor, out_dim)
    assert object_center.shape == (B, 1, 3)
    assert jnp.all(jnp.isfinite(seed_xyz))
    assert jnp.all(jnp.isfinite(seed_features))
    assert jnp.all(jnp.isfinite(object_center))
    print("KERNEL_OK")
</pallas_src>

<mosaic_0001>
module attributes {stable_mosaic.version = 11 : i64} {
  func.func @_head_kernel(%arg0: i32, %arg1: memref<1x16x32xf32, #tpu.memory_space<vmem>>, %arg2: memref<1x1x32xf32, #tpu.memory_space<vmem>>, %arg3: memref<1x1x16xf32, #tpu.memory_space<vmem>>, %arg4: memref<32x16xbf16, #tpu.memory_space<vmem>>, %arg5: memref<1x16xf32, #tpu.memory_space<vmem>>, %arg6: memref<16x32xbf16, #tpu.memory_space<vmem>>, %arg7: memref<1x32xf32, #tpu.memory_space<vmem>>, %arg8: memref<48x32xbf16, #tpu.memory_space<vmem>>, %arg9: memref<1x32xf32, #tpu.memory_space<vmem>>, %arg10: memref<32x16xbf16, #tpu.memory_space<vmem>>, %arg11: memref<1x16xf32, #tpu.memory_space<vmem>>, %arg12: memref<16x3xbf16, #tpu.memory_space<vmem>>, %arg13: memref<1x3xf32, #tpu.memory_space<vmem>>, %arg14: memref<80x32xbf16, #tpu.memory_space<vmem>>, %arg15: memref<1x32xf32, #tpu.memory_space<vmem>>, %arg16: memref<32x16xbf16, #tpu.memory_space<vmem>>, %arg17: memref<1x16xf32, #tpu.memory_space<vmem>>, %arg18: memref<16x3xbf16, #tpu.memory_space<vmem>>, %arg19: memref<1x3xf32, #tpu.memory_space<vmem>>, %arg20: memref<1x16x3xf32, #tpu.memory_space<vmem>>, %arg21: memref<1x16x32xf32, #tpu.memory_space<vmem>>, %arg22: memref<1x1x3xf32, #tpu.memory_space<vmem>>) attributes {dimension_semantics = [#tpu.dimension_semantics<parallel>], iteration_bounds = array<i64: 2>, scalar_prefetch = 0 : i64, scratch_operands = 0 : i64, tpu.core_type = #tpu.core_type<tc>, window_params = [{transform_indices = @transform_0, window_bounds = array<i64: 1, 16, 32>}, {transform_indices = @transform_1, window_bounds = array<i64: 1, 1, 32>}, {transform_indices = @transform_2, window_bounds = array<i64: 1, 1, 16>}, {pipeline_mode = #tpu.pipeline_mode<synchronous>, transform_indices = @transform_3, window_bounds = array<i64: 32, 16>}, {pipeline_mode = #tpu.pipeline_mode<synchronous>, transform_indices = @transform_4, window_bounds = array<i64: 1, 16>}, {pipeline_mode = #tpu.pipeline_mode<synchronous>, transform_indices = @transform_5, window_bounds = array<i64: 16, 32>}, {pipeline_mode = #tpu.pipeline_mode<synchronous>, transform_indices = @transform_6, window_bounds = array<i64: 1, 32>}, {pipeline_mode = #tpu.pipeline_mode<synchronous>, transform_indices = @transform_7, window_bounds = array<i64: 48, 32>}, {pipeline_mode = #tpu.pipeline_mode<synchronous>, transform_indices = @transform_8, window_bounds = array<i64: 1, 32>}, {pipeline_mode = #tpu.pipeline_mode<synchronous>, transform_indices = @transform_9, window_bounds = array<i64: 32, 16>}, {pipeline_mode = #tpu.pipeline_mode<synchronous>, transform_indices = @transform_10, window_bounds = array<i64: 1, 16>}, {pipeline_mode = #tpu.pipeline_mode<synchronous>, transform_indices = @transform_11, window_bounds = array<i64: 16, 3>}, {pipeline_mode = #tpu.pipeline_mode<synchronous>, transform_indices = @transform_12, window_bounds = array<i64: 1, 3>}, {pipeline_mode = #tpu.pipeline_mode<synchronous>, transform_indices = @transform_13, window_bounds = array<i64: 80, 32>}, {pipeline_mode = #tpu.pipeline_mode<synchronous>, transform_indices = @transform_14, window_bounds = array<i64: 1, 32>}, {pipeline_mode = #tpu.pipeline_mode<synchronous>, transform_indices = @transform_15, window_bounds = array<i64: 32, 16>}, {pipeline_mode = #tpu.pipeline_mode<synchronous>, transform_indices = @transform_16, window_bounds = array<i64: 1, 16>}, {pipeline_mode = #tpu.pipeline_mode<synchronous>, transform_indices = @transform_17, window_bounds = array<i64: 16, 3>}, {pipeline_mode = #tpu.pipeline_mode<synchronous>, transform_indices = @transform_18, window_bounds = array<i64: 1, 3>}, {transform_indices = @transform_19, window_bounds = array<i64: 1, 16, 3>}, {transform_indices = @transform_20, window_bounds = array<i64: 1, 16, 32>}, {transform_indices = @transform_21, window_bounds = array<i64: 1, 1, 3>}]} {
    %c0 = arith.constant 0 : index
    %c0_0 = arith.constant 0 : index
    %c0_1 = arith.constant 0 : index
    %0 = vector.load %arg1[%c0, %c0_0, %c0_1] : memref<1x16x32xf32, #tpu.memory_space<vmem>>, vector<1x16x32xf32>
    %1 = vector.shape_cast %0 : vector<1x16x32xf32> to vector<16x32xf32>
    %c0_2 = arith.constant 0 : index
    %c0_3 = arith.constant 0 : index
    %2 = vector.load %arg4[%c0_2, %c0_3] : memref<32x16xbf16, #tpu.memory_space<vmem>>, vector<32x16xbf16>
    %3 = arith.truncf %1 : vector<16x32xf32> to vector<16x32xbf16>
    %cst = arith.constant dense<0.000000e+00> : vector<16x16xf32>
    %4 = tpu.matmul %3, %2, %cst {dimension_numbers = #tpu.dot_dimension_numbers<[1], [0], [0], [1], [0, 0, 1, 1], [], []>} : vector<16x32xbf16>, vector<32x16xbf16>, vector<16x16xf32> -> vector<16x16xf32>
    %c0_4 = arith.constant 0 : index
    %c0_5 = arith.constant 0 : index
    %5 = vector.load %arg5[%c0_4, %c0_5] : memref<1x16xf32, #tpu.memory_space<vmem>>, vector<1x16xf32>
    %6 = vector.broadcast %5 : vector<1x16xf32> to vector<16x16xf32>
    %7 = arith.addf %4, %6 : vector<16x16xf32>
    %cst_6 = arith.constant 0.000000e+00 : f32
    %8 = vector.broadcast %cst_6 : f32 to vector<16x16xf32>
    %9 = arith.maximumf %7, %8 : vector<16x16xf32>
    %c0_7 = arith.constant 0 : index
    %c0_8 = arith.constant 0 : index
    %10 = vector.load %arg6[%c0_7, %c0_8] : memref<16x32xbf16, #tpu.memory_space<vmem>>, vector<16x32xbf16>
    %11 = arith.truncf %9 : vector<16x16xf32> to vector<16x16xbf16>
    %cst_9 = arith.constant dense<0.000000e+00> : vector<16x32xf32>
    %12 = tpu.matmul %11, %10, %cst_9 {dimension_numbers = #tpu.dot_dimension_numbers<[1], [0], [0], [1], [0, 0, 1, 1], [], []>} : vector<16x16xbf16>, vector<16x32xbf16>, vector<16x32xf32> -> vector<16x32xf32>
    %c0_10 = arith.constant 0 : index
    %c0_11 = arith.constant 0 : index
    %13 = vector.load %arg7[%c0_10, %c0_11] : memref<1x32xf32, #tpu.memory_space<vmem>>, vector<1x32xf32>
    %14 = vector.broadcast %13 : vector<1x32xf32> to vector<16x32xf32>
    %15 = arith.addf %12, %14 : vector<16x32xf32>
    %c0_12 = arith.constant 0 : index
    %c0_13 = arith.constant 0 : index
    %c0_14 = arith.constant 0 : index
    %16 = vector.load %arg2[%c0_12, %c0_13, %c0_14] : memref<1x1x32xf32, #tpu.memory_space<vmem>>, vector<1x1x32xf32>
    %17 = vector.shape_cast %16 : vector<1x1x32xf32> to vector<1x32xf32>
    %c0_15 = arith.constant 0 : index
    %c0_16 = arith.constant 0 : index
    %c0_17 = arith.constant 0 : index
    %18 = vector.load %arg3[%c0_15, %c0_16, %c0_17] : memref<1x1x16xf32, #tpu.memory_space<vmem>>, vector<1x1x16xf32>
    %19 = vector.shape_cast %18 : vector<1x1x16xf32> to vector<1x16xf32>
    %20 = tpu.concatenate %17, %19 in 1 : vector<1x32xf32>, vector<1x16xf32> -> vector<1x48xf32>
    %c0_18 = arith.constant 0 : index
    %c0_19 = arith.constant 0 : index
    %21 = vector.load %arg8[%c0_18, %c0_19] : memref<48x32xbf16, #tpu.memory_space<vmem>>, vector<48x32xbf16>
    %22 = arith.truncf %20 : vector<1x48xf32> to vector<1x48xbf16>
    %cst_20 = arith.constant dense<0.000000e+00> : vector<1x32xf32>
    %23 = tpu.matmul %22, %21, %cst_20 {dimension_numbers = #tpu.dot_dimension_numbers<[1], [0], [0], [1], [0, 0, 1, 1], [], []>} : vector<1x48xbf16>, vector<48x32xbf16>, vector<1x32xf32> -> vector<1x32xf32>
    %c0_21 = arith.constant 0 : index
    %c0_22 = arith.constant 0 : index
    %24 = vector.load %arg9[%c0_21, %c0_22] : memref<1x32xf32, #tpu.memory_space<vmem>>, vector<1x32xf32>
    %25 = arith.addf %23, %24 : vector<1x32xf32>
    %cst_23 = arith.constant 0.000000e+00 : f32
    %26 = vector.broadcast %cst_23 : f32 to vector<1x32xf32>
    %27 = arith.maximumf %25, %26 : vector<1x32xf32>
    %c0_24 = arith.constant 0 : index
    %c0_25 = arith.constant 0 : index
    %28 = vector.load %arg10[%c0_24, %c0_25] : memref<32x16xbf16, #tpu.memory_space<vmem>>, vector<32x16xbf16>
    %29 = arith.truncf %27 : vector<1x32xf32> to vector<1x32xbf16>
    %cst_26 = arith.constant dense<0.000000e+00> : vector<1x16xf32>
    %30 = tpu.matmul %29, %28, %cst_26 {dimension_numbers = #tpu.dot_dimension_numbers<[1], [0], [0], [1], [0, 0, 1, 1], [], []>} : vector<1x32xbf16>, vector<32x16xbf16>, vector<1x16xf32> -> vector<1x16xf32>
    %c0_27 = arith.constant 0 : index
    %c0_28 = arith.constant 0 : index
    %31 = vector.load %arg11[%c0_27, %c0_28] : memref<1x16xf32, #tpu.memory_space<vmem>>, vector<1x16xf32>
    %32 = arith.addf %30, %31 : vector<1x16xf32>
    %cst_29 = arith.constant 0.000000e+00 : f32
    %33 = vector.broadcast %cst_29 : f32 to vector<1x16xf32>
    %34 = arith.maximumf %32, %33 : vector<1x16xf32>
    %c0_30 = arith.constant 0 : index
    %c0_31 = arith.constant 0 : index
    %35 = vector.load %arg12[%c0_30, %c0_31] : memref<16x3xbf16, #tpu.memory_space<vmem>>, vector<16x3xbf16>
    %36 = arith.truncf %34 : vector<1x16xf32> to vector<1x16xbf16>
    %cst_32 = arith.constant dense<0.000000e+00> : vector<1x3xf32>
    %37 = tpu.matmul %36, %35, %cst_32 {dimension_numbers = #tpu.dot_dimension_numbers<[1], [0], [0], [1], [0, 0, 1, 1], [], []>} : vector<1x16xbf16>, vector<16x3xbf16>, vector<1x3xf32> -> vector<1x3xf32>
    %c0_33 = arith.constant 0 : index
    %c0_34 = arith.constant 0 : index
    %38 = vector.load %arg13[%c0_33, %c0_34] : memref<1x3xf32, #tpu.memory_space<vmem>>, vector<1x3xf32>
    %39 = arith.addf %37, %38 : vector<1x3xf32>
    %40 = vector.shape_cast %20 : vector<1x48xf32> to vector<1x48xf32>
    %41 = vector.broadcast %40 : vector<1x48xf32> to vector<16x48xf32>
    %42 = tpu.concatenate %15, %41 in 1 : vector<16x32xf32>, vector<16x48xf32> -> vector<16x80xf32>
    %c0_35 = arith.constant 0 : index
    %c0_36 = arith.constant 0 : index
    %43 = vector.load %arg14[%c0_35, %c0_36] : memref<80x32xbf16, #tpu.memory_space<vmem>>, vector<80x32xbf16>
    %44 = arith.truncf %42 : vector<16x80xf32> to vector<16x80xbf16>
    %cst_37 = arith.constant dense<0.000000e+00> : vector<16x32xf32>
    %45 = tpu.matmul %44, %43, %cst_37 {dimension_numbers = #tpu.dot_dimension_numbers<[1], [0], [0], [1], [0, 0, 1, 1], [], []>} : vector<16x80xbf16>, vector<80x32xbf16>, vector<16x32xf32> -> vector<16x32xf32>
    %c0_38 = arith.constant 0 : index
    %c0_39 = arith.constant 0 : index
    %46 = vector.load %arg15[%c0_38, %c0_39] : memref<1x32xf32, #tpu.memory_space<vmem>>, vector<1x32xf32>
    %47 = vector.broadcast %46 : vector<1x32xf32> to vector<16x32xf32>
    %48 = arith.addf %45, %47 : vector<16x32xf32>
    %cst_40 = arith.constant 0.000000e+00 : f32
    %49 = vector.broadcast %cst_40 : f32 to vector<16x32xf32>
    %50 = arith.maximumf %48, %49 : vector<16x32xf32>
    %c0_41 = arith.constant 0 : index
    %c0_42 = arith.constant 0 : index
    %51 = vector.load %arg16[%c0_41, %c0_42] : memref<32x16xbf16, #tpu.memory_space<vmem>>, vector<32x16xbf16>
    %52 = arith.truncf %50 : vector<16x32xf32> to vector<16x32xbf16>
    %cst_43 = arith.constant dense<0.000000e+00> : vector<16x16xf32>
    %53 = tpu.matmul %52, %51, %cst_43 {dimension_numbers = #tpu.dot_dimension_numbers<[1], [0], [0], [1], [0, 0, 1, 1], [], []>} : vector<16x32xbf16>, vector<32x16xbf16>, vector<16x16xf32> -> vector<16x16xf32>
    %c0_44 = arith.constant 0 : index
    %c0_45 = arith.constant 0 : index
    %54 = vector.load %arg17[%c0_44, %c0_45] : memref<1x16xf32, #tpu.memory_space<vmem>>, vector<1x16xf32>
    %55 = vector.broadcast %54 : vector<1x16xf32> to vector<16x16xf32>
    %56 = arith.addf %53, %55 : vector<16x16xf32>
    %cst_46 = arith.constant 0.000000e+00 : f32
    %57 = vector.broadcast %cst_46 : f32 to vector<16x16xf32>
    %58 = arith.maximumf %56, %57 : vector<16x16xf32>
    %c0_47 = arith.constant 0 : index
    %c0_48 = arith.constant 0 : index
    %59 = vector.load %arg18[%c0_47, %c0_48] : memref<16x3xbf16, #tpu.memory_space<vmem>>, vector<16x3xbf16>
    %60 = arith.truncf %58 : vector<16x16xf32> to vector<16x16xbf16>
    %cst_49 = arith.constant dense<0.000000e+00> : vector<16x3xf32>
    %61 = tpu.matmul %60, %59, %cst_49 {dimension_numbers = #tpu.dot_dimension_numbers<[1], [0], [0], [1], [0, 0, 1, 1], [], []>} : vector<16x16xbf16>, vector<16x3xbf16>, vector<16x3xf32> -> vector<16x3xf32>
    %c0_50 = arith.constant 0 : index
    %c0_51 = arith.constant 0 : index
    %62 = vector.load %arg19[%c0_50, %c0_51] : memref<1x3xf32, #tpu.memory_space<vmem>>, vector<1x3xf32>
    %63 = vector.broadcast %62 : vector<1x3xf32> to vector<16x3xf32>
    %64 = arith.addf %61, %63 : vector<16x3xf32>
    %c0_52 = arith.constant 0 : index
    %c0_53 = arith.constant 0 : index
    %c0_54 = arith.constant 0 : index
    %65 = vector.load %arg21[%c0_52, %c0_53, %c0_54] : memref<1x16x32xf32, #tpu.memory_space<vmem>>, vector<1x16x32xf32>
    %66 = vector.shape_cast %65 : vector<1x16x32xf32> to vector<16x32xf32>
    %67 = vector.shape_cast %15 : vector<16x32xf32> to vector<1x16x32xf32>
    tpu.vector_store %arg21[%c0_52, %c0_53, %c0_54], %67 {strides = array<i32>} : memref<1x16x32xf32, #tpu.memory_space<vmem>>, vector<1x16x32xf32>,
    %c0_55 = arith.constant 0 : index
    %c0_56 = arith.constant 0 : index
    %c0_57 = arith.constant 0 : index
    %68 = vector.load %arg22[%c0_55, %c0_56, %c0_57] : memref<1x1x3xf32, #tpu.memory_space<vmem>>, vector<1x1x3xf32>
    %69 = vector.shape_cast %68 : vector<1x1x3xf32> to vector<1x3xf32>
    %70 = vector.shape_cast %39 : vector<1x3xf32> to vector<1x1x3xf32>
    tpu.vector_store %arg22[%c0_55, %c0_56, %c0_57], %70 {strides = array<i32>} : memref<1x1x3xf32, #tpu.memory_space<vmem>>, vector<1x1x3xf32>,
    %71 = vector.broadcast %39 : vector<1x3xf32> to vector<16x3xf32>
    %72 = arith.addf %71, %64 : vector<16x3xf32>
    %c0_58 = arith.constant 0 : index
    %c0_59 = arith.constant 0 : index
    %c0_60 = arith.constant 0 : index
    %73 = vector.load %arg20[%c0_58, %c0_59, %c0_60] : memref<1x16x3xf32, #tpu.memory_space<vmem>>, vector<1x16x3xf32>
    %74 = vector.shape_cast %73 : vector<1x16x3xf32> to vector<16x3xf32>
    %75 = vector.shape_cast %72 : vector<16x3xf32> to vector<1x16x3xf32>
    tpu.vector_store %arg20[%c0_58, %c0_59, %c0_60], %75 {strides = array<i32>} : memref<1x16x3xf32, #tpu.memory_space<vmem>>, vector<1x16x3xf32>,
    return
  }
  func.func @transform_0(%arg0: i32) -> (i32, i32, i32) {
    %c0_i32 = arith.constant 0 : i32
    %c0_i32_0 = arith.constant 0 : i32
    %c0_i32_1 = arith.constant 0 : i32
    return %arg0, %c0_i32, %c0_i32_0 : i32, i32, i32
  }
  func.func @transform_1(%arg0: i32) -> (i32, i32, i32) {
    %c0_i32 = arith.constant 0 : i32
    %c0_i32_0 = arith.constant 0 : i32
    %c0_i32_1 = arith.constant 0 : i32
    return %arg0, %c0_i32, %c0_i32_0 : i32, i32, i32
  }
  func.func @transform_2(%arg0: i32) -> (i32, i32, i32) {
    %c0_i32 = arith.constant 0 : i32
    %c0_i32_0 = arith.constant 0 : i32
    %c0_i32_1 = arith.constant 0 : i32
    return %arg0, %c0_i32, %c0_i32_0 : i32, i32, i32
  }
  func.func @transform_3(%arg0: i32) -> (i32, i32) {
    %c0_i32 = arith.constant 0 : i32
    %c0_i32_0 = arith.constant 0 : i32
    %c0_i32_1 = arith.constant 0 : i32
    return %c0_i32, %c0_i32_0 : i32, i32
  }
  func.func @transform_4(%arg0: i32) -> (i32, i32) {
    %c0_i32 = arith.constant 0 : i32
    %c0_i32_0 = arith.constant 0 : i32
    %c0_i32_1 = arith.constant 0 : i32
    return %c0_i32, %c0_i32_0 : i32, i32
  }
  func.func @transform_5(%arg0: i32) -> (i32, i32) {
    %c0_i32 = arith.constant 0 : i32
    %c0_i32_0 = arith.constant 0 : i32
    %c0_i32_1 = arith.constant 0 : i32
    return %c0_i32, %c0_i32_0 : i32, i32
  }
  func.func @transform_6(%arg0: i32) -> (i32, i32) {
    %c0_i32 = arith.constant 0 : i32
    %c0_i32_0 = arith.constant 0 : i32
    %c0_i32_1 = arith.constant 0 : i32
    return %c0_i32, %c0_i32_0 : i32, i32
  }
  func.func @transform_7(%arg0: i32) -> (i32, i32) {
    %c0_i32 = arith.constant 0 : i32
    %c0_i32_0 = arith.constant 0 : i32
    %c0_i32_1 = arith.constant 0 : i32
    return %c0_i32, %c0_i32_0 : i32, i32
  }
  func.func @transform_8(%arg0: i32) -> (i32, i32) {
    %c0_i32 = arith.constant 0 : i32
    %c0_i32_0 = arith.constant 0 : i32
    %c0_i32_1 = arith.constant 0 : i32
    return %c0_i32, %c0_i32_0 : i32, i32
  }
  func.func @transform_9(%arg0: i32) -> (i32, i32) {
    %c0_i32 = arith.constant 0 : i32
    %c0_i32_0 = arith.constant 0 : i32
    %c0_i32_1 = arith.constant 0 : i32
    return %c0_i32, %c0_i32_0 : i32, i32
  }
  func.func @transform_10(%arg0: i32) -> (i32, i32) {
    %c0_i32 = arith.constant 0 : i32
    %c0_i32_0 = arith.constant 0 : i32
    %c0_i32_1 = arith.constant 0 : i32
    return %c0_i32, %c0_i32_0 : i32, i32
  }
  func.func @transform_11(%arg0: i32) -> (i32, i32) {
    %c0_i32 = arith.constant 0 : i32
    %c0_i32_0 = arith.constant 0 : i32
    %c0_i32_1 = arith.constant 0 : i32
    return %c0_i32, %c0_i32_0 : i32, i32
  }
  func.func @transform_12(%arg0: i32) -> (i32, i32) {
    %c0_i32 = arith.constant 0 : i32
    %c0_i32_0 = arith.constant 0 : i32
    %c0_i32_1 = arith.constant 0 : i32
    return %c0_i32, %c0_i32_0 : i32, i32
  }
  func.func @transform_13(%arg0: i32) -> (i32, i32) {
    %c0_i32 = arith.constant 0 : i32
    %c0_i32_0 = arith.constant 0 : i32
    %c0_i32_1 = arith.constant 0 : i32
    return %c0_i32, %c0_i32_0 : i32, i32
  }
  func.func @transform_14(%arg0: i32) -> (i32, i32) {
    %c0_i32 = arith.constant 0 : i32
    %c0_i32_0 = arith.constant 0 : i32
    %c0_i32_1 = arith.constant 0 : i32
    return %c0_i32, %c0_i32_0 : i32, i32
  }
  func.func @transform_15(%arg0: i32) -> (i32, i32) {
    %c0_i32 = arith.constant 0 : i32
    %c0_i32_0 = arith.constant 0 : i32
    %c0_i32_1 = arith.constant 0 : i32
    return %c0_i32, %c0_i32_0 : i32, i32
  }
  func.func @transform_16(%arg0: i32) -> (i32, i32) {
    %c0_i32 = arith.constant 0 : i32
    %c0_i32_0 = arith.constant 0 : i32
    %c0_i32_1 = arith.constant 0 : i32
    return %c0_i32, %c0_i32_0 : i32, i32
  }
  func.func @transform_17(%arg0: i32) -> (i32, i32) {
    %c0_i32 = arith.constant 0 : i32
    %c0_i32_0 = arith.constant 0 : i32
    %c0_i32_1 = arith.constant 0 : i32
    return %c0_i32, %c0_i32_0 : i32, i32
  }
  func.func @transform_18(%arg0: i32) -> (i32, i32) {
    %c0_i32 = arith.constant 0 : i32
    %c0_i32_0 = arith.constant 0 : i32
    %c0_i32_1 = arith.constant 0 : i32
    return %c0_i32, %c0_i32_0 : i32, i32
  }
  func.func @transform_19(%arg0: i32) -> (i32, i32, i32) {
    %c0_i32 = arith.constant 0 : i32
    %c0_i32_0 = arith.constant 0 : i32
    %c0_i32_1 = arith.constant 0 : i32
    return %arg0, %c0_i32, %c0_i32_0 : i32, i32, i32
  }
  func.func @transform_20(%arg0: i32) -> (i32, i32, i32) {
    %c0_i32 = arith.constant 0 : i32
    %c0_i32_0 = arith.constant 0 : i32
    %c0_i32_1 = arith.constant 0 : i32
    return %arg0, %c0_i32, %c0_i32_0 : i32, i32, i32
  }
  func.func @transform_21(%arg0: i32) -> (i32, i32, i32) {
    %c0_i32 = arith.constant 0 : i32
    %c0_i32_0 = arith.constant 0 : i32
    %c0_i32_1 = arith.constant 0 : i32
    return %arg0, %c0_i32, %c0_i32_0 : i32, i32, i32
  }
}

module attributes {stable_mosaic.version = 11 : i64} {
  func.func @_encoder_kernel(%arg0: i32, %arg1: memref<1x8x3xf32, #tpu.memory_space<vmem>>, %arg2: memref<1x8x16xf32, #tpu.memory_space<vmem>>, %arg3: memref<1x32xf32, #tpu.memory_space<vmem>>, %arg4: memref<3x8xbf16, #tpu.memory_space<vmem>>, %arg5: memref<1x8xf32, #tpu.memory_space<vmem>>, %arg6: memref<8x32xbf16, #tpu.memory_space<vmem>>, %arg7: memref<1x32xf32, #tpu.memory_space<vmem>>, %arg8: memref<16x8xbf16, #tpu.memory_space<vmem>>, %arg9: memref<1x8xf32, #tpu.memory_space<vmem>>, %arg10: memref<8x32xbf16, #tpu.memory_space<vmem>>, %arg11: memref<1x32xf32, #tpu.memory_space<vmem>>, %arg12: memref<1x32xf32, #tpu.memory_space<vmem>>, %arg13: memref<1x32xf32, #tpu.memory_space<vmem>>, %arg14: memref<32x96xbf16, #tpu.memory_space<vmem>>, %arg15: memref<1x96xf32, #tpu.memory_space<vmem>>, %arg16: memref<32x32xbf16, #tpu.memory_space<vmem>>, %arg17: memref<1x32xf32, #tpu.memory_space<vmem>>, %arg18: memref<1x32xf32, #tpu.memory_space<vmem>>, %arg19: memref<1x32xf32, #tpu.memory_space<vmem>>, %arg20: memref<32x128xbf16, #tpu.memory_space<vmem>>, %arg21: memref<1x128xf32, #tpu.memory_space<vmem>>, %arg22: memref<128x32xbf16, #tpu.memory_space<vmem>>, %arg23: memref<1x32xf32, #tpu.memory_space<vmem>>, %arg24: memref<1x32xf32, #tpu.memory_space<vmem>>, %arg25: memref<1x32xf32, #tpu.memory_space<vmem>>, %arg26: memref<32x96xbf16, #tpu.memory_space<vmem>>, %arg27: memref<1x96xf32, #tpu.memory_space<vmem>>, %arg28: memref<32x32xbf16, #tpu.memory_space<vmem>>, %arg29: memref<1x32xf32, #tpu.memory_space<vmem>>, %arg30: memref<1x32xf32, #tpu.memory_space<vmem>>, %arg31: memref<1x32xf32, #tpu.memory_space<vmem>>, %arg32: memref<32x128xbf16, #tpu.memory_space<vmem>>, %arg33: memref<1x128xf32, #tpu.memory_space<vmem>>, %arg34: memref<128x32xbf16, #tpu.memory_space<vmem>>, %arg35: memref<1x32xf32, #tpu.memory_space<vmem>>, %arg36: memref<1x32xf32, #tpu.memory_space<vmem>>, %arg37: memref<1x32xf32, #tpu.memory_space<vmem>>, %arg38: memref<32x96xbf16, #tpu.memory_space<vmem>>, %arg39: memref<1x96xf32, #tpu.memory_space<vmem>>, %arg40: memref<32x32xbf16, #tpu.memory_space<vmem>>, %arg41: memref<1x32xf32, #tpu.memory_space<vmem>>, %arg42: memref<1x32xf32, #tpu.memory_space<vmem>>, %arg43: memref<1x32xf32, #tpu.memory_space<vmem>>, %arg44: memref<32x128xbf16, #tpu.memory_space<vmem>>, %arg45: memref<1x128xf32, #tpu.memory_space<vmem>>, %arg46: memref<128x64xbf16, #tpu.memory_space<vmem>>, %arg47: memref<1x64xf32, #tpu.memory_space<vmem>>, %arg48: memref<1x8x64xf32, #tpu.memory_space<vmem>>, %arg49: memref<1x1x32xf32, #tpu.memory_space<vmem>>) attributes {dimension_semantics = [#tpu.dimension_semantics<parallel>], iteration_bounds = array<i64: 2>, scalar_prefetch = 0 : i64, scratch_operands = 0 : i64, tpu.core_type = #tpu.core_type<tc>, window_params = [{transform_indices = @transform_0, window_bounds = array<i64: 1, 8, 3>}, {transform_indices = @transform_1, window_bounds = array<i64: 1, 8, 16>}, {pipeline_mode = #tpu.pipeline_mode<synchronous>, transform_indices = @transform_2, window_bounds = array<i64: 1, 32>}, {pipeline_mode = #tpu.pipeline_mode<synchronous>, transform_indices = @transform_3, window_bounds = array<i64: 3, 8>}, {pipeline_mode = #tpu.pipeline_mode<synchronous>, transform_indices = @transform_4, window_bounds = array<i64: 1, 8>}, {pipeline_mode = #tpu.pipeline_mode<synchronous>, transform_indices = @transform_5, window_bounds = array<i64: 8, 32>}, {pipeline_mode = #tpu.pipeline_mode<synchronous>, transform_indices = @transform_6, window_bounds = array<i64: 1, 32>}, {pipeline_mode = #tpu.pipeline_mode<synchronous>, transform_indices = @transform_7, window_bounds = array<i64: 16, 8>}, {pipeline_mode = #tpu.pipeline_mode<synchronous>, transform_indices = @transform_8, window_bounds = array<i64: 1, 8>}, {pipeline_mode = #tpu.pipeline_mode<synchronous>, transform_indices = @transform_9, window_bounds = array<i64: 8, 32>}, {pipeline_mode = #tpu.pipeline_mode<synchronous>, transform_indices = @transform_10, window_bounds = array<i64: 1, 32>}, {pipeline_mode = #tpu.pipeline_mode<synchronous>, transform_indices = @transform_11, window_bounds = array<i64: 1, 32>}, {pipeline_mode = #tpu.pipeline_mode<synchronous>, transform_indices = @transform_12, window_bounds = array<i64: 1, 32>}, {pipeline_mode = #tpu.pipeline_mode<synchronous>, transform_indices = @transform_13, window_bounds = array<i64: 32, 96>}, {pipeline_mode = #tpu.pipeline_mode<synchronous>, transform_indices = @transform_14, window_bounds = array<i64: 1, 96>}, {pipeline_mode = #tpu.pipeline_mode<synchronous>, transform_indices = @transform_15, window_bounds = array<i64: 32, 32>}, {pipeline_mode = #tpu.pipeline_mode<synchronous>, transform_indices = @transform_16, window_bounds = array<i64: 1, 32>}, {pipeline_mode = #tpu.pipeline_mode<synchronous>, transform_indices = @transform_17, window_bounds = array<i64: 1, 32>}, {pipeline_mode = #tpu.pipeline_mode<synchronous>, transform_indices = @transform_18, window_bounds = array<i64: 1, 32>}, {pipeline_mode = #tpu.pipeline_mode<synchronous>, transform_indices = @transform_19, window_bounds = array<i64: 32, 128>}, {pipeline_mode = #tpu.pipeline_mode<synchronous>, transform_indices = @transform_20, window_bounds = array<i64: 1, 128>}, {pipeline_mode = #tpu.pipeline_mode<synchronous>, transform_indices = @transform_21, window_bounds = array<i64: 128, 32>}, {pipeline_mode = #tpu.pipeline_mode<synchronous>, transform_indices = @transform_22, window_bounds = array<i64: 1, 32>}, {pipeline_mode = #tpu.pipeline_mode<synchronous>, transform_indices = @transform_23, window_bounds = array<i64: 1, 32>}, {pipeline_mode = #tpu.pipeline_mode<synchronous>, transform_indices = @transform_24, window_bounds = array<i64: 1, 32>}, {pipeline_mode = #tpu.pipeline_mode<synchronous>, transform_indices = @transform_25, window_bounds = array<i64: 32, 96>}, {pipeline_mode = #tpu.pipeline_mode<synchronous>, transform_indices = @transform_26, window_bounds = array<i64: 1, 96>}, {pipeline_mode = #tpu.pipeline_mode<synchronous>, transform_indices = @transform_27, window_bounds = array<i64: 32, 32>}, {pipeline_mode = #tpu.pipeline_mode<synchronous>, transform_indices = @transform_28, window_bounds = array<i64: 1, 32>}, {pipeline_mode = #tpu.pipeline_mode<synchronous>, transform_indices = @transform_29, window_bounds = array<i64: 1, 32>}, {pipeline_mode = #tpu.pipeline_mode<synchronous>, transform_indices = @transform_30, window_bounds = array<i64: 1, 32>}, {pipeline_mode = #tpu.pipeline_mode<synchronous>, transform_indices = @transform_31, window_bounds = array<i64: 32, 128>}, {pipeline_mode = #tpu.pipeline_mode<synchronous>, transform_indices = @transform_32, window_bounds = array<i64: 1, 128>}, {pipeline_mode = #tpu.pipeline_mode<synchronous>, transform_indices = @transform_33, window_bounds = array<i64: 128, 32>}, {pipeline_mode = #tpu.pipeline_mode<synchronous>, transform_indices = @transform_34, window_bounds = array<i64: 1, 32>}, {pipeline_mode = #tpu.pipeline_mode<synchronous>, transform_indices = @transform_35, window_bounds = array<i64: 1, 32>}, {pipeline_mode = #tpu.pipeline_mode<synchronous>, transform_indices = @transform_36, window_bounds = array<i64: 1, 32>}, {pipeline_mode = #tpu.pipeline_mode<synchronous>, transform_indices = @transform_37, window_bounds = array<i64: 32, 96>}, {pipeline_mode = #tpu.pipeline_mode<synchronous>, transform_indices = @transform_38, window_bounds = array<i64: 1, 96>}, {pipeline_mode = #tpu.pipeline_mode<synchronous>, transform_indices = @transform_39, window_bounds = array<i64: 32, 32>}, {pipeline_mode = #tpu.pipeline_mode<synchronous>, transform_indices = @transform_40, window_bounds = array<i64: 1, 32>}, {pipeline_mode = #tpu.pipeline_mode<synchronous>, transform_indices = @transform_41, window_bounds = array<i64: 1, 32>}, {pipeline_mode = #tpu.pipeline_mode<synchronous>, transform_indices = @transform_42, window_bounds = array<i64: 1, 32>}, {pipeline_mode = #tpu.pipeline_mode<synchronous>, transform_indices = @transform_43, window_bounds = array<i64: 32, 128>}, {pipeline_mode = #tpu.pipeline_mode<synchronous>, transform_indices = @transform_44, window_bounds = array<i64: 1, 128>}, {pipeline_mode = #tpu.pipeline_mode<synchronous>, transform_indices = @transform_45, window_bounds = array<i64: 128, 64>}, {pipeline_mode = #tpu.pipeline_mode<synchronous>, transform_indices = @transform_46, window_bounds = array<i64: 1, 64>}, {transform_indices = @transform_47, window_bounds = array<i64: 1, 8, 64>}, {transform_indices = @transform_48, window_bounds = array<i64: 1, 1, 32>}]} {
    %c0 = arith.constant 0 : index
    %c0_0 = arith.constant 0 : index
    %c0_1 = arith.constant 0 : index
    %0 = vector.load %arg1[%c0, %c0_0, %c0_1] : memref<1x8x3xf32, #tpu.memory_space<vmem>>, vector<1x8x3xf32>
    %1 = vector.shape_cast %0 : vector<1x8x3xf32> to vector<8x3xf32>
    %c0_2 = arith.constant 0 : index
    %c0_3 = arith.constant 0 : index
    %2 = vector.load %arg4[%c0_2, %c0_3] : memref<3x8xbf16, #tpu.memory_space<vmem>>, vector<3x8xbf16>
    %3 = arith.truncf %1 : vector<8x3xf32> to vector<8x3xbf16>
    %cst = arith.constant dense<0.000000e+00> : vector<8x8xf32>
    %4 = tpu.matmul %3, %2, %cst {dimension_numbers = #tpu.dot_dimension_numbers<[1], [0], [0], [1], [0, 0, 1, 1], [], []>} : vector<8x3xbf16>, vector<3x8xbf16>, vector<8x8xf32> -> vector<8x8xf32>
    %c0_4 = arith.constant 0 : index
    %c0_5 = arith.constant 0 : index
    %5 = vector.load %arg5[%c0_4, %c0_5] : memref<1x8xf32, #tpu.memory_space<vmem>>, vector<1x8xf32>
    %6 = vector.broadcast %5 : vector<1x8xf32> to vector<8x8xf32>
    %7 = arith.addf %4, %6 : vector<8x8xf32>
    %cst_6 = arith.constant 0.000000e+00 : f32
    %8 = vector.broadcast %cst_6 : f32 to vector<8x8xf32>
    %9 = arith.maximumf %7, %8 : vector<8x8xf32>
    %c0_7 = arith.constant 0 : index
    %c0_8 = arith.constant 0 : index
    %10 = vector.load %arg6[%c0_7, %c0_8] : memref<8x32xbf16, #tpu.memory_space<vmem>>, vector<8x32xbf16>
    %11 = arith.truncf %9 : vector<8x8xf32> to vector<8x8xbf16>
    %cst_9 = arith.constant dense<0.000000e+00> : vector<8x32xf32>
    %12 = tpu.matmul %11, %10, %cst_9 {dimension_numbers = #tpu.dot_dimension_numbers<[1], [0], [0], [1], [0, 0, 1, 1], [], []>} : vector<8x8xbf16>, vector<8x32xbf16>, vector<8x32xf32> -> vector<8x32xf32>
    %c0_10 = arith.constant 0 : index
    %c0_11 = arith.constant 0 : index
    %13 = vector.load %arg7[%c0_10, %c0_11] : memref<1x32xf32, #tpu.memory_space<vmem>>, vector<1x32xf32>
    %14 = vector.broadcast %13 : vector<1x32xf32> to vector<8x32xf32>
    %15 = arith.addf %12, %14 : vector<8x32xf32>
    %c0_12 = arith.constant 0 : index
    %c0_13 = arith.constant 0 : index
    %c0_14 = arith.constant 0 : index
    %16 = vector.load %arg2[%c0_12, %c0_13, %c0_14] : memref<1x8x16xf32, #tpu.memory_space<vmem>>, vector<1x8x16xf32>
    %17 = vector.shape_cast %16 : vector<1x8x16xf32> to vector<8x16xf32>
    %c0_15 = arith.constant 0 : index
    %c0_16 = arith.constant 0 : index
    %18 = vector.load %arg8[%c0_15, %c0_16] : memref<16x8xbf16, #tpu.memory_space<vmem>>, vector<16x8xbf16>
    %19 = arith.truncf %17 : vector<8x16xf32> to vector<8x16xbf16>
    %cst_17 = arith.constant dense<0.000000e+00> : vector<8x8xf32>
    %20 = tpu.matmul %19, %18, %cst_17 {dimension_numbers = #tpu.dot_dimension_numbers<[1], [0], [0], [1], [0, 0, 1, 1], [], []>} : vector<8x16xbf16>, vector<16x8xbf16>, vector<8x8xf32> -> vector<8x8xf32>
    %c0_18 = arith.constant 0 : index
    %c0_19 = arith.constant 0 : index
    %21 = vector.load %arg9[%c0_18, %c0_19] : memref<1x8xf32, #tpu.memory_space<vmem>>, vector<1x8xf32>
    %22 = vector.broadcast %21 : vector<1x8xf32> to vector<8x8xf32>
    %23 = arith.addf %20, %22 : vector<8x8xf32>
    %cst_20 = arith.constant 0.000000e+00 : f32
    %24 = vector.broadcast %cst_20 : f32 to vector<8x8xf32>
    %25 = arith.maximumf %23, %24 : vector<8x8xf32>
    %c0_21 = arith.constant 0 : index
    %c0_22 = arith.constant 0 : index
    %26 = vector.load %arg10[%c0_21, %c0_22] : memref<8x32xbf16, #tpu.memory_space<vmem>>, vector<8x32xbf16>
    %27 = arith.truncf %25 : vector<8x8xf32> to vector<8x8xbf16>
    %cst_23 = arith.constant dense<0.000000e+00> : vector<8x32xf32>
    %28 = tpu.matmul %27, %26, %cst_23 {dimension_numbers = #tpu.dot_dimension_numbers<[1], [0], [0], [1], [0, 0, 1, 1], [], []>} : vector<8x8xbf16>, vector<8x32xbf16>, vector<8x32xf32> -> vector<8x32xf32>
    %c0_24 = arith.constant 0 : index
    %c0_25 = arith.constant 0 : index
    %29 = vector.load %arg11[%c0_24, %c0_25] : memref<1x32xf32, #tpu.memory_space<vmem>>, vector<1x32xf32>
    %30 = vector.broadcast %29 : vector<1x32xf32> to vector<8x32xf32>
    %31 = arith.addf %28, %30 : vector<8x32xf32>
    %32 = arith.addf %15, %31 : vector<8x32xf32>
    %c0_26 = arith.constant 0 : index
    %c0_27 = arith.constant 0 : index
    %33 = vector.load %arg3[%c0_26, %c0_27] : memref<1x32xf32, #tpu.memory_space<vmem>>, vector<1x32xf32>
    %34 = tpu.concatenate %32, %33 in 0 : vector<8x32xf32>, vector<1x32xf32> -> vector<9x32xf32>
    %c0_28 = arith.constant 0 : index
    %c0_29 = arith.constant 0 : index
    %35 = vector.load %arg12[%c0_28, %c0_29] : memref<1x32xf32, #tpu.memory_space<vmem>>, vector<1x32xf32>
    %c0_30 = arith.constant 0 : index
    %c0_31 = arith.constant 0 : index
    %36 = vector.load %arg13[%c0_30, %c0_31] : memref<1x32xf32, #tpu.memory_space<vmem>>, vector<1x32xf32>
    %cst_32 = arith.constant dense<0.000000e+00> : vector<9xf32>
    %37 = vector.multi_reduction <add>, %34, %cst_32 [1] : vector<9x32xf32> to vector<9xf32>
    %38 = vector.shape_cast %37 : vector<9xf32> to vector<9x1xf32>
    %cst_33 = arith.constant 3.200000e+01 : f32
    %39 = vector.broadcast %cst_33 : f32 to vector<9x1xf32>
    %40 = arith.divf %38, %39 : vector<9x1xf32>
    %41 = vector.broadcast %40 : vector<9x1xf32> to vector<9x32xf32>
    %42 = arith.subf %34, %41 : vector<9x32xf32>
    %43 = arith.mulf %42, %42 : vector<9x32xf32>
    %cst_34 = arith.constant dense<0.000000e+00> : vector<9xf32>
    %44 = vector.multi_reduction <add>, %43, %cst_34 [1] : vector<9x32xf32> to vector<9xf32>
    %45 = vector.shape_cast %44 : vector<9xf32> to vector<9x1xf32>
    %cst_35 = arith.constant 3.200000e+01 : f32
    %46 = vector.broadcast %cst_35 : f32 to vector<9x1xf32>
    %47 = arith.divf %45, %46 : vector<9x1xf32>
    %cst_36 = arith.constant 9.99999974E-6 : f32
    %48 = vector.broadcast %cst_36 : f32 to vector<9x1xf32>
    %49 = arith.addf %47, %48 : vector<9x1xf32>
    %50 = math.rsqrt %49 : vector<9x1xf32>
    %51 = vector.broadcast %50 : vector<9x1xf32> to vector<9x32xf32>
    %52 = arith.mulf %42, %51 : vector<9x32xf32>
    %53 = vector.broadcast %35 : vector<1x32xf32> to vector<9x32xf32>
    %54 = arith.mulf %52, %53 : vector<9x32xf32>
    %55 = vector.broadcast %36 : vector<1x32xf32> to vector<9x32xf32>
    %56 = arith.addf %54, %55 : vector<9x32xf32>
    %c0_37 = arith.constant 0 : index
    %c0_38 = arith.constant 0 : index
    %57 = vector.load %arg14[%c0_37, %c0_38] : memref<32x96xbf16, #tpu.memory_space<vmem>>, vector<32x96xbf16>
    %c0_39 = arith.constant 0 : index
    %c0_40 = arith.constant 0 : index
    %58 = vector.load %arg15[%c0_39, %c0_40] : memref<1x96xf32, #tpu.memory_space<vmem>>, vector<1x96xf32>
    %c0_41 = arith.constant 0 : index
    %c0_42 = arith.constant 0 : index
    %59 = vector.load %arg16[%c0_41, %c0_42] : memref<32x32xbf16, #tpu.memory_space<vmem>>, vector<32x32xbf16>
    %c0_43 = arith.constant 0 : index
    %c0_44 = arith.constant 0 : index
    %60 = vector.load %arg17[%c0_43, %c0_44] : memref<1x32xf32, #tpu.memory_space<vmem>>, vector<1x32xf32>
    %61 = arith.truncf %56 : vector<9x32xf32> to vector<9x32xbf16>
    %cst_45 = arith.constant dense<0.000000e+00> : vector<9x96xf32>
    %62 = tpu.matmul %61, %57, %cst_45 {dimension_numbers = #tpu.dot_dimension_numbers<[1], [0], [0], [1], [0, 0, 1, 1], [], []>} : vector<9x32xbf16>, vector<32x96xbf16>, vector<9x96xf32> -> vector<9x96xf32>
    %63 = vector.broadcast %58 : vector<1x96xf32> to vector<9x96xf32>
    %64 = arith.addf %62, %63 : vector<9x96xf32>
    %65 = vector.extract_strided_slice %64 {offsets = [0, 0], sizes = [9, 32], strides = [1, 1]} : vector<9x96xf32> to vector<9x32xf32>
    %cst_46 = arith.constant 0.353553385 : f32
    %66 = vector.broadcast %cst_46 : f32 to vector<9x32xf32>
    %67 = arith.mulf %65, %66 : vector<9x32xf32>
    %68 = vector.extract_strided_slice %64 {offsets = [0, 32], sizes = [9, 32], strides = [1, 1]} : vector<9x96xf32> to vector<9x32xf32>
    %69 = vector.extract_strided_slice %64 {offsets = [0, 64], sizes = [9, 32], strides = [1, 1]} : vector<9x96xf32> to vector<9x32xf32>
    %70 = vector.extract_strided_slice %67 {offsets = [0, 0], sizes = [9, 8], strides = [1, 1]} : vector<9x32xf32> to vector<9x8xf32>
    %71 = vector.extract_strided_slice %67 {offsets = [0, 8], sizes = [9, 8], strides = [1, 1]} : vector<9x32xf32> to vector<9x8xf32>
    %72 = vector.extract_strided_slice %67 {offsets = [0, 16], sizes = [9, 8], strides = [1, 1]} : vector<9x32xf32> to vector<9x8xf32>
    %73 = vector.extract_strided_slice %67 {offsets = [0, 24], sizes = [9, 8], strides = [1, 1]} : vector<9x32xf32> to vector<9x8xf32>
    %74 = tpu.concatenate %70, %71, %72, %73 in 0 : vector<9x8xf32>, vector<9x8xf32>, vector<9x8xf32>, vector<9x8xf32> -> vector<36x8xf32>
    %75 = vector.extract_strided_slice %68 {offsets = [0, 0], sizes = [9, 8], strides = [1, 1]} : vector<9x32xf32> to vector<9x8xf32>
    %76 = vector.extract_strided_slice %68 {offsets = [0, 8], sizes = [9, 8], strides = [1, 1]} : vector<9x32xf32> to vector<9x8xf32>
    %77 = vector.extract_strided_slice %68 {offsets = [0, 16], sizes = [9, 8], strides = [1, 1]} : vector<9x32xf32> to vector<9x8xf32>
    %78 = vector.extract_strided_slice %68 {offsets = [0, 24], sizes = [9, 8], strides = [1, 1]} : vector<9x32xf32> to vector<9x8xf32>
    %79 = tpu.concatenate %75, %76, %77, %78 in 0 : vector<9x8xf32>, vector<9x8xf32>, vector<9x8xf32>, vector<9x8xf32> -> vector<36x8xf32>
    %80 = vector.extract_strided_slice %69 {offsets = [0, 0], sizes = [9, 8], strides = [1, 1]} : vector<9x32xf32> to vector<9x8xf32>
    %81 = vector.extract_strided_slice %69 {offsets = [0, 8], sizes = [9, 8], strides = [1, 1]} : vector<9x32xf32> to vector<9x8xf32>
    %82 = vector.extract_strided_slice %69 {offsets = [0, 16], sizes = [9, 8], strides = [1, 1]} : vector<9x32xf32> to vector<9x8xf32>
    %83 = vector.extract_strided_slice %69 {offsets = [0, 24], sizes = [9, 8], strides = [1, 1]} : vector<9x32xf32> to vector<9x8xf32>
    %84 = tpu.concatenate %80, %81, %82, %83 in 0 : vector<9x8xf32>, vector<9x8xf32>, vector<9x8xf32>, vector<9x8xf32> -> vector<36x8xf32>
    %85 = arith.truncf %74 : vector<36x8xf32> to vector<36x8xbf16>
    %86 = arith.truncf %79 : vector<36x8xf32> to vector<36x8xbf16>
    %cst_47 = arith.constant dense<0.000000e+00> : vector<36x36xf32>
    %87 = tpu.matmul %85, %86, %cst_47 {dimension_numbers = #tpu.dot_dimension_numbers<[1], [1], [0], [0], [0, 0, 1, 0], [], []>} : vector<36x8xbf16>, vector<36x8xbf16>, vector<36x36xf32> -> vector<36x36xf32>
    %cst_48 = arith.constant 0.000000e+00 : f32
    %88 = vector.broadcast %cst_48 : f32 to vector<9x1xf32>
    %cst_49 = arith.constant 1.000000e+00 : f32
    %89 = vector.broadcast %cst_49 : f32 to vector<9x1xf32>
    %cst_50 = arith.constant 2.000000e+00 : f32
    %90 = vector.broadcast %cst_50 : f32 to vector<9x1xf32>
    %cst_51 = arith.constant 3.000000e+00 : f32
    %91 = vector.broadcast %cst_51 : f32 to vector<9x1xf32>
    %92 = tpu.concatenate %88, %89, %90, %91 in 0 : vector<9x1xf32>, vector<9x1xf32>, vector<9x1xf32>, vector<9x1xf32> -> vector<36x1xf32>
    %cst_52 = arith.constant 0.000000e+00 : f32
    %93 = vector.broadcast %cst_52 : f32 to vector<1x9xf32>
    %cst_53 = arith.constant 1.000000e+00 : f32
    %94 = vector.broadcast %cst_53 : f32 to vector<1x9xf32>
    %cst_54 = arith.constant 2.000000e+00 : f32
    %95 = vector.broadcast %cst_54 : f32 to vector<1x9xf32>
    %cst_55 = arith.constant 3.000000e+00 : f32
    %96 = vector.broadcast %cst_55 : f32 to vector<1x9xf32>
    %97 = tpu.concatenate %93, %94, %95, %96 in 1 : vector<1x9xf32>, vector<1x9xf32>, vector<1x9xf32>, vector<1x9xf32> -> vector<1x36xf32>
    %98 = vector.broadcast %92 : vector<36x1xf32> to vector<36x36xf32>
    %99 = vector.broadcast %97 : vector<1x36xf32> to vector<36x36xf32>
    %100 = arith.cmpf oeq, %98, %99 : vector<36x36xf32>
    %cst_56 = arith.constant -1.000000e+30 : f32
    %101 = vector.broadcast %cst_56 : f32 to vector<36x36xf32>
    %102 = arith.select %100, %87, %101 : vector<36x36xi1>, vector<36x36xf32>
    %cst_57 = arith.constant dense<0xFF800000> : vector<36xf32>
    %103 = vector.multi_reduction <maximumf>, %102, %cst_57 [1] : vector<36x36xf32> to vector<36xf32>
    %104 = vector.shape_cast %103 : vector<36xf32> to vector<36x1xf32>
    %105 = vector.broadcast %104 : vector<36x1xf32> to vector<36x36xf32>
    %106 = arith.subf %102, %105 : vector<36x36xf32>
    %107 = math.exp %106 : vector<36x36xf32>
    %cst_58 = arith.constant dense<0.000000e+00> : vector<36xf32>
    %108 = vector.multi_reduction <add>, %107, %cst_58 [1] : vector<36x36xf32> to vector<36xf32>
    %109 = vector.shape_cast %108 : vector<36xf32> to vector<36x1xf32>
    %110 = vector.broadcast %109 : vector<36x1xf32> to vector<36x36xf32>
    %111 = arith.divf %107, %110 : vector<36x36xf32>
    %112 = arith.truncf %111 : vector<36x36xf32> to vector<36x36xbf16>
    %113 = arith.truncf %84 : vector<36x8xf32> to vector<36x8xbf16>
    %cst_59 = arith.constant dense<0.000000e+00> : vector<36x8xf32>
    %114 = tpu.matmul %112, %113, %cst_59 {dimension_numbers = #tpu.dot_dimension_numbers<[1], [0], [0], [1], [0, 0, 1, 1], [], []>} : vector<36x36xbf16>, vector<36x8xbf16>, vector<36x8xf32> -> vector<36x8xf32>
    %115 = vector.extract_strided_slice %114 {offsets = [0, 0], sizes = [9, 8], strides = [1, 1]} : vector<36x8xf32> to vector<9x8xf32>
    %116 = vector.extract_strided_slice %114 {offsets = [9, 0], sizes = [9, 8], strides = [1, 1]} : vector<36x8xf32> to vector<9x8xf32>
    %117 = vector.extract_strided_slice %114 {offsets = [18, 0], sizes = [9, 8], strides = [1, 1]} : vector<36x8xf32> to vector<9x8xf32>
    %118 = vector.extract_strided_slice %114 {offsets = [27, 0], sizes = [9, 8], strides = [1, 1]} : vector<36x8xf32> to vector<9x8xf32>
    %119 = tpu.concatenate %115, %116, %117, %118 in 1 : vector<9x8xf32>, vector<9x8xf32>, vector<9x8xf32>, vector<9x8xf32> -> vector<9x32xf32>
    %120 = arith.truncf %119 : vector<9x32xf32> to vector<9x32xbf16>
    %cst_60 = arith.constant dense<0.000000e+00> : vector<9x32xf32>
    %121 = tpu.matmul %120, %59, %cst_60 {dimension_numbers = #tpu.dot_dimension_numbers<[1], [0], [0], [1], [0, 0, 1, 1], [], []>} : vector<9x32xbf16>, vector<32x32xbf16>, vector<9x32xf32> -> vector<9x32xf32>
    %122 = vector.broadcast %60 : vector<1x32xf32> to vector<9x32xf32>
    %123 = arith.addf %121, %122 : vector<9x32xf32>
    %124 = arith.addf %34, %123 : vector<9x32xf32>
    %c0_61 = arith.constant 0 : index
    %c0_62 = arith.constant 0 : index
    %125 = vector.load %arg18[%c0_61, %c0_62] : memref<1x32xf32, #tpu.memory_space<vmem>>, vector<1x32xf32>
    %c0_63 = arith.constant 0 : index
    %c0_64 = arith.constant 0 : index
    %126 = vector.load %arg19[%c0_63, %c0_64] : memref<1x32xf32, #tpu.memory_space<vmem>>, vector<1x32xf32>
    %cst_65 = arith.constant dense<0.000000e+00> : vector<9xf32>
    %127 = vector.multi_reduction <add>, %124, %cst_65 [1] : vector<9x32xf32> to vector<9xf32>
    %128 = vector.shape_cast %127 : vector<9xf32> to vector<9x1xf32>
    %cst_66 = arith.constant 3.200000e+01 : f32
    %129 = vector.broadcast %cst_66 : f32 to vector<9x1xf32>
    %130 = arith.divf %128, %129 : vector<9x1xf32>
    %131 = vector.broadcast %130 : vector<9x1xf32> to vector<9x32xf32>
    %132 = arith.subf %124, %131 : vector<9x32xf32>
    %133 = arith.mulf %132, %132 : vector<9x32xf32>
    %cst_67 = arith.constant dense<0.000000e+00> : vector<9xf32>
    %134 = vector.multi_reduction <add>, %133, %cst_67 [1] : vector<9x32xf32> to vector<9xf32>
    %135 = vector.shape_cast %134 : vector<9xf32> to vector<9x1xf32>
    %cst_68 = arith.constant 3.200000e+01 : f32
    %136 = vector.broadcast %cst_68 : f32 to vector<9x1xf32>
    %137 = arith.divf %135, %136 : vector<9x1xf32>
    %cst_69 = arith.constant 9.99999974E-6 : f32
    %138 = vector.broadcast %cst_69 : f32 to vector<9x1xf32>
    %139 = arith.addf %137, %138 : vector<9x1xf32>
    %140 = math.rsqrt %139 : vector<9x1xf32>
    %141 = vector.broadcast %140 : vector<9x1xf32> to vector<9x32xf32>
    %142 = arith.mulf %132, %141 : vector<9x32xf32>
    %143 = vector.broadcast %125 : vector<1x32xf32> to vector<9x32xf32>
    %144 = arith.mulf %142, %143 : vector<9x32xf32>
    %145 = vector.broadcast %126 : vector<1x32xf32> to vector<9x32xf32>
    %146 = arith.addf %144, %145 : vector<9x32xf32>
    %c0_70 = arith.constant 0 : index
    %c0_71 = arith.constant 0 : index
    %147 = vector.load %arg20[%c0_70, %c0_71] : memref<32x128xbf16, #tpu.memory_space<vmem>>, vector<32x128xbf16>
    %148 = arith.truncf %146 : vector<9x32xf32> to vector<9x32xbf16>
    %cst_72 = arith.constant dense<0.000000e+00> : vector<9x128xf32>
    %149 = tpu.matmul %148, %147, %cst_72 {dimension_numbers = #tpu.dot_dimension_numbers<[1], [0], [0], [1], [0, 0, 1, 1], [], []>} : vector<9x32xbf16>, vector<32x128xbf16>, vector<9x128xf32> -> vector<9x128xf32>
    %c0_73 = arith.constant 0 : index
    %c0_74 = arith.constant 0 : index
    %150 = vector.load %arg21[%c0_73, %c0_74] : memref<1x128xf32, #tpu.memory_space<vmem>>, vector<1x128xf32>
    %151 = vector.broadcast %150 : vector<1x128xf32> to vector<9x128xf32>
    %152 = arith.addf %149, %151 : vector<9x128xf32>
    %cst_75 = arith.constant 0.707106769 : f32
    %153 = vector.broadcast %cst_75 : f32 to vector<9x128xf32>
    %154 = arith.mulf %152, %153 : vector<9x128xf32>
    %155 = math.absf %154 : vector<9x128xf32>
    %cst_76 = arith.constant 0.327591091 : f32
    %156 = vector.broadcast %cst_76 : f32 to vector<9x128xf32>
    %157 = arith.mulf %156, %155 : vector<9x128xf32>
    %cst_77 = arith.constant 1.000000e+00 : f32
    %158 = vector.broadcast %cst_77 : f32 to vector<9x128xf32>
    %159 = arith.addf %158, %157 : vector<9x128xf32>
    %cst_78 = arith.constant 1.000000e+00 : f32
    %160 = vector.broadcast %cst_78 : f32 to vector<9x128xf32>
    %161 = arith.divf %160, %159 : vector<9x128xf32>
    %cst_79 = arith.constant 1.06140542 : f32
    %162 = vector.broadcast %cst_79 : f32 to vector<9x128xf32>
    %163 = arith.mulf %162, %161 : vector<9x128xf32>
    %cst_80 = arith.constant -1.45315206 : f32
    %164 = vector.broadcast %cst_80 : f32 to vector<9x128xf32>
    %165 = arith.addf %163, %164 : vector<9x128xf32>
    %166 = arith.mulf %165, %161 : vector<9x128xf32>
    %cst_81 = arith.constant 1.42141378 : f32
    %167 = vector.broadcast %cst_81 : f32 to vector<9x128xf32>
    %168 = arith.addf %166, %167 : vector<9x128xf32>
    %169 = arith.mulf %168, %161 : vector<9x128xf32>
    %cst_82 = arith.constant -0.284496725 : f32
    %170 = vector.broadcast %cst_82 : f32 to vector<9x128xf32>
    %171 = arith.addf %169, %170 : vector<9x128xf32>
    %172 = arith.mulf %171, %161 : vector<9x128xf32>
    %cst_83 = arith.constant 0.254829586 : f32
    %173 = vector.broadcast %cst_83 : f32 to vector<9x128xf32>
    %174 = arith.addf %172, %173 : vector<9x128xf32>
    %175 = arith.mulf %174, %161 : vector<9x128xf32>
    %cst_84 = arith.constant 0.000000e+00 : f32
    %176 = vector.broadcast %cst_84 : f32 to vector<9x128xf32>
    %177 = arith.subf %176, %155 : vector<9x128xf32>
    %178 = arith.mulf %177, %155 : vector<9x128xf32>
    %179 = math.exp %178 : vector<9x128xf32>
    %180 = arith.mulf %175, %179 : vector<9x128xf32>
    %cst_85 = arith.constant 1.000000e+00 : f32
    %181 = vector.broadcast %cst_85 : f32 to vector<9x128xf32>
    %182 = arith.subf %181, %180 : vector<9x128xf32>
    %cst_86 = arith.constant 0.000000e+00 : f32
    %183 = vector.broadcast %cst_86 : f32 to vector<9x128xf32>
    %184 = arith.cmpf oge, %154, %183 : vector<9x128xf32>
    %cst_87 = arith.constant 0.000000e+00 : f32
    %185 = vector.broadcast %cst_87 : f32 to vector<9x128xf32>
    %186 = arith.subf %185, %182 : vector<9x128xf32>
    %187 = arith.select %184, %182, %186 : vector<9x128xi1>, vector<9x128xf32>
    %cst_88 = arith.constant 5.000000e-01 : f32
    %188 = vector.broadcast %cst_88 : f32 to vector<9x128xf32>
    %189 = arith.mulf %188, %152 : vector<9x128xf32>
    %cst_89 = arith.constant 1.000000e+00 : f32
    %190 = vector.broadcast %cst_89 : f32 to vector<9x128xf32>
    %191 = arith.addf %190, %187 : vector<9x128xf32>
    %192 = arith.mulf %189, %191 : vector<9x128xf32>
    %c0_90 = arith.constant 0 : index
    %c0_91 = arith.constant 0 : index
    %193 = vector.load %arg22[%c0_90, %c0_91] : memref<128x32xbf16, #tpu.memory_space<vmem>>, vector<128x32xbf16>
    %194 = arith.truncf %192 : vector<9x128xf32> to vector<9x128xbf16>
    %cst_92 = arith.constant dense<0.000000e+00> : vector<9x32xf32>
    %195 = tpu.matmul %194, %193, %cst_92 {dimension_numbers = #tpu.dot_dimension_numbers<[1], [0], [0], [1], [0, 0, 1, 1], [], []>} : vector<9x128xbf16>, vector<128x32xbf16>, vector<9x32xf32> -> vector<9x32xf32>
    %c0_93 = arith.constant 0 : index
    %c0_94 = arith.constant 0 : index
    %196 = vector.load %arg23[%c0_93, %c0_94] : memref<1x32xf32, #tpu.memory_space<vmem>>, vector<1x32xf32>
    %197 = vector.broadcast %196 : vector<1x32xf32> to vector<9x32xf32>
    %198 = arith.addf %195, %197 : vector<9x32xf32>
    %199 = arith.addf %124, %198 : vector<9x32xf32>
    %c0_95 = arith.constant 0 : index
    %c0_96 = arith.constant 0 : index
    %200 = vector.load %arg24[%c0_95, %c0_96] : memref<1x32xf32, #tpu.memory_space<vmem>>, vector<1x32xf32>
    %c0_97 = arith.constant 0 : index
    %c0_98 = arith.constant 0 : index
    %201 = vector.load %arg25[%c0_97, %c0_98] : memref<1x32xf32, #tpu.memory_space<vmem>>, vector<1x32xf32>
    %cst_99 = arith.constant dense<0.000000e+00> : vector<9xf32>
    %202 = vector.multi_reduction <add>, %199, %cst_99 [1] : vector<9x32xf32> to vector<9xf32>
    %203 = vector.shape_cast %202 : vector<9xf32> to vector<9x1xf32>
    %cst_100 = arith.constant 3.200000e+01 : f32
    %204 = vector.broadcast %cst_100 : f32 to vector<9x1xf32>
    %205 = arith.divf %203, %204 : vector<9x1xf32>
    %206 = vector.broadcast %205 : vector<9x1xf32> to vector<9x32xf32>
    %207 = arith.subf %199, %206 : vector<9x32xf32>
    %208 = arith.mulf %207, %207 : vector<9x32xf32>
    %cst_101 = arith.constant dense<0.000000e+00> : vector<9xf32>
    %209 = vector.multi_reduction <add>, %208, %cst_101 [1] : vector<9x32xf32> to vector<9xf32>
    %210 = vector.shape_cast %209 : vector<9xf32> to vector<9x1xf32>
    %cst_102 = arith.constant 3.200000e+01 : f32
    %211 = vector.broadcast %cst_102 : f32 to vector<9x1xf32>
    %212 = arith.divf %210, %211 : vector<9x1xf32>
    %cst_103 = arith.constant 9.99999974E-6 : f32
    %213 = vector.broadcast %cst_103 : f32 to vector<9x1xf32>
    %214 = arith.addf %212, %213 : vector<9x1xf32>
    %215 = math.rsqrt %214 : vector<9x1xf32>
    %216 = vector.broadcast %215 : vector<9x1xf32> to vector<9x32xf32>
    %217 = arith.mulf %207, %216 : vector<9x32xf32>
    %218 = vector.broadcast %200 : vector<1x32xf32> to vector<9x32xf32>
    %219 = arith.mulf %217, %218 : vector<9x32xf32>
    %220 = vector.broadcast %201 : vector<1x32xf32> to vector<9x32xf32>
    %221 = arith.addf %219, %220 : vector<9x32xf32>
    %c0_104 = arith.constant 0 : index
    %c0_105 = arith.constant 0 : index
    %222 = vector.load %arg26[%c0_104, %c0_105] : memref<32x96xbf16, #tpu.memory_space<vmem>>, vector<32x96xbf16>
    %c0_106 = arith.constant 0 : index
    %c0_107 = arith.constant 0 : index
    %223 = vector.load %arg27[%c0_106, %c0_107] : memref<1x96xf32, #tpu.memory_space<vmem>>, vector<1x96xf32>
    %c0_108 = arith.constant 0 : index
    %c0_109 = arith.constant 0 : index
    %224 = vector.load %arg28[%c0_108, %c0_109] : memref<32x32xbf16, #tpu.memory_space<vmem>>, vector<32x32xbf16>
    %c0_110 = arith.constant 0 : index
    %c0_111 = arith.constant 0 : index
    %225 = vector.load %arg29[%c0_110, %c0_111] : memref<1x32xf32, #tpu.memory_space<vmem>>, vector<1x32xf32>
    %226 = arith.truncf %221 : vector<9x32xf32> to vector<9x32xbf16>
    %cst_112 = arith.constant dense<0.000000e+00> : vector<9x96xf32>
    %227 = tpu.matmul %226, %222, %cst_112 {dimension_numbers = #tpu.dot_dimension_numbers<[1], [0], [0], [1], [0, 0, 1, 1], [], []>} : vector<9x32xbf16>, vector<32x96xbf16>, vector<9x96xf32> -> vector<9x96xf32>
    %228 = vector.broadcast %223 : vector<1x96xf32> to vector<9x96xf32>
    %229 = arith.addf %227, %228 : vector<9x96xf32>
    %230 = vector.extract_strided_slice %229 {offsets = [0, 0], sizes = [9, 32], strides = [1, 1]} : vector<9x96xf32> to vector<9x32xf32>
    %cst_113 = arith.constant 0.353553385 : f32
    %231 = vector.broadcast %cst_113 : f32 to vector<9x32xf32>
    %232 = arith.mulf %230, %231 : vector<9x32xf32>
    %233 = vector.extract_strided_slice %229 {offsets = [0, 32], sizes = [9, 32], strides = [1, 1]} : vector<9x96xf32> to vector<9x32xf32>
    %234 = vector.extract_strided_slice %229 {offsets = [0, 64], sizes = [9, 32], strides = [1, 1]} : vector<9x96xf32> to vector<9x32xf32>
    %235 = vector.extract_strided_slice %232 {offsets = [0, 0], sizes = [9, 8], strides = [1, 1]} : vector<9x32xf32> to vector<9x8xf32>
    %236 = vector.extract_strided_slice %232 {offsets = [0, 8], sizes = [9, 8], strides = [1, 1]} : vector<9x32xf32> to vector<9x8xf32>
    %237 = vector.extract_strided_slice %232 {offsets = [0, 16], sizes = [9, 8], strides = [1, 1]} : vector<9x32xf32> to vector<9x8xf32>
    %238 = vector.extract_strided_slice %232 {offsets = [0, 24], sizes = [9, 8], strides = [1, 1]} : vector<9x32xf32> to vector<9x8xf32>
    %239 = tpu.concatenate %235, %236, %237, %238 in 0 : vector<9x8xf32>, vector<9x8xf32>, vector<9x8xf32>, vector<9x8xf32> -> vector<36x8xf32>
    %240 = vector.extract_strided_slice %233 {offsets = [0, 0], sizes = [9, 8], strides = [1, 1]} : vector<9x32xf32> to vector<9x8xf32>
    %241 = vector.extract_strided_slice %233 {offsets = [0, 8], sizes = [9, 8], strides = [1, 1]} : vector<9x32xf32> to vector<9x8xf32>
    %242 = vector.extract_strided_slice %233 {offsets = [0, 16], sizes = [9, 8], strides = [1, 1]} : vector<9x32xf32> to vector<9x8xf32>
    %243 = vector.extract_strided_slice %233 {offsets = [0, 24], sizes = [9, 8], strides = [1, 1]} : vector<9x32xf32> to vector<9x8xf32>
    %244 = tpu.concatenate %240, %241, %242, %243 in 0 : vector<9x8xf32>, vector<9x8xf32>, vector<9x8xf32>, vector<9x8xf32> -> vector<36x8xf32>
    %245 = vector.extract_strided_slice %234 {offsets = [0, 0], sizes = [9, 8], strides = [1, 1]} : vector<9x32xf32> to vector<9x8xf32>
    %246 = vector.extract_strided_slice %234 {offsets = [0, 8], sizes = [9, 8], strides = [1, 1]} : vector<9x32xf32> to vector<9x8xf32>
    %247 = vector.extract_strided_slice %234 {offsets = [0, 16], sizes = [9, 8], strides = [1, 1]} : vector<9x32xf32> to vector<9x8xf32>
    %248 = vector.extract_strided_slice %234 {offsets = [0, 24], sizes = [9, 8], strides = [1, 1]} : vector<9x32xf32> to vector<9x8xf32>
    %249 = tpu.concatenate %245, %246, %247, %248 in 0 : vector<9x8xf32>, vector<9x8xf32>, vector<9x8xf32>, vector<9x8xf32> -> vector<36x8xf32>
    %250 = arith.truncf %239 : vector<36x8xf32> to vector<36x8xbf16>
    %251 = arith.truncf %244 : vector<36x8xf32> to vector<36x8xbf16>
    %cst_114 = arith.constant dense<0.000000e+00> : vector<36x36xf32>
    %252 = tpu.matmul %250, %251, %cst_114 {dimension_numbers = #tpu.dot_dimension_numbers<[1], [1], [0], [0], [0, 0, 1, 0], [], []>} : vector<36x8xbf16>, vector<36x8xbf16>, vector<36x36xf32> -> vector<36x36xf32>
    %cst_115 = arith.constant 0.000000e+00 : f32
    %253 = vector.broadcast %cst_115 : f32 to vector<9x1xf32>
    %cst_116 = arith.constant 1.000000e+00 : f32
    %254 = vector.broadcast %cst_116 : f32 to vector<9x1xf32>
    %cst_117 = arith.constant 2.000000e+00 : f32
    %255 = vector.broadcast %cst_117 : f32 to vector<9x1xf32>
    %cst_118 = arith.constant 3.000000e+00 : f32
    %256 = vector.broadcast %cst_118 : f32 to vector<9x1xf32>
    %257 = tpu.concatenate %253, %254, %255, %256 in 0 : vector<9x1xf32>, vector<9x1xf32>, vector<9x1xf32>, vector<9x1xf32> -> vector<36x1xf32>
    %cst_119 = arith.constant 0.000000e+00 : f32
    %258 = vector.broadcast %cst_119 : f32 to vector<1x9xf32>
    %cst_120 = arith.constant 1.000000e+00 : f32
    %259 = vector.broadcast %cst_120 : f32 to vector<1x9xf32>
    %cst_121 = arith.constant 2.000000e+00 : f32
    %260 = vector.broadcast %cst_121 : f32 to vector<1x9xf32>
    %cst_122 = arith.constant 3.000000e+00 : f32
    %261 = vector.broadcast %cst_122 : f32 to vector<1x9xf32>
    %262 = tpu.concatenate %258, %259, %260, %261 in 1 : vector<1x9xf32>, vector<1x9xf32>, vector<1x9xf32>, vector<1x9xf32> -> vector<1x36xf32>
    %263 = vector.broadcast %257 : vector<36x1xf32> to vector<36x36xf32>
    %264 = vector.broadcast %262 : vector<1x36xf32> to vector<36x36xf32>
    %265 = arith.cmpf oeq, %263, %264 : vector<36x36xf32>
    %cst_123 = arith.constant -1.000000e+30 : f32
    %266 = vector.broadcast %cst_123 : f32 to vector<36x36xf32>
    %267 = arith.select %265, %252, %266 : vector<36x36xi1>, vector<36x36xf32>
    %cst_124 = arith.constant dense<0xFF800000> : vector<36xf32>
    %268 = vector.multi_reduction <maximumf>, %267, %cst_124 [1] : vector<36x36xf32> to vector<36xf32>
    %269 = vector.shape_cast %268 : vector<36xf32> to vector<36x1xf32>
    %270 = vector.broadcast %269 : vector<36x1xf32> to vector<36x36xf32>
    %271 = arith.subf %267, %270 : vector<36x36xf32>
    %272 = math.exp %271 : vector<36x36xf32>
    %cst_125 = arith.constant dense<0.000000e+00> : vector<36xf32>
    %273 = vector.multi_reduction <add>, %272, %cst_125 [1] : vector<36x36xf32> to vector<36xf32>
    %274 = vector.shape_cast %273 : vector<36xf32> to vector<36x1xf32>
    %275 = vector.broadcast %274 : vector<36x1xf32> to vector<36x36xf32>
    %276 = arith.divf %272, %275 : vector<36x36xf32>
    %277 = arith.truncf %276 : vector<36x36xf32> to vector<36x36xbf16>
    %278 = arith.truncf %249 : vector<36x8xf32> to vector<36x8xbf16>
    %cst_126 = arith.constant dense<0.000000e+00> : vector<36x8xf32>
    %279 = tpu.matmul %277, %278, %cst_126 {dimension_numbers = #tpu.dot_dimension_numbers<[1], [0], [0], [1], [0, 0, 1, 1], [], []>} : vector<36x36xbf16>, vector<36x8xbf16>, vector<36x8xf32> -> vector<36x8xf32>
    %280 = vector.extract_strided_slice %279 {offsets = [0, 0], sizes = [9, 8], strides = [1, 1]} : vector<36x8xf32> to vector<9x8xf32>
    %281 = vector.extract_strided_slice %279 {offsets = [9, 0], sizes = [9, 8], strides = [1, 1]} : vector<36x8xf32> to vector<9x8xf32>
    %282 = vector.extract_strided_slice %279 {offsets = [18, 0], sizes = [9, 8], strides = [1, 1]} : vector<36x8xf32> to vector<9x8xf32>
    %283 = vector.extract_strided_slice %279 {offsets = [27, 0], sizes = [9, 8], strides = [1, 1]} : vector<36x8xf32> to vector<9x8xf32>
    %284 = tpu.concatenate %280, %281, %282, %283 in 1 : vector<9x8xf32>, vector<9x8xf32>, vector<9x8xf32>, vector<9x8xf32> -> vector<9x32xf32>
    %285 = arith.truncf %284 : vector<9x32xf32> to vector<9x32xbf16>
    %cst_127 = arith.constant dense<0.000000e+00> : vector<9x32xf32>
    %286 = tpu.matmul %285, %224, %cst_127 {dimension_numbers = #tpu.dot_dimension_numbers<[1], [0], [0], [1], [0, 0, 1, 1], [], []>} : vector<9x32xbf16>, vector<32x32xbf16>, vector<9x32xf32> -> vector<9x32xf32>
    %287 = vector.broadcast %225 : vector<1x32xf32> to vector<9x32xf32>
    %288 = arith.addf %286, %287 : vector<9x32xf32>
    %289 = arith.addf %199, %288 : vector<9x32xf32>
    %c0_128 = arith.constant 0 : index
    %c0_129 = arith.constant 0 : index
    %290 = vector.load %arg30[%c0_128, %c0_129] : memref<1x32xf32, #tpu.memory_space<vmem>>, vector<1x32xf32>
    %c0_130 = arith.constant 0 : index
    %c0_131 = arith.constant 0 : index
    %291 = vector.load %arg31[%c0_130, %c0_131] : memref<1x32xf32, #tpu.memory_space<vmem>>, vector<1x32xf32>
    %cst_132 = arith.constant dense<0.000000e+00> : vector<9xf32>
    %292 = vector.multi_reduction <add>, %289, %cst_132 [1] : vector<9x32xf32> to vector<9xf32>
    %293 = vector.shape_cast %292 : vector<9xf32> to vector<9x1xf32>
    %cst_133 = arith.constant 3.200000e+01 : f32
    %294 = vector.broadcast %cst_133 : f32 to vector<9x1xf32>
    %295 = arith.divf %293, %294 : vector<9x1xf32>
    %296 = vector.broadcast %295 : vector<9x1xf32> to vector<9x32xf32>
    %297 = arith.subf %289, %296 : vector<9x32xf32>
    %298 = arith.mulf %297, %297 : vector<9x32xf32>
    %cst_134 = arith.constant dense<0.000000e+00> : vector<9xf32>
    %299 = vector.multi_reduction <add>, %298, %cst_134 [1] : vector<9x32xf32> to vector<9xf32>
    %300 = vector.shape_cast %299 : vector<9xf32> to vector<9x1xf32>
    %cst_135 = arith.constant 3.200000e+01 : f32
    %301 = vector.broadcast %cst_135 : f32 to vector<9x1xf32>
    %302 = arith.divf %300, %301 : vector<9x1xf32>
    %cst_136 = arith.constant 9.99999974E-6 : f32
    %303 = vector.broadcast %cst_136 : f32 to vector<9x1xf32>
    %304 = arith.addf %302, %303 : vector<9x1xf32>
    %305 = math.rsqrt %304 : vector<9x1xf32>
    %306 = vector.broadcast %305 : vector<9x1xf32> to vector<9x32xf32>
    %307 = arith.mulf %297, %306 : vector<9x32xf32>
    %308 = vector.broadcast %290 : vector<1x32xf32> to vector<9x32xf32>
    %309 = arith.mulf %307, %308 : vector<9x32xf32>
    %310 = vector.broadcast %291 : vector<1x32xf32> to vector<9x32xf32>
    %311 = arith.addf %309, %310 : vector<9x32xf32>
    %c0_137 = arith.constant 0 : index
    %c0_138 = arith.constant 0 : index
    %312 = vector.load %arg32[%c0_137, %c0_138] : memref<32x128xbf16, #tpu.memory_space<vmem>>, vector<32x128xbf16>
    %313 = arith.truncf %311 : vector<9x32xf32> to vector<9x32xbf16>
    %cst_139 = arith.constant dense<0.000000e+00> : vector<9x128xf32>
    %314 = tpu.matmul %313, %312, %cst_139 {dimension_numbers = #tpu.dot_dimension_numbers<[1], [0], [0], [1], [0, 0, 1, 1], [], []>} : vector<9x32xbf16>, vector<32x128xbf16>, vector<9x128xf32> -> vector<9x128xf32>
    %c0_140 = arith.constant 0 : index
    %c0_141 = arith.constant 0 : index
    %315 = vector.load %arg33[%c0_140, %c0_141] : memref<1x128xf32, #tpu.memory_space<vmem>>, vector<1x128xf32>
    %316 = vector.broadcast %315 : vector<1x128xf32> to vector<9x128xf32>
    %317 = arith.addf %314, %316 : vector<9x128xf32>
    %cst_142 = arith.constant 0.707106769 : f32
    %318 = vector.broadcast %cst_142 : f32 to vector<9x128xf32>
    %319 = arith.mulf %317, %318 : vector<9x128xf32>
    %320 = math.absf %319 : vector<9x128xf32>
    %cst_143 = arith.constant 0.327591091 : f32
    %321 = vector.broadcast %cst_143 : f32 to vector<9x128xf32>
    %322 = arith.mulf %321, %320 : vector<9x128xf32>
    %cst_144 = arith.constant 1.000000e+00 : f32
    %323 = vector.broadcast %cst_144 : f32 to vector<9x128xf32>
    %324 = arith.addf %323, %322 : vector<9x128xf32>
    %cst_145 = arith.constant 1.000000e+00 : f32
    %325 = vector.broadcast %cst_145 : f32 to vector<9x128xf32>
    %326 = arith.divf %325, %324 : vector<9x128xf32>
    %cst_146 = arith.constant 1.06140542 : f32
    %327 = vector.broadcast %cst_146 : f32 to vector<9x128xf32>
    %328 = arith.mulf %327, %326 : vector<9x128xf32>
    %cst_147 = arith.constant -1.45315206 : f32
    %329 = vector.broadcast %cst_147 : f32 to vector<9x128xf32>
    %330 = arith.addf %328, %329 : vector<9x128xf32>
    %331 = arith.mulf %330, %326 : vector<9x128xf32>
    %cst_148 = arith.constant 1.42141378 : f32
    %332 = vector.broadcast %cst_148 : f32 to vector<9x128xf32>
    %333 = arith.addf %331, %332 : vector<9x128xf32>
    %334 = arith.mulf %333, %326 : vector<9x128xf32>
    %cst_149 = arith.constant -0.284496725 : f32
    %335 = vector.broadcast %cst_149 : f32 to vector<9x128xf32>
    %336 = arith.addf %334, %335 : vector<9x128xf32>
    %337 = arith.mulf %336, %326 : vector<9x128xf32>
    %cst_150 = arith.constant 0.254829586 : f32
    %338 = vector.broadcast %cst_150 : f32 to vector<9x128xf32>
    %339 = arith.addf %337, %338 : vector<9x128xf32>
    %340 = arith.mulf %339, %326 : vector<9x128xf32>
    %cst_151 = arith.constant 0.000000e+00 : f32
    %341 = vector.broadcast %cst_151 : f32 to vector<9x128xf32>
    %342 = arith.subf %341, %320 : vector<9x128xf32>
    %343 = arith.mulf %342, %320 : vector<9x128xf32>
    %344 = math.exp %343 : vector<9x128xf32>
    %345 = arith.mulf %340, %344 : vector<9x128xf32>
    %cst_152 = arith.constant 1.000000e+00 : f32
    %346 = vector.broadcast %cst_152 : f32 to vector<9x128xf32>
    %347 = arith.subf %346, %345 : vector<9x128xf32>
    %cst_153 = arith.constant 0.000000e+00 : f32
    %348 = vector.broadcast %cst_153 : f32 to vector<9x128xf32>
    %349 = arith.cmpf oge, %319, %348 : vector<9x128xf32>
    %cst_154 = arith.constant 0.000000e+00 : f32
    %350 = vector.broadcast %cst_154 : f32 to vector<9x128xf32>
    %351 = arith.subf %350, %347 : vector<9x128xf32>
    %352 = arith.select %349, %347, %351 : vector<9x128xi1>, vector<9x128xf32>
    %cst_155 = arith.constant 5.000000e-01 : f32
    %353 = vector.broadcast %cst_155 : f32 to vector<9x128xf32>
    %354 = arith.mulf %353, %317 : vector<9x128xf32>
    %cst_156 = arith.constant 1.000000e+00 : f32
    %355 = vector.broadcast %cst_156 : f32 to vector<9x128xf32>
    %356 = arith.addf %355, %352 : vector<9x128xf32>
    %357 = arith.mulf %354, %356 : vector<9x128xf32>
    %c0_157 = arith.constant 0 : index
    %c0_158 = arith.constant 0 : index
    %358 = vector.load %arg34[%c0_157, %c0_158] : memref<128x32xbf16, #tpu.memory_space<vmem>>, vector<128x32xbf16>
    %359 = arith.truncf %357 : vector<9x128xf32> to vector<9x128xbf16>
    %cst_159 = arith.constant dense<0.000000e+00> : vector<9x32xf32>
    %360 = tpu.matmul %359, %358, %cst_159 {dimension_numbers = #tpu.dot_dimension_numbers<[1], [0], [0], [1], [0, 0, 1, 1], [], []>} : vector<9x128xbf16>, vector<128x32xbf16>, vector<9x32xf32> -> vector<9x32xf32>
    %c0_160 = arith.constant 0 : index
    %c0_161 = arith.constant 0 : index
    %361 = vector.load %arg35[%c0_160, %c0_161] : memref<1x32xf32, #tpu.memory_space<vmem>>, vector<1x32xf32>
    %362 = vector.broadcast %361 : vector<1x32xf32> to vector<9x32xf32>
    %363 = arith.addf %360, %362 : vector<9x32xf32>
    %364 = arith.addf %289, %363 : vector<9x32xf32>
    %365 = vector.extract_strided_slice %364 {offsets = [8, 0], sizes = [1, 32], strides = [1, 1]} : vector<9x32xf32> to vector<1x32xf32>
    %c0_162 = arith.constant 0 : index
    %c0_163 = arith.constant 0 : index
    %c0_164 = arith.constant 0 : index
    %366 = vector.load %arg49[%c0_162, %c0_163, %c0_164] : memref<1x1x32xf32, #tpu.memory_space<vmem>>, vector<1x1x32xf32>
    %367 = vector.shape_cast %366 : vector<1x1x32xf32> to vector<1x32xf32>
    %368 = vector.shape_cast %365 : vector<1x32xf32> to vector<1x1x32xf32>
    tpu.vector_store %arg49[%c0_162, %c0_163, %c0_164], %368 {strides = array<i32>} : memref<1x1x32xf32, #tpu.memory_space<vmem>>, vector<1x1x32xf32>,
    %369 = vector.extract_strided_slice %364 {offsets = [0, 0], sizes = [8, 32], strides = [1, 1]} : vector<9x32xf32> to vector<8x32xf32>
    %c0_165 = arith.constant 0 : index
    %c0_166 = arith.constant 0 : index
    %370 = vector.load %arg36[%c0_165, %c0_166] : memref<1x32xf32, #tpu.memory_space<vmem>>, vector<1x32xf32>
    %c0_167 = arith.constant 0 : index
    %c0_168 = arith.constant 0 : index
    %371 = vector.load %arg37[%c0_167, %c0_168] : memref<1x32xf32, #tpu.memory_space<vmem>>, vector<1x32xf32>
    %cst_169 = arith.constant dense<0.000000e+00> : vector<8xf32>
    %372 = vector.multi_reduction <add>, %369, %cst_169 [1] : vector<8x32xf32> to vector<8xf32>
    %373 = vector.shape_cast %372 : vector<8xf32> to vector<8x1xf32>
    %cst_170 = arith.constant 3.200000e+01 : f32
    %374 = vector.broadcast %cst_170 : f32 to vector<8x1xf32>
    %375 = arith.divf %373, %374 : vector<8x1xf32>
    %376 = vector.broadcast %375 : vector<8x1xf32> to vector<8x32xf32>
    %377 = arith.subf %369, %376 : vector<8x32xf32>
    %378 = arith.mulf %377, %377 : vector<8x32xf32>
    %cst_171 = arith.constant dense<0.000000e+00> : vector<8xf32>
    %379 = vector.multi_reduction <add>, %378, %cst_171 [1] : vector<8x32xf32> to vector<8xf32>
    %380 = vector.shape_cast %379 : vector<8xf32> to vector<8x1xf32>
    %cst_172 = arith.constant 3.200000e+01 : f32
    %381 = vector.broadcast %cst_172 : f32 to vector<8x1xf32>
    %382 = arith.divf %380, %381 : vector<8x1xf32>
    %cst_173 = arith.constant 9.99999974E-6 : f32
    %383 = vector.broadcast %cst_173 : f32 to vector<8x1xf32>
    %384 = arith.addf %382, %383 : vector<8x1xf32>
    %385 = math.rsqrt %384 : vector<8x1xf32>
    %386 = vector.broadcast %385 : vector<8x1xf32> to vector<8x32xf32>
    %387 = arith.mulf %377, %386 : vector<8x32xf32>
    %388 = vector.broadcast %370 : vector<1x32xf32> to vector<8x32xf32>
    %389 = arith.mulf %387, %388 : vector<8x32xf32>
    %390 = vector.broadcast %371 : vector<1x32xf32> to vector<8x32xf32>
    %391 = arith.addf %389, %390 : vector<8x32xf32>
    %c0_174 = arith.constant 0 : index
    %c0_175 = arith.constant 0 : index
    %392 = vector.load %arg38[%c0_174, %c0_175] : memref<32x96xbf16, #tpu.memory_space<vmem>>, vector<32x96xbf16>
    %c0_176 = arith.constant 0 : index
    %c0_177 = arith.constant 0 : index
    %393 = vector.load %arg39[%c0_176, %c0_177] : memref<1x96xf32, #tpu.memory_space<vmem>>, vector<1x96xf32>
    %c0_178 = arith.constant 0 : index
    %c0_179 = arith.constant 0 : index
    %394 = vector.load %arg40[%c0_178, %c0_179] : memref<32x32xbf16, #tpu.memory_space<vmem>>, vector<32x32xbf16>
    %c0_180 = arith.constant 0 : index
    %c0_181 = arith.constant 0 : index
    %395 = vector.load %arg41[%c0_180, %c0_181] : memref<1x32xf32, #tpu.memory_space<vmem>>, vector<1x32xf32>
    %396 = arith.truncf %391 : vector<8x32xf32> to vector<8x32xbf16>
    %cst_182 = arith.constant dense<0.000000e+00> : vector<8x96xf32>
    %397 = tpu.matmul %396, %392, %cst_182 {dimension_numbers = #tpu.dot_dimension_numbers<[1], [0], [0], [1], [0, 0, 1, 1], [], []>} : vector<8x32xbf16>, vector<32x96xbf16>, vector<8x96xf32> -> vector<8x96xf32>
    %398 = vector.broadcast %393 : vector<1x96xf32> to vector<8x96xf32>
    %399 = arith.addf %397, %398 : vector<8x96xf32>
    %400 = vector.extract_strided_slice %399 {offsets = [0, 0], sizes = [8, 32], strides = [1, 1]} : vector<8x96xf32> to vector<8x32xf32>
    %cst_183 = arith.constant 0.353553385 : f32
    %401 = vector.broadcast %cst_183 : f32 to vector<8x32xf32>
    %402 = arith.mulf %400, %401 : vector<8x32xf32>
    %403 = vector.extract_strided_slice %399 {offsets = [0, 32], sizes = [8, 32], strides = [1, 1]} : vector<8x96xf32> to vector<8x32xf32>
    %404 = vector.extract_strided_slice %399 {offsets = [0, 64], sizes = [8, 32], strides = [1, 1]} : vector<8x96xf32> to vector<8x32xf32>
    %405 = vector.extract_strided_slice %402 {offsets = [0, 0], sizes = [8, 8], strides = [1, 1]} : vector<8x32xf32> to vector<8x8xf32>
    %406 = vector.extract_strided_slice %402 {offsets = [0, 8], sizes = [8, 8], strides = [1, 1]} : vector<8x32xf32> to vector<8x8xf32>
    %407 = vector.extract_strided_slice %402 {offsets = [0, 16], sizes = [8, 8], strides = [1, 1]} : vector<8x32xf32> to vector<8x8xf32>
    %408 = vector.extract_strided_slice %402 {offsets = [0, 24], sizes = [8, 8], strides = [1, 1]} : vector<8x32xf32> to vector<8x8xf32>
    %409 = tpu.concatenate %405, %406, %407, %408 in 0 : vector<8x8xf32>, vector<8x8xf32>, vector<8x8xf32>, vector<8x8xf32> -> vector<32x8xf32>
    %410 = vector.extract_strided_slice %403 {offsets = [0, 0], sizes = [8, 8], strides = [1, 1]} : vector<8x32xf32> to vector<8x8xf32>
    %411 = vector.extract_strided_slice %403 {offsets = [0, 8], sizes = [8, 8], strides = [1, 1]} : vector<8x32xf32> to vector<8x8xf32>
    %412 = vector.extract_strided_slice %403 {offsets = [0, 16], sizes = [8, 8], strides = [1, 1]} : vector<8x32xf32> to vector<8x8xf32>
    %413 = vector.extract_strided_slice %403 {offsets = [0, 24], sizes = [8, 8], strides = [1, 1]} : vector<8x32xf32> to vector<8x8xf32>
    %414 = tpu.concatenate %410, %411, %412, %413 in 0 : vector<8x8xf32>, vector<8x8xf32>, vector<8x8xf32>, vector<8x8xf32> -> vector<32x8xf32>
    %415 = vector.extract_strided_slice %404 {offsets = [0, 0], sizes = [8, 8], strides = [1, 1]} : vector<8x32xf32> to vector<8x8xf32>
    %416 = vector.extract_strided_slice %404 {offsets = [0, 8], sizes = [8, 8], strides = [1, 1]} : vector<8x32xf32> to vector<8x8xf32>
    %417 = vector.extract_strided_slice %404 {offsets = [0, 16], sizes = [8, 8], strides = [1, 1]} : vector<8x32xf32> to vector<8x8xf32>
    %418 = vector.extract_strided_slice %404 {offsets = [0, 24], sizes = [8, 8], strides = [1, 1]} : vector<8x32xf32> to vector<8x8xf32>
    %419 = tpu.concatenate %415, %416, %417, %418 in 0 : vector<8x8xf32>, vector<8x8xf32>, vector<8x8xf32>, vector<8x8xf32> -> vector<32x8xf32>
    %420 = arith.truncf %409 : vector<32x8xf32> to vector<32x8xbf16>
    %421 = arith.truncf %414 : vector<32x8xf32> to vector<32x8xbf16>
    %cst_184 = arith.constant dense<0.000000e+00> : vector<32x32xf32>
    %422 = tpu.matmul %420, %421, %cst_184 {dimension_numbers = #tpu.dot_dimension_numbers<[1], [1], [0], [0], [0, 0, 1, 0], [], []>} : vector<32x8xbf16>, vector<32x8xbf16>, vector<32x32xf32> -> vector<32x32xf32>
    %cst_185 = arith.constant 0.000000e+00 : f32
    %423 = vector.broadcast %cst_185 : f32 to vector<8x1xf32>
    %cst_186 = arith.constant 1.000000e+00 : f32
    %424 = vector.broadcast %cst_186 : f32 to vector<8x1xf32>
    %cst_187 = arith.constant 2.000000e+00 : f32
    %425 = vector.broadcast %cst_187 : f32 to vector<8x1xf32>
    %cst_188 = arith.constant 3.000000e+00 : f32
    %426 = vector.broadcast %cst_188 : f32 to vector<8x1xf32>
    %427 = tpu.concatenate %423, %424, %425, %426 in 0 : vector<8x1xf32>, vector<8x1xf32>, vector<8x1xf32>, vector<8x1xf32> -> vector<32x1xf32>
    %cst_189 = arith.constant 0.000000e+00 : f32
    %428 = vector.broadcast %cst_189 : f32 to vector<1x8xf32>
    %cst_190 = arith.constant 1.000000e+00 : f32
    %429 = vector.broadcast %cst_190 : f32 to vector<1x8xf32>
    %cst_191 = arith.constant 2.000000e+00 : f32
    %430 = vector.broadcast %cst_191 : f32 to vector<1x8xf32>
    %cst_192 = arith.constant 3.000000e+00 : f32
    %431 = vector.broadcast %cst_192 : f32 to vector<1x8xf32>
    %432 = tpu.concatenate %428, %429, %430, %431 in 1 : vector<1x8xf32>, vector<1x8xf32>, vector<1x8xf32>, vector<1x8xf32> -> vector<1x32xf32>
    %433 = vector.broadcast %427 : vector<32x1xf32> to vector<32x32xf32>
    %434 = vector.broadcast %432 : vector<1x32xf32> to vector<32x32xf32>
    %435 = arith.cmpf oeq, %433, %434 : vector<32x32xf32>
    %cst_193 = arith.constant -1.000000e+30 : f32
    %436 = vector.broadcast %cst_193 : f32 to vector<32x32xf32>
    %437 = arith.select %435, %422, %436 : vector<32x32xi1>, vector<32x32xf32>
    %cst_194 = arith.constant dense<0xFF800000> : vector<32xf32>
    %438 = vector.multi_reduction <maximumf>, %437, %cst_194 [1] : vector<32x32xf32> to vector<32xf32>
    %439 = vector.shape_cast %438 : vector<32xf32> to vector<32x1xf32>
    %440 = vector.broadcast %439 : vector<32x1xf32> to vector<32x32xf32>
    %441 = arith.subf %437, %440 : vector<32x32xf32>
    %442 = math.exp %441 : vector<32x32xf32>
    %cst_195 = arith.constant dense<0.000000e+00> : vector<32xf32>
    %443 = vector.multi_reduction <add>, %442, %cst_195 [1] : vector<32x32xf32> to vector<32xf32>
    %444 = vector.shape_cast %443 : vector<32xf32> to vector<32x1xf32>
    %445 = vector.broadcast %444 : vector<32x1xf32> to vector<32x32xf32>
    %446 = arith.divf %442, %445 : vector<32x32xf32>
    %447 = arith.truncf %446 : vector<32x32xf32> to vector<32x32xbf16>
    %448 = arith.truncf %419 : vector<32x8xf32> to vector<32x8xbf16>
    %cst_196 = arith.constant dense<0.000000e+00> : vector<32x8xf32>
    %449 = tpu.matmul %447, %448, %cst_196 {dimension_numbers = #tpu.dot_dimension_numbers<[1], [0], [0], [1], [0, 0, 1, 1], [], []>} : vector<32x32xbf16>, vector<32x8xbf16>, vector<32x8xf32> -> vector<32x8xf32>
    %450 = vector.extract_strided_slice %449 {offsets = [0, 0], sizes = [8, 8], strides = [1, 1]} : vector<32x8xf32> to vector<8x8xf32>
    %451 = vector.extract_strided_slice %449 {offsets = [8, 0], sizes = [8, 8], strides = [1, 1]} : vector<32x8xf32> to vector<8x8xf32>
    %452 = vector.extract_strided_slice %449 {offsets = [16, 0], sizes = [8, 8], strides = [1, 1]} : vector<32x8xf32> to vector<8x8xf32>
    %453 = vector.extract_strided_slice %449 {offsets = [24, 0], sizes = [8, 8], strides = [1, 1]} : vector<32x8xf32> to vector<8x8xf32>
    %454 = tpu.concatenate %450, %451, %452, %453 in 1 : vector<8x8xf32>, vector<8x8xf32>, vector<8x8xf32>, vector<8x8xf32> -> vector<8x32xf32>
    %455 = arith.truncf %454 : vector<8x32xf32> to vector<8x32xbf16>
    %cst_197 = arith.constant dense<0.000000e+00> : vector<8x32xf32>
    %456 = tpu.matmul %455, %394, %cst_197 {dimension_numbers = #tpu.dot_dimension_numbers<[1], [0], [0], [1], [0, 0, 1, 1], [], []>} : vector<8x32xbf16>, vector<32x32xbf16>, vector<8x32xf32> -> vector<8x32xf32>
    %457 = vector.broadcast %395 : vector<1x32xf32> to vector<8x32xf32>
    %458 = arith.addf %456, %457 : vector<8x32xf32>
    %459 = arith.addf %369, %458 : vector<8x32xf32>
    %c0_198 = arith.constant 0 : index
    %c0_199 = arith.constant 0 : index
    %460 = vector.load %arg42[%c0_198, %c0_199] : memref<1x32xf32, #tpu.memory_space<vmem>>, vector<1x32xf32>
    %c0_200 = arith.constant 0 : index
    %c0_201 = arith.constant 0 : index
    %461 = vector.load %arg43[%c0_200, %c0_201] : memref<1x32xf32, #tpu.memory_space<vmem>>, vector<1x32xf32>
    %cst_202 = arith.constant dense<0.000000e+00> : vector<8xf32>
    %462 = vector.multi_reduction <add>, %459, %cst_202 [1] : vector<8x32xf32> to vector<8xf32>
    %463 = vector.shape_cast %462 : vector<8xf32> to vector<8x1xf32>
    %cst_203 = arith.constant 3.200000e+01 : f32
    %464 = vector.broadcast %cst_203 : f32 to vector<8x1xf32>
    %465 = arith.divf %463, %464 : vector<8x1xf32>
    %466 = vector.broadcast %465 : vector<8x1xf32> to vector<8x32xf32>
    %467 = arith.subf %459, %466 : vector<8x32xf32>
    %468 = arith.mulf %467, %467 : vector<8x32xf32>
    %cst_204 = arith.constant dense<0.000000e+00> : vector<8xf32>
    %469 = vector.multi_reduction <add>, %468, %cst_204 [1] : vector<8x32xf32> to vector<8xf32>
    %470 = vector.shape_cast %469 : vector<8xf32> to vector<8x1xf32>
    %cst_205 = arith.constant 3.200000e+01 : f32
    %471 = vector.broadcast %cst_205 : f32 to vector<8x1xf32>
    %472 = arith.divf %470, %471 : vector<8x1xf32>
    %cst_206 = arith.constant 9.99999974E-6 : f32
    %473 = vector.broadcast %cst_206 : f32 to vector<8x1xf32>
    %474 = arith.addf %472, %473 : vector<8x1xf32>
    %475 = math.rsqrt %474 : vector<8x1xf32>
    %476 = vector.broadcast %475 : vector<8x1xf32> to vector<8x32xf32>
    %477 = arith.mulf %467, %476 : vector<8x32xf32>
    %478 = vector.broadcast %460 : vector<1x32xf32> to vector<8x32xf32>
    %479 = arith.mulf %477, %478 : vector<8x32xf32>
    %480 = vector.broadcast %461 : vector<1x32xf32> to vector<8x32xf32>
    %481 = arith.addf %479, %480 : vector<8x32xf32>
    %c0_207 = arith.constant 0 : index
    %c0_208 = arith.constant 0 : index
    %482 = vector.load %arg44[%c0_207, %c0_208] : memref<32x128xbf16, #tpu.memory_space<vmem>>, vector<32x128xbf16>
    %483 = arith.truncf %481 : vector<8x32xf32> to vector<8x32xbf16>
    %cst_209 = arith.constant dense<0.000000e+00> : vector<8x128xf32>
    %484 = tpu.matmul %483, %482, %cst_209 {dimension_numbers = #tpu.dot_dimension_numbers<[1], [0], [0], [1], [0, 0, 1, 1], [], []>} : vector<8x32xbf16>, vector<32x128xbf16>, vector<8x128xf32> -> vector<8x128xf32>
    %c0_210 = arith.constant 0 : index
    %c0_211 = arith.constant 0 : index
    %485 = vector.load %arg45[%c0_210, %c0_211] : memref<1x128xf32, #tpu.memory_space<vmem>>, vector<1x128xf32>
    %486 = vector.broadcast %485 : vector<1x128xf32> to vector<8x128xf32>
    %487 = arith.addf %484, %486 : vector<8x128xf32>
    %cst_212 = arith.constant 0.707106769 : f32
    %488 = vector.broadcast %cst_212 : f32 to vector<8x128xf32>
    %489 = arith.mulf %487, %488 : vector<8x128xf32>
    %490 = math.absf %489 : vector<8x128xf32>
    %cst_213 = arith.constant 0.327591091 : f32
    %491 = vector.broadcast %cst_213 : f32 to vector<8x128xf32>
    %492 = arith.mulf %491, %490 : vector<8x128xf32>
    %cst_214 = arith.constant 1.000000e+00 : f32
    %493 = vector.broadcast %cst_214 : f32 to vector<8x128xf32>
    %494 = arith.addf %493, %492 : vector<8x128xf32>
    %cst_215 = arith.constant 1.000000e+00 : f32
    %495 = vector.broadcast %cst_215 : f32 to vector<8x128xf32>
    %496 = arith.divf %495, %494 : vector<8x128xf32>
    %cst_216 = arith.constant 1.06140542 : f32
    %497 = vector.broadcast %cst_216 : f32 to vector<8x128xf32>
    %498 = arith.mulf %497, %496 : vector<8x128xf32>
    %cst_217 = arith.constant -1.45315206 : f32
    %499 = vector.broadcast %cst_217 : f32 to vector<8x128xf32>
    %500 = arith.addf %498, %499 : vector<8x128xf32>
    %501 = arith.mulf %500, %496 : vector<8x128xf32>
    %cst_218 = arith.constant 1.42141378 : f32
    %502 = vector.broadcast %cst_218 : f32 to vector<8x128xf32>
    %503 = arith.addf %501, %502 : vector<8x128xf32>
    %504 = arith.mulf %503, %496 : vector<8x128xf32>
    %cst_219 = arith.constant -0.284496725 : f32
    %505 = vector.broadcast %cst_219 : f32 to vector<8x128xf32>
    %506 = arith.addf %504, %505 : vector<8x128xf32>
    %507 = arith.mulf %506, %496 : vector<8x128xf32>
    %cst_220 = arith.constant 0.254829586 : f32
    %508 = vector.broadcast %cst_220 : f32 to vector<8x128xf32>
    %509 = arith.addf %507, %508 : vector<8x128xf32>
    %510 = arith.mulf %509, %496 : vector<8x128xf32>
    %cst_221 = arith.constant 0.000000e+00 : f32
    %511 = vector.broadcast %cst_221 : f32 to vector<8x128xf32>
    %512 = arith.subf %511, %490 : vector<8x128xf32>
    %513 = arith.mulf %512, %490 : vector<8x128xf32>
    %514 = math.exp %513 : vector<8x128xf32>
    %515 = arith.mulf %510, %514 : vector<8x128xf32>
    %cst_222 = arith.constant 1.000000e+00 : f32
    %516 = vector.broadcast %cst_222 : f32 to vector<8x128xf32>
    %517 = arith.subf %516, %515 : vector<8x128xf32>
    %cst_223 = arith.constant 0.000000e+00 : f32
    %518 = vector.broadcast %cst_223 : f32 to vector<8x128xf32>
    %519 = arith.cmpf oge, %489, %518 : vector<8x128xf32>
    %cst_224 = arith.constant 0.000000e+00 : f32
    %520 = vector.broadcast %cst_224 : f32 to vector<8x128xf32>
    %521 = arith.subf %520, %517 : vector<8x128xf32>
    %522 = arith.select %519, %517, %521 : vector<8x128xi1>, vector<8x128xf32>
    %cst_225 = arith.constant 5.000000e-01 : f32
    %523 = vector.broadcast %cst_225 : f32 to vector<8x128xf32>
    %524 = arith.mulf %523, %487 : vector<8x128xf32>
    %cst_226 = arith.constant 1.000000e+00 : f32
    %525 = vector.broadcast %cst_226 : f32 to vector<8x128xf32>
    %526 = arith.addf %525, %522 : vector<8x128xf32>
    %527 = arith.mulf %524, %526 : vector<8x128xf32>
    %c0_227 = arith.constant 0 : index
    %c0_228 = arith.constant 0 : index
    %528 = vector.load %arg46[%c0_227, %c0_228] : memref<128x64xbf16, #tpu.memory_space<vmem>>, vector<128x64xbf16>
    %529 = arith.truncf %527 : vector<8x128xf32> to vector<8x128xbf16>
    %cst_229 = arith.constant dense<0.000000e+00> : vector<8x64xf32>
    %530 = tpu.matmul %529, %528, %cst_229 {dimension_numbers = #tpu.dot_dimension_numbers<[1], [0], [0], [1], [0, 0, 1, 1], [], []>} : vector<8x128xbf16>, vector<128x64xbf16>, vector<8x64xf32> -> vector<8x64xf32>
    %c0_230 = arith.constant 0 : index
    %c0_231 = arith.constant 0 : index
    %531 = vector.load %arg47[%c0_230, %c0_231] : memref<1x64xf32, #tpu.memory_space<vmem>>, vector<1x64xf32>
    %532 = vector.broadcast %531 : vector<1x64xf32> to vector<8x64xf32>
    %533 = arith.addf %530, %532 : vector<8x64xf32>
    %534 = vector.extract_strided_slice %533 {offsets = [0, 0], sizes = [8, 32], strides = [1, 1]} : vector<8x64xf32> to vector<8x32xf32>
    %535 = arith.addf %459, %534 : vector<8x32xf32>
    %c0_232 = arith.constant 0 : index
    %c0_233 = arith.constant 0 : index
    %c0_234 = arith.constant 0 : index
    %536 = vector.load %arg48[%c0_232, %c0_233, %c0_234] : memref<1x8x64xf32, #tpu.memory_space<vmem>>, vector<1x8x32xf32>
    %537 = vector.shape_cast %536 : vector<1x8x32xf32> to vector<8x32xf32>
    %538 = vector.shape_cast %535 : vector<8x32xf32> to vector<1x8x32xf32>
    tpu.vector_store %arg48[%c0_232, %c0_233, %c0_234], %538 {strides = array<i32>} : memref<1x8x64xf32, #tpu.memory_space<vmem>>, vector<1x8x32xf32>,
    %539 = vector.extract_strided_slice %533 {offsets = [0, 32], sizes = [8, 32], strides = [1, 1]} : vector<8x64xf32> to vector<8x32xf32>
    %540 = arith.addf %459, %539 : vector<8x32xf32>
    %c0_235 = arith.constant 0 : index
    %c0_236 = arith.constant 0 : index
    %c32 = arith.constant 32 : index
    %541 = vector.load %arg48[%c0_235, %c0_236, %c32] : memref<1x8x64xf32, #tpu.memory_space<vmem>>, vector<1x8x32xf32>
    %542 = vector.shape_cast %541 : vector<1x8x32xf32> to vector<8x32xf32>
    %543 = vector.shape_cast %540 : vector<8x32xf32> to vector<1x8x32xf32>
    tpu.vector_store %arg48[%c0_235, %c0_236, %c32], %543 {strides = array<i32>} : memref<1x8x64xf32, #tpu.memory_space<vmem>>, vector<1x8x32xf32>,
    return
  }
  func.func @transform_0(%arg0: i32) -> (i32, i32, i32) {
    %c0_i32 = arith.constant 0 : i32
    %c0_i32_0 = arith.constant 0 : i32
    %c0_i32_1 = arith.constant 0 : i32
    return %arg0, %c0_i32, %c0_i32_0 : i32, i32, i32
  }
  func.func @transform_1(%arg0: i32) -> (i32, i32, i32) {
    %c0_i32 = arith.constant 0 : i32
    %c0_i32_0 = arith.constant 0 : i32
    %c0_i32_1 = arith.constant 0 : i32
    return %arg0, %c0_i32, %c0_i32_0 : i32, i32, i32
  }
  func.func @transform_2(%arg0: i32) -> (i32, i32) {
    %c0_i32 = arith.constant 0 : i32
    %c0_i32_0 = arith.constant 0 : i32
    %c0_i32_1 = arith.constant 0 : i32
    return %c0_i32, %c0_i32_0 : i32, i32
  }
  func.func @transform_3(%arg0: i32) -> (i32, i32) {
    %c0_i32 = arith.constant 0 : i32
    %c0_i32_0 = arith.constant 0 : i32
    %c0_i32_1 = arith.constant 0 : i32
    return %c0_i32, %c0_i32_0 : i32, i32
  }
  func.func @transform_4(%arg0: i32) -> (i32, i32) {
    %c0_i32 = arith.constant 0 : i32
    %c0_i32_0 = arith.constant 0 : i32
    %c0_i32_1 = arith.constant 0 : i32
    return %c0_i32, %c0_i32_0 : i32, i32
  }
  func.func @transform_5(%arg0: i32) -> (i32, i32) {
    %c0_i32 = arith.constant 0 : i32
    %c0_i32_0 = arith.constant 0 : i32
    %c0_i32_1 = arith.constant 0 : i32
    return %c0_i32, %c0_i32_0 : i32, i32
  }
  func.func @transform_6(%arg0: i32) -> (i32, i32) {
    %c0_i32 = arith.constant 0 : i32
    %c0_i32_0 = arith.constant 0 : i32
    %c0_i32_1 = arith.constant 0 : i32
    return %c0_i32, %c0_i32_0 : i32, i32
  }
  func.func @transform_7(%arg0: i32) -> (i32, i32) {
    %c0_i32 = arith.constant 0 : i32
    %c0_i32_0 = arith.constant 0 : i32
    %c0_i32_1 = arith.constant 0 : i32
    return %c0_i32, %c0_i32_0 : i32, i32
  }
  func.func @transform_8(%arg0: i32) -> (i32, i32) {
    %c0_i32 = arith.constant 0 : i32
    %c0_i32_0 = arith.constant 0 : i32
    %c0_i32_1 = arith.constant 0 : i32
    return %c0_i32, %c0_i32_0 : i32, i32
  }
  func.func @transform_9(%arg0: i32) -> (i32, i32) {
    %c0_i32 = arith.constant 0 : i32
    %c0_i32_0 = arith.constant 0 : i32
    %c0_i32_1 = arith.constant 0 : i32
    return %c0_i32, %c0_i32_0 : i32, i32
  }
  func.func @transform_10(%arg0: i32) -> (i32, i32) {
    %c0_i32 = arith.constant 0 : i32
    %c0_i32_0 = arith.constant 0 : i32
    %c0_i32_1 = arith.constant 0 : i32
    return %c0_i32, %c0_i32_0 : i32, i32
  }
  func.func @transform_11(%arg0: i32) -> (i32, i32) {
    %c0_i32 = arith.constant 0 : i32
    %c0_i32_0 = arith.constant 0 : i32
    %c0_i32_1 = arith.constant 0 : i32
    return %c0_i32, %c0_i32_0 : i32, i32
  }
  func.func @transform_12(%arg0: i32) -> (i32, i32) {
    %c0_i32 = arith.constant 0 : i32
    %c0_i32_0 = arith.constant 0 : i32
    %c0_i32_1 = arith.constant 0 : i32
    return %c0_i32, %c0_i32_0 : i32, i32
  }
  func.func @transform_13(%arg0: i32) -> (i32, i32) {
    %c0_i32 = arith.constant 0 : i32
    %c0_i32_0 = arith.constant 0 : i32
    %c0_i32_1 = arith.constant 0 : i32
    return %c0_i32, %c0_i32_0 : i32, i32
  }
  func.func @transform_14(%arg0: i32) -> (i32, i32) {
    %c0_i32 = arith.constant 0 : i32
    %c0_i32_0 = arith.constant 0 : i32
    %c0_i32_1 = arith.constant 0 : i32
    return %c0_i32, %c0_i32_0 : i32, i32
  }
  func.func @transform_15(%arg0: i32) -> (i32, i32) {
    %c0_i32 = arith.constant 0 : i32
    %c0_i32_0 = arith.constant 0 : i32
    %c0_i32_1 = arith.constant 0 : i32
    return %c0_i32, %c0_i32_0 : i32, i32
  }
  func.func @transform_16(%arg0: i32) -> (i32, i32) {
    %c0_i32 = arith.constant 0 : i32
    %c0_i32_0 = arith.constant 0 : i32
    %c0_i32_1 = arith.constant 0 : i32
    return %c0_i32, %c0_i32_0 : i32, i32
  }
  func.func @transform_17(%arg0: i32) -> (i32, i32) {
    %c0_i32 = arith.constant 0 : i32
    %c0_i32_0 = arith.constant 0 : i32
    %c0_i32_1 = arith.constant 0 : i32
    return %c0_i32, %c0_i32_0 : i32, i32
  }
  func.func @transform_18(%arg0: i32) -> (i32, i32) {
    %c0_i32 = arith.constant 0 : i32
    %c0_i32_0 = arith.constant 0 : i32
    %c0_i32_1 = arith.constant 0 : i32
    return %c0_i32, %c0_i32_0 : i32, i32
  }
  func.func @transform_19(%arg0: i32) -> (i32, i32) {
    %c0_i32 = arith.constant 0 : i32
    %c0_i32_0 = arith.constant 0 : i32
    %c0_i32_1 = arith.constant 0 : i32
    return %c0_i32, %c0_i32_0 : i32, i32
  }
  func.func @transform_20(%arg0: i32) -> (i32, i32) {
    %c0_i32 = arith.constant 0 : i32
    %c0_i32_0 = arith.constant 0 : i32
    %c0_i32_1 = arith.constant 0 : i32
    return %c0_i32, %c0_i32_0 : i32, i32
  }
  func.func @transform_21(%arg0: i32) -> (i32, i32) {
    %c0_i32 = arith.constant 0 : i32
    %c0_i32_0 = arith.constant 0 : i32
    %c0_i32_1 = arith.constant 0 : i32
    return %c0_i32, %c0_i32_0 : i32, i32
  }
  func.func @transform_22(%arg0: i32) -> (i32, i32) {
    %c0_i32 = arith.constant 0 : i32
    %c0_i32_0 = arith.constant 0 : i32
    %c0_i32_1 = arith.constant 0 : i32
    return %c0_i32, %c0_i32_0 : i32, i32
  }
  func.func @transform_23(%arg0: i32) -> (i32, i32) {
    %c0_i32 = arith.constant 0 : i32
    %c0_i32_0 = arith.constant 0 : i32
    %c0_i32_1 = arith.constant 0 : i32
    return %c0_i32, %c0_i32_0 : i32, i32
  }
  func.func @transform_24(%arg0: i32) -> (i32, i32) {
    %c0_i32 = arith.constant 0 : i32
    %c0_i32_0 = arith.constant 0 : i32
    %c0_i32_1 = arith.constant 0 : i32
    return %c0_i32, %c0_i32_0 : i32, i32
  }
  func.func @transform_25(%arg0: i32) -> (i32, i32) {
    %c0_i32 = arith.constant 0 : i32
    %c0_i32_0 = arith.constant 0 : i32
    %c0_i32_1 = arith.constant 0 : i32
    return %c0_i32, %c0_i32_0 : i32, i32
  }
  func.func @transform_26(%arg0: i32) -> (i32, i32) {
    %c0_i32 = arith.constant 0 : i32
    %c0_i32_0 = arith.constant 0 : i32
    %c0_i32_1 = arith.constant 0 : i32
    return %c0_i32, %c0_i32_0 : i32, i32
  }
  func.func @transform_27(%arg0: i32) -> (i32, i32) {
    %c0_i32 = arith.constant 0 : i32
    %c0_i32_0 = arith.constant 0 : i32
    %c0_i32_1 = arith.constant 0 : i32
    return %c0_i32, %c0_i32_0 : i32, i32
  }
  func.func @transform_28(%arg0: i32) -> (i32, i32) {
    %c0_i32 = arith.constant 0 : i32
    %c0_i32_0 = arith.constant 0 : i32
    %c0_i32_1 = arith.constant 0 : i32
    return %c0_i32, %c0_i32_0 : i32, i32
  }
  func.func @transform_29(%arg0: i32) -> (i32, i32) {
    %c0_i32 = arith.constant 0 : i32
    %c0_i32_0 = arith.constant 0 : i32
    %c0_i32_1 = arith.constant 0 : i32
    return %c0_i32, %c0_i32_0 : i32, i32
  }
  func.func @transform_30(%arg0: i32) -> (i32, i32) {
    %c0_i32 = arith.constant 0 : i32
    %c0_i32_0 = arith.constant 0 : i32
    %c0_i32_1 = arith.constant 0 : i32
    return %c0_i32, %c0_i32_0 : i32, i32
  }
  func.func @transform_31(%arg0: i32) -> (i32, i32) {
    %c0_i32 = arith.constant 0 : i32
    %c0_i32_0 = arith.constant 0 : i32
    %c0_i32_1 = arith.constant 0 : i32
    return %c0_i32, %c0_i32_0 : i32, i32
  }
  func.func @transform_32(%arg0: i32) -> (i32, i32) {
    %c0_i32 = arith.constant 0 : i32
    %c0_i32_0 = arith.constant 0 : i32
    %c0_i32_1 = arith.constant 0 : i32
    return %c0_i32, %c0_i32_0 : i32, i32
  }
  func.func @transform_33(%arg0: i32) -> (i32, i32) {
    %c0_i32 = arith.constant 0 : i32
    %c0_i32_0 = arith.constant 0 : i32
    %c0_i32_1 = arith.constant 0 : i32
    return %c0_i32, %c0_i32_0 : i32, i32
  }
  func.func @transform_34(%arg0: i32) -> (i32, i32) {
    %c0_i32 = arith.constant 0 : i32
    %c0_i32_0 = arith.constant 0 : i32
    %c0_i32_1 = arith.constant 0 : i32
    return %c0_i32, %c0_i32_0 : i32, i32
  }
  func.func @transform_35(%arg0: i32) -> (i32, i32) {
    %c0_i32 = arith.constant 0 : i32
    %c0_i32_0 = arith.constant 0 : i32
    %c0_i32_1 = arith.constant 0 : i32
    return %c0_i32, %c0_i32_0 : i32, i32
  }
  func.func @transform_36(%arg0: i32) -> (i32, i32) {
    %c0_i32 = arith.constant 0 : i32
    %c0_i32_0 = arith.constant 0 : i32
    %c0_i32_1 = arith.constant 0 : i32
    return %c0_i32, %c0_i32_0 : i32, i32
  }
  func.func @transform_37(%arg0: i32) -> (i32, i32) {
    %c0_i32 = arith.constant 0 : i32
    %c0_i32_0 = arith.constant 0 : i32
    %c0_i32_1 = arith.constant 0 : i32
    return %c0_i32, %c0_i32_0 : i32, i32
  }
  func.func @transform_38(%arg0: i32) -> (i32, i32) {
    %c0_i32 = arith.constant 0 : i32
    %c0_i32_0 = arith.constant 0 : i32
    %c0_i32_1 = arith.constant 0 : i32
    return %c0_i32, %c0_i32_0 : i32, i32
  }
  func.func @transform_39(%arg0: i32) -> (i32, i32) {
    %c0_i32 = arith.constant 0 : i32
    %c0_i32_0 = arith.constant 0 : i32
    %c0_i32_1 = arith.constant 0 : i32
    return %c0_i32, %c0_i32_0 : i32, i32
  }
  func.func @transform_40(%arg0: i32) -> (i32, i32) {
    %c0_i32 = arith.constant 0 : i32
    %c0_i32_0 = arith.constant 0 : i32
    %c0_i32_1 = arith.constant 0 : i32
    return %c0_i32, %c0_i32_0 : i32, i32
  }
  func.func @transform_41(%arg0: i32) -> (i32, i32) {
    %c0_i32 = arith.constant 0 : i32
    %c0_i32_0 = arith.constant 0 : i32
    %c0_i32_1 = arith.constant 0 : i32
    return %c0_i32, %c0_i32_0 : i32, i32
  }
  func.func @transform_42(%arg0: i32) -> (i32, i32) {
    %c0_i32 = arith.constant 0 : i32
    %c0_i32_0 = arith.constant 0 : i32
    %c0_i32_1 = arith.constant 0 : i32
    return %c0_i32, %c0_i32_0 : i32, i32
  }
  func.func @transform_43(%arg0: i32) -> (i32, i32) {
    %c0_i32 = arith.constant 0 : i32
    %c0_i32_0 = arith.constant 0 : i32
    %c0_i32_1 = arith.constant 0 : i32
    return %c0_i32, %c0_i32_0 : i32, i32
  }
  func.func @transform_44(%arg0: i32) -> (i32, i32) {
    %c0_i32 = arith.constant 0 : i32
    %c0_i32_0 = arith.constant 0 : i32
    %c0_i32_1 = arith.constant 0 : i32
    return %c0_i32, %c0_i32_0 : i32, i32
  }
  func.func @transform_45(%arg0: i32) -> (i32, i32) {
    %c0_i32 = arith.constant 0 : i32
    %c0_i32_0 = arith.constant 0 : i32
    %c0_i32_1 = arith.constant 0 : i32
    return %c0_i32, %c0_i32_0 : i32, i32
  }
  func.func @transform_46(%arg0: i32) -> (i32, i32) {
    %c0_i32 = arith.constant 0 : i32
    %c0_i32_0 = arith.constant 0 : i32
    %c0_i32_1 = arith.constant 0 : i32
    return %c0_i32, %c0_i32_0 : i32, i32
  }
  func.func @transform_47(%arg0: i32) -> (i32, i32, i32) {
    %c0_i32 = arith.constant 0 : i32
    %c0_i32_0 = arith.constant 0 : i32
    %c0_i32_1 = arith.constant 0 : i32
    return %arg0, %c0_i32, %c0_i32_0 : i32, i32, i32
  }
  func.func @transform_48(%arg0: i32) -> (i32, i32, i32) {
    %c0_i32 = arith.constant 0 : i32
    %c0_i32_0 = arith.constant 0 : i32
    %c0_i32_1 = arith.constant 0 : i32
    return %arg0, %c0_i32, %c0_i32_0 : i32, i32, i32
  }
}

</mosaic_0001>

<bundles_post_ra>
// kernel: robust_seed_generator_forward.3
= control target key start
LH: loop header
LB: loop body
LE: loop exit
PB: predicated region body
PF: predicated region fallthrough
CT: control target
= control target key end

     0   :  { %s2166_s0 = inlined_call_operand.vmem [shape: f32[2,16,32], index: 0, kind: input, shape index: {}]   ;;  %s2167_s1 = inlined_call_operand.vmem [shape: f32[2,1,32], index: 1, kind: input, shape index: {}]   ;;  %s2168_s2 = inlined_call_operand.vmem [shape: f32[2,1,16], index: 2, kind: input, shape index: {}]   ;;  %s2169_s3 = inlined_call_operand.vmem [shape: bf16[32,16], index: 3, kind: input, shape index: {}]   ;;  %s2170_s4 = inlined_call_operand.vmem [shape: f32[1,16], index: 4, kind: input, shape index: {}]   ;;  %s2171_s5 = inlined_call_operand.vmem [shape: bf16[16,32], index: 5, kind: input, shape index: {}]   ;;  %s2172_s6 = inlined_call_operand.vmem [shape: f32[1,32], index: 6, kind: input, shape index: {}]   ;;  %s2173_s7 = inlined_call_operand.vmem [shape: bf16[48,32], index: 7, kind: input, shape index: {}]   ;;  %s2174_s8 = inlined_call_operand.vmem [shape: f32[1,32], index: 8, kind: input, shape index: {}]   ;;  %s2175_s9 = inlined_call_operand.vmem [shape: bf16[32,16], index: 9, kind: input, shape index: {}]   ;;  %s2176_s10 = inlined_call_operand.vmem [shape: f32[1,16], index: 10, kind: input, shape index: {}]   ;;  %s2177_s11 = inlined_call_operand.vmem [shape: bf16[16,3], index: 11, kind: input, shape index: {}]   ;;  %s2178_s12 = inlined_call_operand.vmem [shape: f32[1,3], index: 12, kind: input, shape index: {}]   ;;  %s2179_s13 = inlined_call_operand.vmem [shape: bf16[80,32], index: 13, kind: input, shape index: {}]   ;;  %s2180_s14 = inlined_call_operand.vmem [shape: f32[1,32], index: 14, kind: input, shape index: {}]   ;;  %s2181_s15 = inlined_call_operand.vmem [shape: bf16[32,16], index: 15, kind: input, shape index: {}]   ;;  %s2182_s16 = inlined_call_operand.vmem [shape: f32[1,16], index: 16, kind: input, shape index: {}]   ;;  %s2183_s17 = inlined_call_operand.vmem [shape: bf16[16,3], index: 17, kind: input, shape index: {}]   ;;  %s2184_s18 = inlined_call_operand.vmem [shape: f32[1,3], index: 18, kind: input, shape index: {}]   ;;  %s2185_s19 = inlined_call_operand.vmem [shape: f32[2,16,3], index: 19, kind: output, shape index: {0}]   ;;  %s2186_s20 = inlined_call_operand.hbm [shape: f32[2,16,32], index: 20, kind: output, shape index: {1}]   ;;  %s2187_s21 = inlined_call_operand.hbm [shape: f32[2,1,3], index: 21, kind: output, shape index: {2}]  }
   0x1   :  { %2197 = sst [smem:[#allocation13_spill]] %s2166_s0 }
   0x2   :  { %2198 = sst [smem:[#allocation14_spill]] %s2167_s1 }
   0x3   :  { %2199 = sst [smem:[#allocation15_spill]] %s2168_s2 }
   0x4   :  { %2200 = sst [smem:[#allocation16_spill]] %s2169_s3 }
   0x5   :  { %2201 = sst [smem:[#allocation17_spill]] %s2170_s4 }
   0x6   :  { %2202 = sst [smem:[#allocation18_spill]] %s2171_s5 }
   0x7   :  { %2203 = sst [smem:[#allocation19_spill]] %s2172_s6 }
   0x8   :  { %2204 = sst [smem:[#allocation20_spill]] %s2173_s7 }
   0x9   :  { %2205 = sst [smem:[#allocation21_spill]] %s2174_s8 }
   0xa   :  { %2206 = sst [smem:[#allocation22_spill]] %s2175_s9 }
   0xb   :  { %2207 = sst [smem:[#allocation23_spill]] %s2176_s10 }
   0xc   :  { %2208 = sst [smem:[#allocation24_spill]] %s2177_s11 }
   0xd   :  { %2209 = sst [smem:[#allocation25_spill]] %s2178_s12 }
   0xe   :  { %27 = vsyncpa [#allocation3], 0 }
   0xf   :  { %29 = vsyncpa [#allocation3 + $0x1], 0 }
  0x10   :  { %30 = vsyncpa [#allocation5], 0 }
  0x11   :  { %32 = vsyncpa [#allocation5 + $0x1], 0  ;;  %s1876_s2 = smov 0   ;;  %s1878_s25 = smov 0  }
  0x12   :  { %s1880_s26 = smov 0   ;;  %s1882_s27 = smov 0  }
  0x13 LB: > { %2210 = sst [smem:[#allocation8_spill]] %s1745_s2  ;;  %s1897_s3 = sadd.s32 4294967295, %s1757_s27   ;;  %s1757_s27 = sphi %s1882_s27, %s2235_s27   ;;  %s1753_s26 = sphi %s1880_s26, %s2237_s26   ;;  %s1749_s25 = sphi %s1878_s25, %s2239_s25   ;;  %s1745_s2 = sphi %s1876_s2, %s2238_s2  }
  0x14   : > { %2211 = sst [smem:[#allocation9_spill]] %s1753_s26  ;;  %s1457_s28 = sadd.s32 4294967294, %s1757_s27  }
  0x15   : > { %s1901_s29 = sadd.s32 1, %s1757_s27   ;;  %s485_s0 = sadd.s32 1, %s1753_s26 }
  0x16   : > { %2212 = sst [smem:[#allocation10_spill]] %s1901_s29  ;;  %s482_s4 = ssub.s32 %s1757_s27, %s1901_s29 }
  0x17   : > { %p495_p0 = scmp.ne.s32.totalorder %s1753_s26, %s1749_s25  ;;  %p483_p1 = scmp.eq.s32.totalorder %s482_s4, 0 }
  0x18   : > { %p496_p2 = scmp.eq.s32.totalorder %s1897_s3, 1  ;;  %p501_p3 = scmp.ne.s32.totalorder %s1749_s25, %s1745_s2 }
  0x19   : > { %p502_p4 = scmp.eq.s32.totalorder %s1457_s28, 1  ;;  %p1460_p7 = scmp.ge.s32.totalorder %s1757_s27, 1 }
  0x1a   : > { %s1912_s30 = scalar_select %p483_p1, %s1753_s26, %s485_s0  }
  0x1b   : > { %p1914_p5 = por %p496_p2, %p495_p0  ;;  %p1918_p6 = por %p502_p4, %p501_p3 }
  0x1c   : > { %2213 = sst [smem:[#allocation11_spill]] %s1912_s30  ;;  %p614_p8 = scmp.lt.s32.totalorder %s1757_s27, 3 }
  0x1d   : > { %s2215_s22 = scalar_select %p1918_p6, 1, 0 }
  0x1e   : > { %p615_p9 = pnand %p1460_p7, %p614_p8 }
  0x1f   : > { %2216 = sst [smem:[#allocation12_spill]] %s2215_s22  ;;  %s2217_s24 = sld [smem:[#allocation16_spill]] (!%p615_p9)  ;;  %v1759_v1 = vmov (!%p615_p9), 0.0   ;;  %vm1760_vm0 = vmmov (!%p615_p9), 0   ;;  %vm732_vm1 = vcmask (!%p615_p9), 261120   ;;  %v1037_v8 = vlaneseq (!%p615_p9)  ;;  %v1652_v29 = vld [vmem:[%s2179_s13] sm:$0xff] (!%p615_p9)  }
  0x20   : > { %618 = sbr.rel (%p615_p9) target bundleno = 1161 (0x489), region = 96  ;;  %1531 = vmatprep.subr.bf16.mxu0 (!%p615_p9), %v1759_v1  ;;  %1539 = vmatprep.subr.bf16.mxu1 (!%p615_p9), %v1759_v1  ;;  %p689_p10 = scmp.lt.s32.totalorder (!%p615_p9), %s1897_s3, 1  ;;  %vm795_vm2 = vcmask (!%p615_p9), 130048   ;;  %vm877_vm3 = vcmask (!%p615_p9), 392192   ;;  %v1653_v30 = vld [vmem:[%s2179_s13 + $0x8] sm:$0xff] (!%p615_p9)   ;;  %v1654_v31 = vld [vmem:[%s2179_s13 + $0x10] sm:$0xff] (!%p615_p9)  }
  0x21   : > { %1535 = vmatprep.mubr.msk.bf16.mxu0 (!%p615_p9), %vm1760_vm0, %v1759_v1  ;;  %1541 = vmatprep.mubr.msk.bf16.mxu1 (!%p615_p9), %vm1760_vm0, %v1759_v1  ;;  %s2218_s0 = sld [smem:[#allocation15_spill]] (!%p615_p9)  ;;  %s2219_s29 = sld [smem:[#allocation13_spill]] (!%p615_p9)  ;;  %v1959_v9 = vshrl.u32 (!%p615_p9), %v1037_v8, 7  ;;  %v1655_v32 = vld [vmem:[%s2179_s13 + $0x18] sm:$0xff] (!%p615_p9)   ;;  %v1656_v33 = vld [vmem:[%s2179_s13 + $0x20] sm:$0xff] (!%p615_p9)   ;;  %vm1095_vm4 = vcmask (!%p615_p9), 654336  }
  0x22   : > { %s1761_s2 = smov (!%p615_p9), 32   ;;  %s2221_s30 = sld [smem:[#allocation14_spill]] (!%p615_p9)  ;;  %v1483_v56 = vld [vmem:[%s2180_s14] ss:$0 sm:$0xff] (!%p615_p9)  ;;  %vm1274_vm5 = vcmask (!%p615_p9), 16384  }
  0x23   : > { %v1039_v10 = vsub.s32 (!%p615_p9), 0, %v1959_v9  ;;  %s2222_s28 = sld [smem:[#allocation17_spill]] (!%p615_p9)  ;;  %s2223_s7 = sld [smem:[#allocation20_spill]] (!%p615_p9) }
  0x24   : > { %s2224_s9 = sld [smem:[#allocation22_spill]] (!%p615_p9)  ;;  %s2225_s6 = sld [smem:[#allocation19_spill]] (!%p615_p9) }
  0x25   : > { %v1646_v0 = vld [vmem:[%s2217_s24] sm:$0xff] (!%p615_p9)   ;;  %v1647_v2 = vld [vmem:[%s2217_s24 + $0x8] sm:$0xff] (!%p615_p9)   ;;  %s2226_s8 = sld [smem:[#allocation21_spill]] (!%p615_p9)  ;;  %s2227_s11 = sld [smem:[#allocation24_spill]] (!%p615_p9) }
  0x26   : > { %1532 = vmatpush3.bf16.msra.mxu0 (!%p615_p9), %v1646_v0  ;;  %s2228_s10 = sld [smem:[#allocation23_spill]] (!%p615_p9)  ;;  %s2229_s12 = sld [smem:[#allocation25_spill]] (!%p615_p9) }
  0x27   : > { %1533 = vmatprep.subr.bf16.mxu0 %v1759_v1  ;;  %s1939_s4 = scalar_select %p689_p10, %s1897_s3, 1 }
  0x29   : > { %s2195_s23 = sshll.u32 %s1939_s4, 4  ;;  %s699_s24 = scalar_lea.vmem %s2218_s0, %s1939_s4  ;;  %v1466_v15 = vld [vmem:[%s2222_s28] ss:$0 sm:$0xff]  ;;  %v1650_v26 = vld [vmem:[%s2223_s7 + $0x8] sm:$0xff]   ;;  %v1651_v27 = vld [vmem:[%s2223_s7 + $0x10] sm:$0xff]  }
  0x2a   : > { %1534 = vmatpush3.bf16.msra.mxu0 %v1647_v2  ;;  %s693_s22 = scalar_lea.vmem %s2219_s29, %s2195_s23  ;;  %v1473_v3 = vld [vmem:[%s699_s24] ss:$0 sm:$0xff]  ;;  %s2220_s0 = sld [smem:[#allocation18_spill]]  ;;  %v1658_v35 = vld [vmem:[%s2224_s9 + $0x8] sm:$0xff]  }
  0x2b   : > { %1555 = vmatprep.subr.bf16.mxu0 %v1759_v1  ;;  %v706_v4 = vld [vmem:[%s693_s22] sm:$0xff]  ;;  %v707_v5 = vld [vmem:[%s693_s22 + $0x8] sm:$0xff]  ;;  %847 = vrot.lane.b32.xlu0 %v1473_v3, %s1761_s2  ;;  %s696_s22 = scalar_lea.vmem %s2221_s30, %s1939_s4 }
  0x2c   : > { %v712_v6 = vpack.c.bf16 %v707_v5, %v706_v4  ;;  %v840_v11 = vld [vmem:[%s696_s22] sm:$0x1]  ;;  %s1505_s22 = sshll.u32 %s1897_s3, 8 }
  0x2d   : > { %v1649_v24 = vld [vmem:[%s2223_s7] sm:$0xff]  }
  0x2e   : > { %1536 = vmatmul.mubr.msk.bf16.vlgmr.msra.gmra.mrb[0].mxu0 %vm732_vm1, %v712_v6  ;;  %v1657_v34 = vld [vmem:[%s2224_s9] sm:$0xff]  }
  0x2f   : > { %1559 = vmatprep.mubr.msk.bf16.mxu0 %vm1760_vm0, %v1759_v1  ;;  %1556 = vmatpush3.bf16.msra.mxu0 %v1657_v34  ;;  %v1470_v36 = vld [vmem:[%s2225_s6] ss:$0 sm:$0xff]  ;;  %s1762_s6 = smov [#allocation2]  }
  0x30   : > { %v1648_v7 = vld [vmem:[%s2220_s0] sm:$0xff]   ;;  %1557 = vmatprep.subr.bf16.mxu0 %v1759_v1 }
  0x31   : > { %1540 = vmatpush3.bf16.msra.mxu1 %v1648_v7  ;;  %v858_v47 = vld [vmem:[%s2226_s8] sm:$0x1] }
  0x32   : > { %1545 = vmatprep.subr.bf16.mxu1 %v1759_v1  ;;  %v1659_v55 = vld [vmem:[%s2227_s11] sm:$0xff]  }
  0x33   : > { %1558 = vmatpush3.bf16.msra.mxu0 %v1658_v35  ;;  %v927_v3 = vld [vmem:[%s2228_s10] sm:$0x1] }
  0x34   : > { %1563 = vmatprep.subr.bf16.mxu0 %v1759_v1 }
  0x9d   : > { %v848_v12 = vpop.permute.xlu0 %847 }
  0x9e   : > { %v850_v13 = vsel %vm732_vm1, %v840_v11, %v848_v12  ;;  %v1660_v12 = vld [vmem:[%s2181_s15] sm:$0xff]  }
  0x9f   : > { %v1040_v14 = vrot.slane %v850_v13, %v1039_v10  ;;  %v857_v28 = vpack.c.bf16 %v850_v13, %v850_v13 }
  0xa1   : > { %1042 = vrot.lane.b32.xlu0 %v1040_v14, %s1761_s2  ;;  %s2017_s2 = sand.u32 1, %s1749_s25   ;;  %v1661_v14 = vld [vmem:[%s2181_s15 + $0x8] sm:$0xff]  }
  0xa2   : > { %s1461_s29 = sshll.u32 %s2017_s2, 4  ;;  %s2196_s0 = scalar_lea.vmem [#allocation4], %s2017_s2 }
  0xa3   : > { %s2023_s24 = scalar_lea.vmem [#allocation2], %s1461_s29  ;;  %s2085_s29 = scalar_lea.hbm %s2186_s20, %s1505_s22 }
  0xa4   : > { %s1311_s30 = sshll.u32 %s2023_s24, 4  ;;  %s1291_s23 = scalar_lea.sflag [#allocation3], %s2017_s2  ;;  %s2078_s30 = int_to_ptr.vmem [resolvable:$true] %s1311_s30 }
 0x101   : > { %v770_v16 = vpop.f32.mrb[0].mxu0 }
 0x102   : > { %v771_v17 = vadd.f32 %v1466_v15, %v770_v16  ;;  %v1537_v18 = vpop.f32.mrb[1].mxu0  ;;  %v987_v16 = vld [vmem:[%s2229_s12] sm:$0x1] }
 0x103   : > { %v773_v19 = vpop.f32.mrb[2].mxu0 }
 0x104   : > { %v774_v20 = vadd.f32 %v1466_v15, %v773_v19  ;;  %v1538_v21 = vpop.f32.mrb[3].mxu0  ;;  %v777_v22 = vmax.f32 %v771_v17, 0.0  ;;  %v1662_v15 = vld [vmem:[%s2183_s17] sm:$0xff]  }
 0x106   : > { %v778_v23 = vmax.f32 %v774_v20, 0.0 }
 0x108   : > { %v781_v25 = vpack.c.bf16 %v778_v23, %v777_v22 }
 0x10a   : > { %1542 = vmatmul.mubr.msk.bf16.vlgmr.msra.gmra.mrb[0].mxu1 %vm795_vm2, %v781_v25 }
 0x10b   : > { %1546 = vmatpush3.bf16.msra.mxu1 %v1649_v24  ;;  %1551 = vmatprep.mubr.msk.bf16.mxu1 %vm1760_vm0, %v1759_v1 }
 0x10c   : > { %1547 = vmatprep.subr.bf16.mxu1 %v1759_v1 }
 0x10f   : > { %1548 = vmatpush3.bf16.msra.mxu1 %v1650_v26 }
 0x110   : > { %1549 = vmatprep.subr.bf16.mxu1 %v1759_v1 }
 0x113   : > { %1550 = vmatpush3.bf16.msra.mxu1 %v1651_v27  ;;  %v1043_v43 = vpop.permute.xlu0 %1042 }
 0x114   : > { %1569 = vmatprep.subr.bf16.mxu1 %v1759_v1 }
 0x116   : > { %1552 = vmatmul.mubr.msk.bf16.vlgmr.msra.gmra.mrb[4].mxu1 %vm877_vm3, %v857_v28 }
 0x117   : > { %1570 = vmatpush3.bf16.msra.mxu1 %v1652_v29  ;;  %1579 = vmatprep.mubr.msk.bf16.mxu1 %vm1760_vm0, %v1759_v1 }
 0x118   : > { %1571 = vmatprep.subr.bf16.mxu1 %v1759_v1 }
 0x11b   : > { %1572 = vmatpush3.bf16.msra.mxu1 %v1653_v30 }
 0x11c   : > { %1573 = vmatprep.subr.bf16.mxu1 %v1759_v1 }
 0x11f   : > { %1574 = vmatpush3.bf16.msra.mxu1 %v1654_v31 }
 0x120   : > { %1575 = vmatprep.subr.bf16.mxu1 %v1759_v1 }
 0x123   : > { %1576 = vmatpush3.bf16.msra.mxu1 %v1655_v32 }
 0x124   : > { %1577 = vmatprep.subr.bf16.mxu1 %v1759_v1 }
 0x127   : > { %1578 = vmatpush3.bf16.msra.mxu1 %v1656_v33 }
 0x1dd   : > { %v833_v37 = vpop.f32.mrb[0].mxu1 }
 0x1de   : > { %v834_v38 = vadd.f32 %v1470_v36, %v833_v37  ;;  %v1543_v39 = vpop.f32.mrb[1].mxu1 }
 0x1df   : > { %v836_v40 = vpop.f32.mrb[2].mxu1 }
 0x1e0   : > { %1272 = vst.msk [vmem:[%s2023_s24] sm:$0xff] %vm732_vm1, %v834_v38  ;;  %v837_v41 = vadd.f32 %v1470_v36, %v836_v40  ;;  %v1544_v42 = vpop.f32.mrb[3].mxu1  ;;  %v1045_v44 = vsel %vm732_vm1, %v834_v38, %v1043_v43 }
 0x1e2   : > { %v1046_v45 = vsel %vm732_vm1, %v837_v41, %v1043_v43  ;;  %1273 = vst.msk [vmem:[%s2023_s24 + $0x8] sm:$0xff] %vm732_vm1, %v837_v41  ;;  %s1667_s24 = sshll.u32 %s1762_s6, 4  ;;  %s1668_s24 = int_to_ptr.vmem [resolvable:$false] %s1667_s24 }
 0x1e3   : > { %v1057_v46 = vpack.c.bf16 %v1046_v45, %v1045_v44  ;;  %s1669_s7 = scalar_lea.vmem %s1668_s24, 512  ;;  %p1670_p0 = scmp.lt.s32.totalorder %s2078_s30, %s1668_s24 }
 0x1e5   : > { %1580 = vmatmul.mubr.msk.bf16.vlgmr.msra.gmra.mrb[8].mxu1 %vm1095_vm4, %v1057_v46 }
 0x1e9   : > { %v915_v48 = vpop.f32.mrb[4].mxu1 }
 0x1ea   : > { %v916_v49 = vadd.f32 %v915_v48, %v858_v47  ;;  %v1553_v50 = vpop.f32.mrb[5].mxu1 }
 0x1eb   : > { %v918_v51 = vpop.f32.mrb[6].mxu1 }
 0x1ec   : > { %v921_v52 = vmax.f32 %v916_v49, 0.0  ;;  %v1554_v53 = vpop.f32.mrb[7].mxu1 }
 0x1ee   : > { %v926_v54 = vpack.c.bf16 %v921_v52, %v921_v52 }
 0x1f0   : > { %1560 = vmatmul.mubr.msk.bf16.vlgmr.msra.gmra.mrb[4].mxu0 %vm732_vm1, %v926_v54 }
 0x1f1   : > { %1565 = vmatprep.mubr.msk.bf16.mxu0 %vm1760_vm0, %v1759_v1  ;;  %1564 = vmatpush3.bf16.msra.mxu0 %v1659_v55 }
 0x1f2   : > { %1583 = vmatprep.subr.bf16.mxu0 %v1759_v1 }
 0x2b8   : > { %v1133_v57 = vpop.f32.mrb[8].mxu1 }
 0x2b9   : > { %v1134_v58 = vadd.f32 %v1483_v56, %v1133_v57  ;;  %v1581_v59 = vpop.f32.mrb[9].mxu1 }
 0x2ba   : > { %v1136_v60 = vpop.f32.mrb[10].mxu1 }
 0x2bb   : > { %v1137_v61 = vadd.f32 %v1483_v56, %v1136_v60  ;;  %v1582_v62 = vpop.f32.mrb[11].mxu1  ;;  %v1140_v63 = vmax.f32 %v1134_v58, 0.0 }
 0x2bd   : > { %v1141_v0 = vmax.f32 %v1137_v61, 0.0 }
 0x2bf   : > { %v1146_v2 = vpack.c.bf16 %v1141_v0, %v1140_v63 }
 0x2c3   : > { %v977_v4 = vpop.f32.mrb[4].mxu0 }
 0x2c4   : > { %v978_v5 = vadd.f32 %v977_v4, %v927_v3  ;;  %v1561_v6 = vpop.f32.mrb[5].mxu0 }
 0x2c5   : > { %v980_v7 = vpop.f32.mrb[6].mxu0 }
 0x2c6   : > { %v983_v8 = vmax.f32 %v978_v5, 0.0  ;;  %v1562_v11 = vpop.f32.mrb[7].mxu0 }
 0x2c8   : > { %v986_v13 = vpack.c.bf16 %v983_v8, %v983_v8 }
 0x2ca   : > { %1566 = vmatmul.mubr.msk.bf16.vlgmr.msra.gmra.mrb[8].mxu0 %vm795_vm2, %v986_v13 }
 0x2cb   : > { %1584 = vmatpush3.bf16.msra.mxu0 %v1660_v12  ;;  %1587 = vmatprep.mubr.msk.bf16.mxu0 %vm1760_vm0, %v1759_v1 }
 0x2cc   : > { %1585 = vmatprep.subr.bf16.mxu0 %v1759_v1 }
 0x2cf   : > { %1586 = vmatpush3.bf16.msra.mxu0 %v1661_v14 }
 0x2d0   : > { %1591 = vmatprep.subr.bf16.mxu0 %v1759_v1 }
 0x2d2   : > { %1588 = vmatmul.mubr.msk.bf16.vlgmr.msra.gmra.mrb[12].mxu0 %vm732_vm1, %v1146_v2 }
 0x2d3   : > { %1593 = vmatprep.mubr.msk.bf16.mxu0 %vm1760_vm0, %v1759_v1  ;;  %1592 = vmatpush3.bf16.msra.mxu0 %v1662_v15  ;;  %v1490_v1 = vld [vmem:[%s2182_s16] ss:$0 sm:$0xff] }
 0x39d   : > { %v1031_v17 = vpop.f32.mrb[8].mxu0 }
 0x39e   : > { %v2067_v18 = vadd.f32 %v1031_v17, %v987_v16  ;;  %v1567_v19 = vpop.f32.mrb[9].mxu0 }
 0x39f   : > { %v1034_v20 = vpop.f32.mrb[10].mxu0 }
 0x3a0   : > { %v1568_v21 = vpop.f32.mrb[11].mxu0  ;;  %1275 = vst.msk [vmem:[%s2196_s0] sm:$0x1] %vm1274_vm5, %v2067_v18  ;;  %s1663_s0 = scalar_lea.vmem %s2078_s30, 256 }
 0x3a1   : > { %p1664_p11 = scmp.ne.s32.totalorder %s2078_s30, %s1663_s0  ;;  %p1671_p1 = scmp.lt.s32.totalorder %s1669_s7, %s1663_s0 }
 0x3a3   : > { %p1665_p12 = pnand %p1664_p11, %p1914_p5  ;;  %p1672_p2 = por %p1671_p1, %p1670_p0 }
 0x3a5   : > { %v1203_v22 = vpop.f32.mrb[12].mxu0  ;;  %p1666_p13 = pneg %p1665_p12 }
 0x3a6   : > { %v1204_v23 = vadd.f32 %v1490_v1, %v1203_v22  ;;  %v1589_v24 = vpop.f32.mrb[13].mxu0 }
 0x3a7   : > { %v1206_v25 = vpop.f32.mrb[14].mxu0  ;;  %p1673_p3 = pnand %p1672_p2, %p1666_p13 }
 0x3a8   : > { %v1207_v26 = vadd.f32 %v1490_v1, %v1206_v25  ;;  %v1590_v27 = vpop.f32.mrb[15].mxu0  ;;  %v1210_v28 = vmax.f32 %v1204_v23, 0.0 }
 0x3aa   : > { %v1211_v29 = vmax.f32 %v1207_v26, 0.0 }
 0x3ac   : > { %v1214_v30 = vpack.c.bf16 %v1211_v29, %v1210_v28 }
 0x3ae   : > { %1594 = vmatmul.mubr.msk.bf16.vlgmr.msra.gmra.mrb[16].mxu0 %vm795_vm2, %v1214_v30 }
 0x3af   : > { %1676 = shalt.err (!%p1673_p3)
}
 0x3b0   : > { %s1677_s22 = scalar_lea.hbm %s2085_s29, 256  ;;  %s1681_s6 = scalar_lea.hbm %s2186_s20, 512 }
 0x3b1   : > { %p1678_p4 = scmp.ne.s32.totalorder %s2085_s29, %s1677_s22  ;;  %p1682_p9 = scmp.lt.u32.totalorder %s2085_s29, %s2186_s20 }
 0x3b2   : > { %p1683_p10 = scmp.lt.u32.totalorder %s1681_s6, %s1677_s22  ;;  %p1685_p12 = scmp.lt.u32.totalorder %s1677_s22, %s2085_s29 }
 0x3b3   : > { %p1679_p7 = pnand %p1678_p4, %p1914_p5 }
 0x3b4   : > { %p1684_p11 = por %p1683_p10, %p1682_p9 }
 0x3b5   : > { %p1680_p8 = pneg %p1679_p7 }
 0x3b6   : > { %p1686_p13 = por %p1685_p12, %p1684_p11 }
 0x3b8   : > { %p1687_p0 = pnand %p1686_p13, %p1680_p8 }
 0x3ba   : > { %1690 = shalt.err (!%p1687_p0)
}
 0x3bb   : > { %s1763_s7 = smov 128   ;;  %s1764_s0 = smov 8  }
 0x3bc   : > { %1597 = dma.vmem_to_hbm [thread:$0]  (%p1914_p5), %s2078_s30, 256, %s2085_s29, %s1291_s23, %s1763_s7, %s1763_s7, %s1764_s0  }
 0x3bd   : > { %s2230_s1 = sshll.u32 %s1897_s3, 4  ;;  %s2231_s6 = scalar_lea.vmem [#allocation4], %s2017_s2 }
 0x3be   : > { %s2116_s22 = scalar_lea.hbm %s2187_s21, %s2230_s1  ;;  %s1327_s24 = sshll.u32 %s2231_s6, 4  ;;  %s1328_s24 = int_to_ptr.vmem [resolvable:$true] %s1327_s24 }
 0x3bf   : > { %s1296_s8 = scalar_lea.sflag [#allocation5], %s2017_s2  ;;  %s1691_s9 = scalar_lea.vmem %s1328_s24, 16 }
 0x3c0   : > { %p1692_p1 = scmp.ne.s32.totalorder %s1328_s24, %s1691_s9  ;;  %s1765_s10 = smov [#allocation4]  }
 0x3c1   : > { %s1695_s11 = sshll.u32 %s1765_s10, 4  ;;  %s1696_s11 = int_to_ptr.vmem [resolvable:$false] %s1695_s11 }
 0x3c2   : > { %p1693_p2 = pnand %p1692_p1, %p1914_p5  ;;  %s1697_s12 = scalar_lea.vmem %s1696_s11, 32 }
 0x3c3   : > { %p1698_p4 = scmp.lt.s32.totalorder %s1328_s24, %s1696_s11  ;;  %p1699_p7 = scmp.lt.s32.totalorder %s1697_s12, %s1691_s9 }
 0x3c4   : > { %p1694_p3 = pneg %p1693_p2 }
 0x3c5   : > { %p1700_p8 = por %p1699_p7, %p1698_p4 }
 0x3c7   : > { %p1701_p9 = pnand %p1700_p8, %p1694_p3 }
 0x3c9   : > { %1704 = shalt.err (!%p1701_p9)
}
 0x3ca   : > { %s1705_s3 = scalar_lea.hbm %s2116_s22, 16  ;;  %s1709_s10 = scalar_lea.hbm %s2187_s21, 32 }
 0x3cb   : > { %p1706_p10 = scmp.ne.s32.totalorder %s2116_s22, %s1705_s3  ;;  %p1710_p13 = scmp.lt.u32.totalorder %s2116_s22, %s2187_s21 }
 0x3cc   : > { %p1711_p0 = scmp.lt.u32.totalorder %s1709_s10, %s1705_s3  ;;  %p1713_p2 = scmp.lt.u32.totalorder %s1705_s3, %s2116_s22 }
 0x3cd   : > { %p1707_p11 = pnand %p1706_p10, %p1914_p5 }
 0x3ce   : > { %p1712_p1 = por %p1711_p0, %p1710_p13 }
 0x3cf   : > { %p1708_p12 = pneg %p1707_p11 }
 0x3d0   : > { %p1714_p3 = por %p1713_p2, %p1712_p1 }
 0x3d2   : > { %p1715_p4 = pnand %p1714_p3, %p1708_p12 }
 0x3d4   : > { %1718 = shalt.err (!%p1715_p4)
}
 0x3d5   : > { %1598 = dma.vmem_to_hbm [thread:$0]  (%p1914_p5), %s1328_s24, 16, %s2116_s22, %s1296_s8   ;;  %v1494_v31 = vld [vmem:[%s2184_s18] ss:$0 sm:$0xff]  ;;  %v1279_v33 = vrot.slane %v2067_v18, %v1039_v10  ;;  %vm1282_vm6 = vcmask 23552  }
 0x3d6   : > { %s2232_s29 = sshll.u32 %s1939_s4, 4 }
 0x3d7   : > { %s704_s1 = scalar_lea.vmem %s2185_s19, %s2232_s29 }
 0x481   : > { %v1265_v32 = vpop.f32.mrb[16].mxu0 }
 0x482   : > { %v1266_v34 = vadd.f32 %v1494_v31, %v1265_v32  ;;  %v1595_v35 = vpop.f32.mrb[17].mxu0 }
 0x483   : > { %v1268_v36 = vpop.f32.mrb[18].mxu0 }
 0x484   : > { %v1280_v37 = vadd.f32 %v1279_v33, %v1266_v34  ;;  %v1269_v38 = vadd.f32 %v1494_v31, %v1268_v36  ;;  %v1596_v39 = vpop.f32.mrb[19].mxu0 }
 0x486   : > { %1283 = vst.msk [vmem:[%s704_s1] sm:$0xff] %vm1282_vm6, %v1280_v37  ;;  %v1281_v40 = vadd.f32 %v1279_v33, %v1269_v38 }
 0x488   : > { %1284 = vst.msk [vmem:[%s704_s1 + $0x8] sm:$0xff] %vm1282_vm6, %v1281_v40 }
 0x489 PF: > { %s2233_s8 = sld [smem:[#allocation8_spill]]  ;;  %p1608_p5 = scmp.ge.s32.totalorder %s1757_s27, 2 }
 0x48b   : > { %p1602_p7 = pnand %p1608_p5, %p1918_p6 }
 0x48f   : > { %s1347_s28 = sand.u32 1, %s2233_s8  }
 0x490   : > { %s1348_s4 = scalar_lea.sflag [#allocation3], %s1347_s28 }
 0x491   : > { %1736 = dma.done.wait (!%p1602_p7), %s1348_s4, 256  }
 0x492   : > { %1738 = vsyncadd (!%p1602_p7), %s1348_s4, 4294967040  ;;  %s1357_s26 = scalar_lea.sflag [#allocation5], %s1347_s28 }
 0x493   : > { %1740 = dma.done.wait (!%p1602_p7), %s1357_s26, 16  }
 0x494   : > { %1742 = vsyncadd (!%p1602_p7), %s1357_s26, 4294967280  ;;  %s2235_s27 = sld [smem:[#allocation10_spill]]  ;;  %s2236_s22 = sld [smem:[#allocation9_spill]] }
 0x495   : > { %s2237_s26 = sld [smem:[#allocation11_spill]]  ;;  %s2238_s2 = smov %s1749_s25 }
 0x49a   : > { %p35_p8 = scmp.ge.s32.totalorder %s2235_s27, 4   ;;  %s2239_s25 = smov %s2236_s22 }
 0x49c   :  { %37 = sbr.rel (!%p35_p8) target bundleno = 19 (0x13), region = 166 }
 0x4a3   :  { %1361 = vsyncpa [#allocation3], 1 }
 0x4a4   :  { %1363 = vsyncpa [#allocation3 + $0x1], 1 }
 0x4a5   :  { %1364 = vsyncpa [#allocation5], 1 }
 0x4a6   :  { %1366 = vsyncpa [#allocation5 + $0x1], 1 }

// kernel: robust_seed_generator_forward.2
= control target key start
LH: loop header
LB: loop body
LE: loop exit
PB: predicated region body
PF: predicated region fallthrough
CT: control target
= control target key end

     0   :  { %s5318_s6 = smov 1   ;;  %s5319_s10 = smov 2   ;;  %s6324_s0 = inlined_call_operand.smem [shape: u32[49], index: -1, kind: input, shape index: {}] }
   0x1   :  { %s5397_s5 = sld [smem:[%s6324_s0]]   ;;  %s5320_s14 = smov 3  }
   0x2   :  { %s5402_s9 = sld [smem:[%s6324_s0 + %s5318_s6]]   ;;  %s5321_s18 = smov 4  }
   0x3   :  { %s5407_s13 = sld [smem:[%s6324_s0 + %s5319_s10]]   ;;  %s5322_s22 = smov 5  }
   0x4   :  { %s5412_s17 = sld [smem:[%s6324_s0 + %s5320_s14]]   ;;  %s5323_s26 = smov 6  }
   0x5   :  { %s5417_s21 = sld [smem:[%s6324_s0 + %s5321_s18]]   ;;  %s5324_s30 = smov 7  }
   0x6   :  { %s5422_s25 = sld [smem:[%s6324_s0 + %s5322_s22]]   ;;  %s5325_s4 = smov 8  }
   0x7   :  { %6363 = sst [smem:[#allocation17_spill]] %s5397_s5  ;;  %s5326_s10 = smov 9  }
   0x8   :  { %s5427_s29 = sld [smem:[%s6324_s0 + %s5323_s26]]   ;;  %s5327_s15 = smov 10  }
   0x9   :  { %6364 = sst [smem:[#allocation18_spill]] %s5407_s13  ;;  %s5328_s20 = smov 11  }
   0xa   :  { %s5432_s3 = sld [smem:[%s6324_s0 + %s5324_s30]]   ;;  %s5329_s26 = smov 12  }
   0xb   :  { %s5437_s8 = sld [smem:[%s6324_s0 + %s5325_s4]]   ;;  %s5330_s1 = smov 13  }
   0xc   :  { %s5442_s14 = sld [smem:[%s6324_s0 + %s5326_s10]]   ;;  %s5331_s7 = smov 14  }
   0xd   :  { %s5447_s19 = sld [smem:[%s6324_s0 + %s5327_s15]]   ;;  %s5332_s15 = smov 15  }
   0xe   :  { %6365 = sst [smem:[#allocation19_spill]] %s5427_s29  ;;  %s5333_s22 = smov 16  }
   0xf   :  { %s5452_s24 = sld [smem:[%s6324_s0 + %s5328_s20]]   ;;  %s5334_s28 = smov 17  }
  0x10   :  { %6366 = sst [smem:[#allocation20_spill]] %s5432_s3 }
  0x11   :  { %6367 = sst [smem:[#allocation21_spill]] %s5437_s8 }
  0x12   :  { %s5457_s30 = sld [smem:[%s6324_s0 + %s5329_s26]]  }
  0x13   :  { %6368 = sst [smem:[#allocation22_spill]] %s5447_s19 }
  0x14   :  { %s5462_s6 = sld [smem:[%s6324_s0 + %s5330_s1]]  }
  0x15   :  { %6369 = sst [smem:[#allocation23_spill]] %s5452_s24 }
  0x16   :  { %s5467_s12 = sld [smem:[%s6324_s0 + %s5331_s7]]   ;;  %s5335_s7 = smov 18  }
  0x17   :  { %s5472_s20 = sld [smem:[%s6324_s0 + %s5332_s15]]   ;;  %s5336_s15 = smov 19  }
  0x18   :  { %6370 = sst [smem:[#allocation24_spill]] %s5457_s30 }
  0x19   :  { %s5477_s27 = sld [smem:[%s6324_s0 + %s5333_s22]]   ;;  %s5337_s22 = smov 20  }
  0x1a   :  { %6371 = sst [smem:[#allocation25_spill]] %s5462_s6 }
  0x1b   :  { %s5482_s4 = sld [smem:[%s6324_s0 + %s5334_s28]]   ;;  %s5338_s28 = smov 21  }
  0x1c   :  { %6372 = sst [smem:[#allocation26_spill]] %s5467_s12 }
  0x1d   :  { %6373 = sst [smem:[#allocation27_spill]] %s5472_s20 }
  0x1e   :  { %s5487_s12 = sld [smem:[%s6324_s0 + %s5335_s7]]   ;;  %s5339_s7 = smov 22  }
  0x1f   :  { %6374 = sst [smem:[#allocation28_spill]] %s5477_s27 }
  0x20   :  { %s5492_s20 = sld [smem:[%s6324_s0 + %s5336_s15]]   ;;  %s5340_s15 = smov 23  }
  0x21   :  { %6375 = sst [smem:[#allocation29_spill]] %s5482_s4 }
  0x22   :  { %s5497_s27 = sld [smem:[%s6324_s0 + %s5337_s22]]   ;;  %s5341_s22 = smov 24  }
  0x23   :  { %s5502_s4 = sld [smem:[%s6324_s0 + %s5338_s28]]   ;;  %s5342_s28 = smov 25  }
  0x24   :  { %6376 = sst [smem:[#allocation30_spill]] %s5487_s12 }
  0x25   :  { %s5507_s12 = sld [smem:[%s6324_s0 + %s5339_s7]]   ;;  %s5343_s7 = smov 26  }
  0x26   :  { %6377 = sst [smem:[#allocation31_spill]] %s5492_s20 }
  0x27   :  { %s5512_s20 = sld [smem:[%s6324_s0 + %s5340_s15]]   ;;  %s5344_s15 = smov 27  }
  0x28   :  { %6378 = sst [smem:[#allocation32_spill]] %s5497_s27 }
  0x29   :  { %6379 = sst [smem:[#allocation33_spill]] %s5502_s4 }
  0x2a   :  { %s5517_s27 = sld [smem:[%s6324_s0 + %s5341_s22]]   ;;  %s5345_s22 = smov 28  }
  0x2b   :  { %6380 = sst [smem:[#allocation34_spill]] %s5507_s12 }
  0x2c   :  { %s5522_s4 = sld [smem:[%s6324_s0 + %s5342_s28]]   ;;  %s5346_s28 = smov 29  }
  0x2d   :  { %6381 = sst [smem:[#allocation35_spill]] %s5512_s20 }
  0x2e   :  { %s5527_s12 = sld [smem:[%s6324_s0 + %s5343_s7]]   ;;  %s5347_s7 = smov 30  }
  0x2f   :  { %s5532_s20 = sld [smem:[%s6324_s0 + %s5344_s15]]   ;;  %s5348_s15 = smov 31  }
  0x30   :  { %6382 = sst [smem:[#allocation36_spill]] %s5517_s27 }
  0x31   :  { %s5537_s27 = sld [smem:[%s6324_s0 + %s5345_s22]]   ;;  %s5349_s22 = smov 32  }
  0x32   :  { %6383 = sst [smem:[#allocation37_spill]] %s5522_s4 }
  0x33   :  { %s5542_s4 = sld [smem:[%s6324_s0 + %s5346_s28]]   ;;  %s5350_s28 = smov 33  }
  0x34   :  { %6384 = sst [smem:[#allocation38_spill]] %s5527_s12 }
  0x35   :  { %6385 = sst [smem:[#allocation39_spill]] %s5532_s20 }
  0x36   :  { %s5547_s12 = sld [smem:[%s6324_s0 + %s5347_s7]]   ;;  %s5351_s7 = smov 34  }
  0x37   :  { %6386 = sst [smem:[#allocation40_spill]] %s5537_s27 }
  0x38   :  { %s5552_s20 = sld [smem:[%s6324_s0 + %s5348_s15]]   ;;  %s5352_s15 = smov 35  }
  0x39   :  { %6387 = sst [smem:[#allocation41_spill]] %s5542_s4 }
  0x3a   :  { %s5557_s27 = sld [smem:[%s6324_s0 + %s5349_s22]]   ;;  %s5353_s22 = smov 36  }
  0x3b   :  { %s5562_s4 = sld [smem:[%s6324_s0 + %s5350_s28]]   ;;  %s5354_s28 = smov 37  }
  0x3c   :  { %6388 = sst [smem:[#allocation42_spill]] %s5547_s12 }
  0x3d   :  { %s5567_s12 = sld [smem:[%s6324_s0 + %s5351_s7]]   ;;  %s5355_s7 = smov 38  }
  0x3e   :  { %6389 = sst [smem:[#allocation43_spill]] %s5552_s20 }
  0x3f   :  { %s5572_s20 = sld [smem:[%s6324_s0 + %s5352_s15]]   ;;  %s5356_s15 = smov 39  }
  0x40   :  { %6390 = sst [smem:[#allocation44_spill]] %s5557_s27 }
  0x41   :  { %6391 = sst [smem:[#allocation45_spill]] %s5562_s4 }
  0x42   :  { %s5577_s27 = sld [smem:[%s6324_s0 + %s5353_s22]]   ;;  %s5357_s22 = smov 40  }
  0x43   :  { %6392 = sst [smem:[#allocation46_spill]] %s5567_s12 }
  0x44   :  { %s5582_s4 = sld [smem:[%s6324_s0 + %s5354_s28]]   ;;  %s5358_s28 = smov 41  }
  0x45   :  { %6393 = sst [smem:[#allocation47_spill]] %s5572_s20 }
  0x46   :  { %s5587_s12 = sld [smem:[%s6324_s0 + %s5355_s7]]   ;;  %s5359_s7 = smov 42  }
  0x47   :  { %s5592_s20 = sld [smem:[%s6324_s0 + %s5356_s15]]   ;;  %s5360_s15 = smov 43  }
  0x48   :  { %s5597_s30 = sld [smem:[%s6324_s0 + %s5357_s22]]   ;;  %s5361_s22 = smov 44  }
  0x49   :  { %s5607_s24 = sld [smem:[%s6324_s0 + %s5359_s7]]   ;;  %s5363_s7 = smov 46  }
  0x4a   :  { %6394 = sst [smem:[#allocation48_spill]] %s5582_s4 }
  0x4b   :  { %s5602_s4 = sld [smem:[%s6324_s0 + %s5358_s28]]   ;;  %s5362_s28 = smov 45  }
  0x4c   :  { %s5617_s6 = sld [smem:[%s6324_s0 + %s5361_s22]]   ;;  %s5365_s22 = smov 48  }
  0x4d   :  { %6395 = sst [smem:[#allocation49_spill]] %s5592_s20 }
  0x4e   :  { %s5612_s20 = sld [smem:[%s6324_s0 + %s5360_s15]]   ;;  %s5364_s15 = smov 47  }
  0x4f   :  { %s5622_s13 = sld [smem:[%s6324_s0 + %s5362_s28]]  }
  0x50   :  { %s5627_s19 = sld [smem:[%s6324_s0 + %s5363_s7]]  }
  0x51   :  { %6396 = sst [smem:[#allocation50_spill]] %s5602_s4 }
  0x52   :  { %6398 = sst [smem:[#allocation52_spill]] %s5617_s6 }
  0x53   :  { %s5637_s29 = sld [smem:[%s6324_s0 + %s5365_s22]]  }
  0x54   :  { %6397 = sst [smem:[#allocation51_spill]] %s5612_s20 }
  0x55   :  { %s5632_s20 = sld [smem:[%s6324_s0 + %s5364_s15]]  }
  0x56   :  { %103 = vsyncpa [#allocation3], 0 }
  0x57   :  { %104 = vsyncpa [#allocation5], 0 }
  0x58   :  { %105 = vsyncpa [#allocation8], 0 }
  0x59   :  { %106 = vsyncpa [#allocation11], 0  ;;  %s5639_s28 = smov 0  }
  0x5a LB: > { %s6399_s6 = sld [smem:[#allocation52_spill]]  ;;  %s6400_s4 = sld [smem:[#allocation50_spill]]  ;;  %s5316_s28 = sphi %s5639_s28, %s112_s28  }
  0x5b   : > { %s5366_s1 = smov [#allocation4]   ;;  %s5645_s7 = sadd.s32 4294967295, %s5316_s28  }
  0x5c   : > { %s1295_s2 = sshll.u32 %s5366_s1, 4  ;;  %p4285_p0 = scmp.ge.s32.totalorder %s5316_s28, 1  ;;  %s5650_s2 = int_to_ptr.vmem [resolvable:$true] %s1295_s2 }
  0x5d   : > { %p1166_p1 = scmp.lt.s32.totalorder %s5316_s28, 3  ;;  %p6336_p2 = scmp.eq.s32.totalorder %s5645_s7, 0 }
  0x5e   : > { %s5367_s10 = smov [#allocation7]   ;;  %s5368_s15 = smov [#allocation10]  }
  0x5f   : > { %p5652_p3 = pnand %p4285_p0, %p1166_p1  ;;  %s1320_s11 = sshll.u32 %s5367_s10, 4  ;;  %s5658_s11 = int_to_ptr.vmem [resolvable:$true] %s1320_s11 }
  0x60   : > { %s1345_s16 = sshll.u32 %s5368_s15, 4  ;;  %s5369_s22 = smov [#allocation2]   ;;  %s5666_s16 = int_to_ptr.vmem [resolvable:$true] %s1345_s16 }
  0x61   : > { %s6401_s0 = scalar_select %p5652_p3, 1, 0 }
  0x62   : > { %p4787_p4 = pneg %p5652_p3  ;;  %s1281_s23 = sshll.u32 %s5369_s22, 4  ;;  %s5668_s23 = int_to_ptr.vmem [resolvable:$true] %s1281_s23 }
  0x63   : > { %s5098_s26 = scalar_lea.hbm %s5587_s12, 16 }
  0x64   : > { %p5662_p5 = pnand %p6336_p2, %p4787_p4  ;;  %p5099_p6 = scmp.ne.s32.totalorder %s5587_s12, %s5098_s26 }
  0x65   : > { %p5105_p10 = scmp.lt.u32.totalorder %s5098_s26, %s5587_s12 }
  0x66   : > { %p5674_p7 = pneg %p5662_p5 }
  0x68   : > { %p5101_p8 = pnand %p5674_p7, %p5099_p6 }
  0x6a   : > { %p5102_p9 = pneg %p5101_p8 }
  0x6c   : > { %p5107_p11 = pnand %p5105_p10, %p5102_p9 }
  0x6e   : > { %5110 = shalt.err (!%p5107_p11)
}
  0x6f   : > { %s5111_s10 = scalar_lea.vmem %s5650_s2, 16  ;;  %s5118_s15 = scalar_lea.vmem %s5650_s2, 32 }
  0x70   : > { %p5112_p12 = scmp.ne.s32.totalorder %s5650_s2, %s5111_s10  ;;  %p5119_p1 = scmp.lt.s32.totalorder %s5650_s2, %s5650_s2 }
  0x71   : > { %p5120_p4 = scmp.lt.s32.totalorder %s5118_s15, %s5111_s10 }
  0x72   : > { %p5114_p13 = pnand %p5112_p12, %p5674_p7 }
  0x73   : > { %p5121_p2 = por %p5120_p4, %p5119_p1 }
  0x74   : > { %p5115_p0 = pneg %p5114_p13 }
  0x76   : > { %p5122_p6 = pnand %p5121_p2, %p5115_p0 }
  0x78   : > { %5125 = shalt.err (!%p5122_p6)
}
  0x79   : > { %4793 = dma.hbm_to_vmem [thread:$0]  (!%p5662_p5), %s5587_s12, 16, %s5650_s2, [#allocation5]  }
  0x7a   : > { %s5126_s22 = scalar_lea.hbm %s6400_s4, 16 }
  0x7b   : > { %p5127_p8 = scmp.ne.s32.totalorder %s6400_s4, %s5126_s22  ;;  %p5133_p11 = scmp.lt.u32.totalorder %s5126_s22, %s6400_s4 }
  0x7d   : > { %p5129_p9 = pnand %p5127_p8, %p5674_p7 }
  0x7f   : > { %p5130_p10 = pneg %p5129_p9 }
  0x81   : > { %p5135_p12 = pnand %p5133_p11, %p5130_p10 }
  0x83   : > { %5138 = shalt.err (!%p5135_p12)
}
  0x84   : > { %s5139_s26 = scalar_lea.vmem %s5658_s11, 16  ;;  %s5146_s10 = scalar_lea.vmem %s5658_s11, 32 }
  0x85   : > { %p5140_p2 = scmp.ne.s32.totalorder %s5658_s11, %s5139_s26  ;;  %p5147_p1 = scmp.lt.s32.totalorder %s5658_s11, %s5658_s11 }
  0x86   : > { %p5148_p4 = scmp.lt.s32.totalorder %s5146_s10, %s5139_s26 }
  0x87   : > { %p5142_p13 = pnand %p5140_p2, %p5674_p7 }
  0x88   : > { %p5149_p6 = por %p5148_p4, %p5147_p1 }
  0x89   : > { %p5143_p0 = pneg %p5142_p13 }
  0x8b   : > { %p5150_p8 = pnand %p5149_p6, %p5143_p0 }
  0x8d   : > { %5153 = shalt.err (!%p5150_p8)
}
  0x8e   : > { %4799 = dma.hbm_to_vmem [thread:$0]  (!%p5662_p5), %s6400_s4, 16, %s5658_s11, [#allocation8]  }
  0x8f   : > { %s5154_s2 = scalar_lea.hbm %s6399_s6, 16 }
  0x90   : > { %p5155_p9 = scmp.ne.s32.totalorder %s6399_s6, %s5154_s2  ;;  %p5161_p12 = scmp.lt.u32.totalorder %s5154_s2, %s6399_s6 }
  0x92   : > { %p5157_p10 = pnand %p5155_p9, %p5674_p7 }
  0x94   : > { %p5158_p11 = pneg %p5157_p10 }
  0x96   : > { %p5163_p2 = pnand %p5161_p12, %p5158_p11 }
  0x98   : > { %5166 = shalt.err (!%p5163_p2)
}
  0x99   : > { %s5167_s15 = scalar_lea.vmem %s5666_s16, 16  ;;  %s5174_s22 = scalar_lea.vmem %s5666_s16, 32 }
  0x9a   : > { %p5168_p13 = scmp.ne.s32.totalorder %s5666_s16, %s5167_s15  ;;  %p5175_p4 = scmp.lt.s32.totalorder %s5666_s16, %s5666_s16 }
  0x9b   : > { %p5176_p6 = scmp.lt.s32.totalorder %s5174_s22, %s5167_s15 }
  0x9c   : > { %p5170_p0 = pnand %p5168_p13, %p5674_p7 }
  0x9d   : > { %p5177_p8 = por %p5176_p6, %p5175_p4 }
  0x9e   : > { %p5171_p1 = pneg %p5170_p0 }
  0xa0   : > { %p5178_p9 = pnand %p5177_p8, %p5171_p1 }
  0xa2   : > { %5181 = shalt.err (!%p5178_p9)
}
  0xa3   : > { %4805 = dma.hbm_to_vmem [thread:$0]  (!%p5662_p5), %s6399_s6, 16, %s5666_s16, [#allocation11]  }
  0xa4   : > { %s5182_s11 = scalar_lea.hbm %s5577_s27, 16 }
  0xa5   : > { %p5183_p10 = scmp.ne.s32.totalorder %s5577_s27, %s5182_s11  ;;  %p5189_p2 = scmp.lt.u32.totalorder %s5182_s11, %s5577_s27 }
  0xa7   : > { %p5185_p11 = pnand %p5183_p10, %p5674_p7 }
  0xa9   : > { %p5186_p12 = pneg %p5185_p11 }
  0xab   : > { %p5191_p13 = pnand %p5189_p2, %p5186_p12 }
  0xad   : > { %5194 = shalt.err (!%p5191_p13)
}
  0xae   : > { %s5195_s26 = scalar_lea.vmem %s5668_s23, 16  ;;  %s5202_s10 = scalar_lea.vmem %s5668_s23, 32 }
  0xaf   : > { %p5196_p0 = scmp.ne.s32.totalorder %s5668_s23, %s5195_s26  ;;  %p5203_p6 = scmp.lt.s32.totalorder %s5668_s23, %s5668_s23 }
  0xb0   : > { %p5204_p8 = scmp.lt.s32.totalorder %s5202_s10, %s5195_s26 }
  0xb1   : > { %p5198_p1 = pnand %p5196_p0, %p5674_p7 }
  0xb2   : > { %p5205_p9 = por %p5204_p8, %p5203_p6 }
  0xb3   : > { %p5199_p4 = pneg %p5198_p1 }
  0xb5   : > { %p5206_p10 = pnand %p5205_p9, %p5199_p4 }
  0xb7   : > { %5209 = shalt.err (!%p5206_p10)
}
  0xb8   : > { %4790 = dma.hbm_to_vmem [thread:$0]  (!%p5662_p5), %s5577_s27, 16, %s5668_s23, [#allocation3]  }
  0xb9   : > { %s5370_s16 = smov [#allocation6]   ;;  %s5371_s15 = smov [#allocation9]  }
  0xba   : > { %s1309_s2 = sshll.u32 %s5370_s16, 4  ;;  %s1331_s22 = sshll.u32 %s5371_s15, 4  ;;  %s1310_s2 = int_to_ptr.vmem [resolvable:$true] %s1309_s2  ;;  %s1332_s22 = int_to_ptr.vmem [resolvable:$true] %s1331_s22 }
  0xbb   : > { %s5210_s11 = scalar_lea.hbm %s5597_s30, 16 }
  0xbc   : > { %p5211_p11 = scmp.ne.s32.totalorder %s5597_s30, %s5210_s11  ;;  %p5217_p13 = scmp.lt.u32.totalorder %s5210_s11, %s5597_s30 }
  0xbe   : > { %p5213_p12 = pnand %p5211_p11, %p5674_p7 }
  0xc0   : > { %p5214_p2 = pneg %p5213_p12 }
  0xc2   : > { %p5219_p0 = pnand %p5217_p13, %p5214_p2 }
  0xc4   : > { %5222 = shalt.err (!%p5219_p0)
}
  0xc5   : > { %s5223_s26 = scalar_lea.vmem %s1310_s2, 16  ;;  %s5230_s23 = scalar_lea.vmem %s1310_s2, 32 }
  0xc6   : > { %p5224_p1 = scmp.ne.s32.totalorder %s1310_s2, %s5223_s26  ;;  %p5231_p8 = scmp.lt.s32.totalorder %s1310_s2, %s1310_s2 }
  0xc7   : > { %p5232_p9 = scmp.lt.s32.totalorder %s5230_s23, %s5223_s26 }
  0xc8   : > { %p5226_p4 = pnand %p5224_p1, %p5674_p7 }
  0xc9   : > { %p5233_p10 = por %p5232_p9, %p5231_p8 }
  0xca   : > { %p5227_p6 = pneg %p5226_p4 }
  0xcc   : > { %p5234_p3 = pnand %p5233_p10, %p5227_p6 }
  0xce   : > { %5237 = shalt.err (!%p5234_p3)
}
  0xcf   : > { %4796 = dma.hbm_to_vmem [thread:$0]  (!%p5662_p5), %s5597_s30, 16, %s1310_s2, [#allocation5]  }
  0xd0   : > { %s5238_s10 = scalar_lea.hbm %s5607_s24, 16 }
  0xd1   : > { %p5239_p11 = scmp.ne.s32.totalorder %s5607_s24, %s5238_s10  ;;  %p5245_p13 = scmp.lt.u32.totalorder %s5238_s10, %s5607_s24 }
  0xd3   : > { %p5241_p12 = pnand %p5239_p11, %p5674_p7 }
  0xd5   : > { %p5242_p2 = pneg %p5241_p12 }
  0xd7   : > { %p5247_p0 = pnand %p5245_p13, %p5242_p2 }
  0xd9   : > { %5250 = shalt.err (!%p5247_p0)
}
  0xda   : > { %s5251_s16 = scalar_lea.vmem %s1332_s22, 16  ;;  %s5258_s15 = scalar_lea.vmem %s1332_s22, 32 }
  0xdb   : > { %p5252_p3 = scmp.ne.s32.totalorder %s1332_s22, %s5251_s16  ;;  %p5259_p6 = scmp.lt.s32.totalorder %s1332_s22, %s1332_s22 }
  0xdc   : > { %p5260_p8 = scmp.lt.s32.totalorder %s5258_s15, %s5251_s16 }
  0xdd   : > { %p5254_p1 = pnand %p5252_p3, %p5674_p7 }
  0xde   : > { %p5261_p9 = por %p5260_p8, %p5259_p6 }
  0xdf   : > { %p5255_p4 = pneg %p5254_p1 }
  0xe1   : > { %p5262_p10 = pnand %p5261_p9, %p5255_p4 }
  0xe3   : > { %5265 = shalt.err (!%p5262_p10)
}
  0xe4   : > { %4802 = dma.hbm_to_vmem [thread:$0]  (!%p5662_p5), %s5607_s24, 16, %s1332_s22, [#allocation8]  }
  0xe5   : > { %s5372_s2 = smov [#allocation12]   ;;  %s5266_s26 = scalar_lea.hbm %s5627_s19, 16 }
  0xe6   : > { %s1359_s11 = sshll.u32 %s5372_s2, 4  ;;  %p5267_p11 = scmp.ne.s32.totalorder %s5627_s19, %s5266_s26  ;;  %s1360_s11 = int_to_ptr.vmem [resolvable:$true] %s1359_s11 }
  0xe7   : > { %p5273_p13 = scmp.lt.u32.totalorder %s5266_s26, %s5627_s19 }
  0xe8   : > { %p5269_p12 = pnand %p5267_p11, %p5674_p7 }
  0xea   : > { %p5270_p2 = pneg %p5269_p12 }
  0xec   : > { %p5275_p0 = pnand %p5273_p13, %p5270_p2 }
  0xee   : > { %5278 = shalt.err (!%p5275_p0)
}
  0xef   : > { %s5279_s23 = scalar_lea.vmem %s1360_s11, 16  ;;  %s5286_s10 = scalar_lea.vmem %s1360_s11, 32 }
  0xf0   : > { %p5280_p3 = scmp.ne.s32.totalorder %s1360_s11, %s5279_s23  ;;  %p5287_p6 = scmp.lt.s32.totalorder %s1360_s11, %s1360_s11 }
  0xf1   : > { %p5288_p8 = scmp.lt.s32.totalorder %s5286_s10, %s5279_s23 }
  0xf2   : > { %p5282_p1 = pnand %p5280_p3, %p5674_p7 }
  0xf3   : > { %p5289_p9 = por %p5288_p8, %p5287_p6 }
  0xf4   : > { %p5283_p4 = pneg %p5282_p1 }
  0xf6   : > { %p5290_p10 = pnand %p5289_p9, %p5283_p4 }
  0xf8   : > { %5293 = shalt.err (!%p5290_p10)
}
  0xf9   : > { %4808 = dma.hbm_to_vmem [thread:$0]  (!%p5662_p5), %s5627_s19, 16, %s1360_s11, [#allocation11]  }
  0xfa   : > { %p6404_p11 = scmp.ne.s32.totalorder %s6401_s0, 0 }
  0xfb   : > { %p6405_p12 = scmp.eq.s32.totalorder (!%p6404_p11), %s5645_s7, 0 }
  0xfc   : > { %1386 = sbr.rel (%p6404_p11) target bundleno = 9075 (0x2373), region = 208 }
 0x103   : > { %5299 = dma.done.wait (%p6405_p12), [#allocation3], 16   ;;  %p6406_p2 = pmov %p6405_p12 }
 0x105   : > { %5301 = vsyncadd (%p6406_p2), [#allocation3], 4294967280  ;;  %p6407_p7 = pmov %p6406_p2 }
 0x106   : > { %p6408_p13 = pmov %p6406_p2 }
 0x107   : > { %5303 = dma.done.wait (%p6407_p7), [#allocation5], 32  }
 0x108   : > { %5305 = vsyncadd (%p6408_p13), [#allocation5], 4294967264  ;;  %p6409_p0 = pmov %p6406_p2 }
 0x10a   : > { %5307 = dma.done.wait (%p6409_p0), [#allocation8], 32   ;;  %p6410_p5 = pmov %p6409_p0 }
 0x10b   : > { %p6411_p3 = pmov %p6409_p0 }
 0x10c   : > { %5309 = vsyncadd (%p6410_p5), [#allocation8], 4294967264 }
 0x10d   : > { %5311 = dma.done.wait (%p6411_p3), [#allocation11], 32   ;;  %p6412_p1 = pmov %p6409_p0 }
 0x10e   : > { %s6413_s5 = sld [smem:[#allocation17_spill]]  ;;  %vm1559_vm0 = vcmask 1040384   ;;  %v5373_v0 = vmov 0.0   ;;  %p1529_p4 = scmp.lt.s32.totalorder %s5645_s7, 1  ;;  %vm1560_vm1 = vcmask 1041408   ;;  %v5374_v1 = vmov 65535  }
 0x10f   : > { %5313 = vsyncadd (%p6412_p1), [#allocation11], 4294967264  ;;  %4507 = vmatprep.subr.bf16.mxu0 %v5373_v0  ;;  %4513 = vmatprep.subr.bf16.mxu1 %v5373_v0  ;;  %s6414_s3 = sld [smem:[#allocation20_spill]]  ;;  %v1561_v2 = vsel %vm1559_vm0, 4294967295, %v5374_v1  ;;  %vm5375_vm2 = vmmov 0   ;;  %vm1555_vm3 = vcmask 23552  }
 0x110   : > { %4509 = vmatprep.mubr.msk.bf16.mxu0 %vm5375_vm2, %v5373_v0  ;;  %4515 = vmatprep.mubr.msk.bf16.mxu1 %vm5375_vm2, %v5373_v0  ;;  %s6470_s7 = smov (!%p1529_p4, %s5645_s7), 1  ;;  %v1562_v3 = vsel %vm1560_vm1, %v1561_v2, 0  ;;  %v1546_v4 = vld [vmem:[%s5412_s17] sm:$0x3]  ;;  %vm6350_vm4 = vcmask 130048   ;;  %s6415_s8 = sld [smem:[#allocation21_spill]] }
 0x111   : > { %s5801_s0 = sshll.u32 %s6470_s7, 3  ;;  %v1564_v6 = vand.u32 %v1562_v3, %v1546_v4  ;;  %v1607_v11 = vld [vmem:[%s5422_s25] sm:$0xf]  ;;  %vm1620_vm5 = vcmask 1043456   ;;  %vm1616_vm6 = vcmask 64512   ;;  %s6416_s22 = sld [smem:[#allocation19_spill]] }
 0x112   : > { %s1536_s1 = scalar_lea.vmem %s5402_s9, %s5801_s0  ;;  %v1622_v12 = vsel %vm1620_vm5, %v1607_v11, 0  ;;  %v4305_v13 = vld [vmem:[%s5417_s21] ss:$0 sm:$0xff]  ;;  %s6417_s16 = sld [smem:[#allocation22_spill]]  ;;  %vm1785_vm7 = vcmask 261120   ;;  %vm1789_vm8 = vcmask 253952  }
 0x113   : > { %4508 = vmatpush3.bf16.msra.mxu0 %v1564_v6  ;;  %v1664_v9 = vld [vmem:[%s1536_s1] sm:$0xff]  ;;  %4514 = vmatpush3.bf16.msra.mxu1 %v1622_v12  ;;  %s6418_s15 = sld [smem:[#allocation18_spill]]  ;;  %s6419_s2 = sld [smem:[#allocation25_spill]]  ;;  %vm1925_vm9 = vcmask 1042432   ;;  %vm6349_vm10 = vcmask 195584   ;;  %vm2062_vm11 = vcmask 72704  }
 0x114   : > { %s1532_s18 = scalar_lea.vmem %s6413_s5, %s5801_s0  ;;  %4519 = vmatprep.subr.bf16.mxu0 %v5373_v0  ;;  %v1667_v10 = vpack.c.bf16 %v1664_v9, %v1664_v9  ;;  %4525 = vmatprep.subr.bf16.mxu1 %v5373_v0  ;;  %v1726_v18 = vld [vmem:[%s5442_s14] sm:$0xf]  ;;  %s6420_s11 = sld [smem:[#allocation23_spill]]  ;;  %vm2064_vm12 = vcmask 146432   ;;  %vm2066_vm13 = vcmask 220160   ;;  %vm2107_vm15 = vcmask 293888  }
 0x115   : > { %v1545_v5 = vld [vmem:[%s1532_s18] sm:$0xff]  ;;  %v1739_v22 = vsel %vm1620_vm5, %v1726_v18, 0  ;;  %s6421_s26 = sld [smem:[#allocation24_spill]]  ;;  %s6422_s23 = sld [smem:[#allocation26_spill]] }
 0x116   : > { %v1547_v7 = vpack.c.bf16 %v1545_v5, %v1545_v5  ;;  %v4959_v8 = vld [vmem:[%s6414_s3] sm:$0xff]   ;;  %s6357_s10 = smov 120   ;;  %s6355_s18 = smov 104  }
 0x117   : > { %v4309_v23 = vld [vmem:[%s6415_s8] ss:$0 sm:$0xff]  ;;  %s6353_s1 = smov 112   ;;  %s6449_s3 = smov 24  }
 0x118   : > { %4510 = vmatmul.mubr.msk.bf16.vlgmr.msra.gmra.mrb[0].mxu0 %vm1555_vm3, %v1547_v7  ;;  %v4307_v31 = vld [vmem:[%s6416_s22] ss:$0 sm:$0xff]  ;;  %s6351_s22 = smov 96   ;;  %s6450_s4 = sld [smem:[#allocation40_spill]] }
 0x119   : > { %4520 = vmatpush3.bf16.msra.mxu0 %v4959_v8  ;;  %4521 = vmatprep.mubr.msk.bf16.mxu0 %vm5375_vm2, %v5373_v0  ;;  %v4312_v32 = vld [vmem:[%s6417_s16] ss:$0 sm:$0xff]  ;;  %v4961_v53 = vld [vmem:[%s6419_s2 + $0x8] sm:$0xff]   ;;  %s6347_s16 = smov 64   ;;  %s6455_s5 = sld [smem:[#allocation43_spill]] }
 0x11a   : > { %4531 = vmatprep.subr.bf16.mxu0 %v5373_v0  ;;  %v4751_v33 = vadd.f32 %v4312_v32, %v4307_v31  ;;  %v5833_v38 = vld [vmem:[%s6418_s15] sm:$0x1]  ;;  %s6427_s15 = sld [smem:[#allocation27_spill]]  ;;  %s6457_s6 = sld [smem:[#allocation42_spill]] }
 0x11b   : > { %v1790_v41 = vsel %vm1789_vm8, %v5833_v38, 0.0  ;;  %v4960_v52 = vld [vmem:[%s6419_s2] sm:$0xff]   ;;  %s6448_s2 = smov 16   ;;  %s6458_s8 = sld [smem:[#allocation45_spill]] }
 0x11c   : > { %v4314_v62 = vld [vmem:[%s6420_s11] ss:$0 sm:$0xff]  ;;  %s6341_s11 = smov 8  }
 0x11d   : > { %v4315_v3 = vld [vmem:[%s6421_s26] ss:$0 sm:$0xff]  ;;  %s6345_s26 = smov 16  }
 0x11e   : > { %v4316_v8 = vld [vmem:[%s6422_s23] ss:$0 sm:$0xff]  ;;  %s6343_s23 = smov 24  }
 0x120   : > { %4522 = vmatmul.mubr.msk.bf16.vlgmr.msra.gmra.mrb[4].mxu0 %vm6350_vm4, %v1667_v10 }
 0x121   : > { %4535 = vmatprep.mubr.msk.bf16.mxu0 %vm5375_vm2, %v5373_v0  ;;  %4532 = vmatpush3.bf16.msra.mxu0 %v4960_v52  ;;  %v5380_v52 = vmov 0  }
 0x122   : > { %4533 = vmatprep.subr.bf16.mxu0 %v5373_v0  ;;  %4912 = vset.pattern.permute.xlu1 %v5380_v52 }
 0x123   : > { %4913 = vset.pattern.permute.xlu0 %v5380_v52 }
 0x125   : > { %4534 = vmatpush3.bf16.msra.mxu0 %v4961_v53  ;;  %v5381_v53 = vmov 1.0  }
 0x126   : > { %4557 = vmatprep.subr.bf16.mxu0 %v5373_v0 }
 0x1eb   : > { %v1600_v14 = vpop.f32.mrb[0].mxu0 }
 0x1ec   : > { %v1601_v15 = vadd.f32 %v4305_v13, %v1600_v14  ;;  %v4511_v16 = vpop.f32.mrb[1].mxu0 }
 0x1ed   : > { %v1603_v17 = vpop.f32.mrb[2].mxu0 }
 0x1ee   : > { %v1606_v19 = vmax.f32 %v1601_v15, 0.0  ;;  %v4512_v20 = vpop.f32.mrb[3].mxu0 }
 0x1f0   : > { %v1608_v21 = vpack.c.bf16 %v1606_v19, %v1606_v19 }
 0x1f2   : > { %4516 = vmatmul.mubr.msk.bf16.vlgmr.msra.gmra.mrb[0].mxu1 %vm1616_vm6, %v1608_v21 }
 0x1f3   : > { %4526 = vmatpush3.bf16.msra.mxu1 %v1739_v22  ;;  %v1719_v24 = vpop.f32.mrb[4].mxu0  ;;  %4527 = vmatprep.mubr.msk.bf16.mxu1 %vm5375_vm2, %v5373_v0 }
 0x1f4   : > { %v1720_v25 = vadd.f32 %v4309_v23, %v1719_v24  ;;  %v4523_v26 = vpop.f32.mrb[5].mxu0  ;;  %4539 = vmatprep.subr.bf16.mxu1 %v5373_v0 }
 0x1f5   : > { %v1722_v27 = vpop.f32.mrb[6].mxu0 }
 0x1f6   : > { %v1725_v28 = vmax.f32 %v1720_v25, 0.0  ;;  %v4524_v29 = vpop.f32.mrb[7].mxu0 }
 0x1f8   : > { %v1727_v30 = vpack.c.bf16 %v1725_v28, %v1725_v28 }
 0x1fe   : > { %4528 = vmatmul.mubr.msk.bf16.vlgmr.msra.gmra.mrb[0].mxu1 %vm1616_vm6, %v1727_v30 }
 0x1ff   : > { %4545 = vmatprep.mubr.msk.bf16.mxu1 %vm5375_vm2, %v5373_v0 }
 0x2d1   : > { %v1775_v34 = vpop.f32.mrb[0].mxu1 }
 0x2d2   : > { %v5830_v35 = vadd.f32 %v4751_v33, %v1775_v34  ;;  %v4529_v36 = vpop.f32.mrb[1].mxu1 }
 0x2d3   : > { %v1778_v37 = vpop.f32.mrb[2].mxu1 }
 0x2d4   : > { %v4530_v39 = vpop.f32.mrb[3].mxu1  ;;  %v1786_v40 = vsel %vm1785_vm7, %v5830_v35, 0.0 }
 0x2d5   : > { %1787 = vadd.xlane.f32.xlu0 %v1786_v40 }
 0x2d9   : > { %1791 = vadd.xlane.f32.xlu0 %v1790_v41 }
 0x362   : > { %v1788_v42 = vpop.xlane.xlu0 %1787 }
 0x363   : > { %v1794_v43 = vmul.f32 0.03125, %v1788_v42 }
 0x365   : > { %v1796_v44 = vsub.f32 %v5830_v35, %v1794_v43 }
 0x366   : > { %v1792_v45 = vpop.xlane.xlu0 %1791 }
 0x367   : > { %v1795_v46 = vmul.f32 0.03125, %v1792_v45  ;;  %v1798_v47 = vmul.f32 %v1796_v44, %v1796_v44 }
 0x369   : > { %v1797_v48 = vsub.f32 %v5833_v38, %v1795_v46  ;;  %v1800_v49 = vsel %vm1785_vm7, %v1798_v47, 0.0 }
 0x36a   : > { %1801 = vadd.xlane.f32.xlu1 %v1800_v49 }
 0x36b   : > { %v1799_v50 = vmul.f32 %v1797_v48, %v1797_v48 }
 0x36d   : > { %v1803_v51 = vsel %vm1789_vm8, %v1799_v50, 0.0 }
 0x36e   : > { %1804 = vadd.xlane.f32.xlu1 %v1803_v51 }
 0x3f7   : > { %v1802_v54 = vpop.xlane.xlu1 %1801 }
 0x3f8   : > { %v1806_v55 = vmul.f32 0.03125, %v1802_v54  ;;  %v2059_v54 = vsel %vm1559_vm0, 0.0, %v5381_v53 }
 0x3fa   : > { %v1808_v56 = vadd.f32 1e-05, %v1806_v55  ;;  %v2093_v55 = vlaneseq }
 0x3fb   : > { %v1805_v57 = vpop.xlane.xlu1 %1804 }
 0x3fc   : > { %5002 = vrsqrt.f32 %v1808_v56  ;;  %v1807_v58 = vmul.f32 0.03125, %v1805_v57  ;;  %v3618_v56 = vsel %vm1616_vm6, 0.0, %v5381_v53  ;;  %v2094_v57 = vshrl.u32 %v2093_v55, 7 }
 0x3fe   : > { %v1809_v59 = vadd.f32 1e-05, %v1807_v58  ;;  %v3619_v58 = vsel %vm6350_vm4, %v3618_v56, 2.0 }
 0x400   : > { %5004 = vrsqrt.f32 %v1809_v59  ;;  %v5382_v59 = vmov 2.0  }
 0x406   : > { %v5003_v60 = vpop.eup %5002 }
 0x407   : > { %v1812_v61 = vmul.f32 %v5003_v60, %v1796_v44  ;;  %v2060_v60 = vsel %vm1560_vm1, 1.0, %v5382_v59 }
 0x409   : > { %v1820_v1 = vmul.f32 %v4314_v62, %v1812_v61  ;;  %v3620_v61 = vsel %vm6349_vm10, %v3619_v58, 3.0 }
 0x40a   : > { %v5005_v63 = vpop.eup %5004 }
 0x40b   : > { %v1813_v2 = vmul.f32 %v5005_v63, %v1797_v48  ;;  %v1828_v5 = vadd.f32 %v4315_v3, %v1820_v1  ;;  %v5383_v63 = vmov 3.0  }
 0x40c   : > { %v2061_v1 = vsel %vm1925_vm9, 2.0, %v5383_v63 }
 0x40d   : > { %v1821_v4 = vmul.f32 %v4314_v62, %v1813_v2  ;;  %v2095_v62 = vsub.s32 0, %v2094_v57  ;;  %v4914_v2 = vpack.i.bf16 %v2061_v1, %v2060_v60 }
 0x40f   : > { %v1829_v6 = vadd.f32 %v4315_v3, %v1821_v4  ;;  %v5900_v3 = vrot.slane %v3620_v61, %v2095_v62 }
 0x411   : > { %v1840_v7 = vpack.c.bf16 %v1829_v6, %v1828_v5 }
 0x413   : > { %4536 = vmatmul.mubr.msk.bf16.vlgmr.msra.gmra.mrb[8].mxu0 %vm1785_vm7, %v1840_v7 }
 0x414   : > { %4563 = vmatprep.mubr.msk.bf16.mxu0 %vm5375_vm2, %v5373_v0 }
 0x4e6   : > { %v1896_v9 = vpop.f32.mrb[8].mxu0 }
 0x4e7   : > { %v1897_v10 = vadd.f32 %v4316_v8, %v1896_v9  ;;  %v4537_v11 = vpop.f32.mrb[9].mxu0 }
 0x4e8   : > { %v1899_v12 = vpop.f32.mrb[10].mxu0 }
 0x4e9   : > { %v1900_v13 = vadd.f32 %v4316_v8, %v1899_v12  ;;  %v4538_v14 = vpop.f32.mrb[11].mxu0  ;;  %v1940_v15 = vrot.slane %v1897_v10, 7  ;;  %v1958_v16 = vrot.slane %v1897_v10, 5  ;;  %v1949_v19 = vrot.slane %v1897_v10, 6 }
 0x4ea   : > { %v5868_v31 = vmul.f32 0.35355338, %v1897_v10 }
 0x4eb   : > { %1943 = vrot.lane.b32.xlu0 %v1940_v15, %s6357_s10  ;;  %v1941_v17 = vrot.slane %v1900_v13, 7  ;;  %v1959_v18 = vrot.slane %v1900_v13, 5  ;;  %v1950_v20 = vrot.slane %v1900_v13, 6  ;;  %v5864_v28 = vmul.f32 0.35355338, %v1900_v13 }
 0x4ec   : > { %v1907_v37 = vrot.slane %v5868_v31, 7  ;;  %v1926_v45 = vrot.slane %v5868_v31, 5  ;;  %v1916_v47 = vrot.slane %v5868_v31, 6 }
 0x4ed   : > { %v1942_v21 = vsel %vm1559_vm0, %v1940_v15, %v1941_v17  ;;  %v1960_v22 = vsel %vm1925_vm9, %v1958_v16, %v1959_v18  ;;  %v1951_v23 = vsel %vm1560_vm1, %v1949_v19, %v1950_v20  ;;  %v1908_v34 = vrot.slane %v5864_v28, 7 }
 0x4ee   : > { %1945 = vrot.lane.b32.xlu1 %v1942_v21, %s6357_s10  ;;  %v4902_v24 = vpack.i.bf16 %v1951_v23, %v1949_v19  ;;  %v1917_v46 = vrot.slane %v5864_v28, 6  ;;  %v1927_v50 = vrot.slane %v5864_v28, 5  ;;  %v2063_v23 = vsel %vm2062_vm11, 0.0, %v5381_v53 }
 0x4ef   : > { %1963 = vrot.lane.b32.xlu0 %v1960_v22, %s6355_s18  ;;  %v1909_v41 = vsel %vm1559_vm0, %v1907_v37, %v1908_v34 }
 0x4f0   : > { %v1918_v48 = vsel %vm1560_vm1, %v1916_v47, %v1917_v46  ;;  %v1928_v51 = vsel %vm1925_vm9, %v1926_v45, %v1927_v50 }
 0x4f1   : > { %v4907_v49 = vpack.i.bf16 %v1918_v48, %v1916_v47 }
 0x4f2   : > { %4903 = vrot.lane.b32.xlu1 %v4902_v24, %s6353_s1  ;;  %v2065_v24 = vsel %vm2064_vm12, %v2063_v23, 2.0 }
 0x4f6   : > { %1961 = vrot.lane.b32.xlu1 %v1958_v16, %s6355_s18 }
 0x55d   : > { %v1944_v25 = vpop.permute.xlu0 %1943 }
 0x55e   : > { %v1967_v26 = vsel %vm1559_vm0, %v1900_v13, %v1944_v25  ;;  %v2067_v25 = vsel %vm2066_vm13, %v2065_v24, 3.0  ;;  %vm6338_vm13 = vcmask 289792  }
 0x55f   : > { %v5862_v27 = vpack.c.bf16 %v1967_v26, %v1897_v10  ;;  %v5922_v26 = vrot.slane %v2067_v25, %v2095_v62 }
 0x560   : > { %v1946_v29 = vpop.permute.xlu1 %1945 }
 0x561   : > { %v1964_v30 = vpop.permute.xlu0 %1963  ;;  %1979 = vrot.lane.b32.xlu1 %v5862_v27, %s6351_s22  ;;  %vm4323_vm14 = vcmp.eq.f32.partialorder %v5922_v26, 0.0  ;;  %vm6339_vm12 = vcmp.eq.f32.partialorder %v5922_v26, 3.0 }
 0x562   : > { %v5870_v32 = vpack.c.bf16 %v1964_v30, %v1964_v30 }
 0x564   : > { %v4904_v33 = vpop.permute.xlu1 %4903 }
 0x565   : > { %v4905_v36 = vunpack.i.l.bf16 %v4904_v33  ;;  %1983 = vrot.lane.b32.xlu1 %v5870_v32, %s6351_s22  ;;  %v4906_v39 = vunpack.i.h.bf16 %v4904_v33 }
 0x567   : > { %v1968_v42 = vsel %vm1560_vm1, %v1946_v29, %v4905_v36 }
 0x568   : > { %v1962_v40 = vpop.permute.xlu1 %1961 }
 0x569   : > { %v1969_v43 = vsel %vm1925_vm9, %v4906_v39, %v1962_v40  ;;  %1912 = vrot.lane.b32.xlu1 %v1909_v41, %s6357_s10 }
 0x56a   : > { %v5880_v44 = vpack.c.bf16 %v1969_v43, %v1968_v42 }
 0x56c   : > { %1981 = vrot.lane.b32.xlu0 %v5880_v44, %s6351_s22  ;;  %s6437_s22 = sld [smem:[#allocation36_spill]] }
 0x56d   : > { %1929 = vrot.lane.b32.xlu1 %v1926_v45, %s6355_s18 }
 0x570   : > { %1910 = vrot.lane.b32.xlu0 %v1907_v37, %s6357_s10 }
 0x571   : > { %2075 = vperm.xlu1 %4912, %v2059_v54  }
 0x574   : > { %4908 = vrot.lane.b32.xlu0 %v4907_v49, %s6353_s1  ;;  %s6438_s1 = sld [smem:[#allocation38_spill]] }
 0x578   : > { %1931 = vrot.lane.b32.xlu0 %v1928_v51, %s6355_s18 }
 0x57c   : > { %4915 = vperm.xlu0 %4913, %v4914_v2  }
 0x5d3   : > { %v1980_v4 = vpop.permute.xlu1 %1979 }
 0x5d4   : > { %v1995_v5 = vsel %vm1616_vm6, %v1980_v4, 0 }
 0x5d5   : > { %4540 = vmatpush3.bf16.xpose.msra.mxu1 %v1995_v5 }
 0x5d6   : > { %4541 = vmatprep.subr.bf16.mxu1 %v5373_v0 }
 0x5d7   : > { %v1984_v8 = vpop.permute.xlu1 %1983 }
 0x5d8   : > { %v2001_v10 = vsel %vm1616_vm6, %v1984_v8, 0 }
 0x5db   : > { %v1913_v12 = vpop.permute.xlu1 %1912 }
 0x5de   : > { %v1982_v6 = vpop.permute.xlu0 %1981 }
 0x5df   : > { %v1998_v7 = vsel %vm1616_vm6, %v1982_v6, 0  ;;  %v1930_v17 = vpop.permute.xlu1 %1929 }
 0x5e0   : > { %4542 = vmatpush3.bf16.xpose.msra.mxu1 %v1998_v7 }
 0x5e1   : > { %4543 = vmatprep.subr.bf16.mxu1 %v5373_v0 }
 0x5e2   : > { %v1911_v9 = vpop.permute.xlu0 %1910 }
 0x5e3   : > { %v1935_v11 = vsel %vm1559_vm0, %v5864_v28, %v1911_v9 }
 0x5e4   : > { %v1970_v14 = vpack.c.bf16 %v1935_v11, %v5868_v31 }
 0x5e6   : > { %v4909_v13 = vpop.permute.xlu0 %4908 }
 0x5e7   : > { %v4911_v15 = vunpack.i.h.bf16 %v4909_v13  ;;  %v4910_v16 = vunpack.i.l.bf16 %v4909_v13 }
 0x5e8   : > { %4544 = vmatpush3.bf16.xpose.msra.mxu1 %v2001_v10 }
 0x5e9   : > { %4583 = vmatprep.subr.bf16.mxu1 %v5373_v0  ;;  %v1936_v18 = vsel %vm1560_vm1, %v1913_v12, %v4910_v16  ;;  %v1937_v19 = vsel %vm1925_vm9, %v4911_v15, %v1930_v17 }
 0x5ea   : > { %v1971_v20 = vpack.c.bf16 %v1937_v19, %v1936_v18  ;;  %v1932_v21 = vpop.permute.xlu0 %1931 }
 0x5eb   : > { %v1972_v22 = vpack.c.bf16 %v1932_v21, %v1932_v21 }
 0x5ef   : > { %4546 = vmatmul.mubr.msk.bf16.vlgmr.msra.gmra.mrb[4].mxu1 %vm1616_vm6, %v1970_v14 }
 0x5f0   : > { %4549 = vmatprep.mubr.msk.bf16.mxu1 %vm5375_vm2, %v5373_v0  ;;  %v5924_v28 = vpop.permute.xlu1 %2075 }
 0x5f1   : > { %vm6340_vm3 = vcmp.eq.f32.partialorder %v5924_v28, %v5922_v26 }
 0x5f7   : > { %4550 = vmatmul.mubr.msk.bf16.gmra.mrb[8].mxu1 %vm1616_vm6, %v1971_v20 }
 0x5f8   : > { %4553 = vmatprep.mubr.msk.bf16.mxu1 %vm5375_vm2, %v5373_v0 }
 0x5fb   : > { %v4916_v29 = vpop.permute.xlu0 %4915 }
 0x5fc   : > { %v4917_v37 = vunpack.i.l.bf16 %v4916_v29  ;;  %v4918_v42 = vunpack.i.h.bf16 %v4916_v29 }
 0x5fe   : > { %vm5937_vm5 = vcmp.eq.f32.partialorder %v4917_v37, %v5922_v26  ;;  %vm5944_vm11 = vcmp.eq.f32.partialorder %v4918_v42, %v5922_v26 }
 0x5ff   : > { %4554 = vmatmul.mubr.msk.bf16.gmra.mrb[12].mxu1 %vm1616_vm6, %v1972_v22 }
 0x600   : > { %4587 = vmatprep.mubr.msk.bf16.mxu1 %vm5375_vm2, %v5373_v0 }
 0x6c2   : > { %v2037_v30 = vpop.f32.mrb[4].mxu1 }
 0x6c3   : > { %v2102_v31 = vsel %vm4323_vm14, %v2037_v30, -1e+30  ;;  %v4547_v33 = vpop.f32.mrb[5].mxu1 }
 0x6c4   : > { %v2040_v34 = vpop.f32.mrb[6].mxu1  ;;  %v2108_v36 = vsel %vm2107_vm15, %v2102_v31, -inf }
 0x6c5   : > { %v2103_v39 = vsel %vm6340_vm3, %v2040_v34, -1e+30  ;;  %v4548_v40 = vpop.f32.mrb[7].mxu1  ;;  %2109 = vmax.xlane.f32.xlu1 %v2108_v36  ;;  %vm2267_vm3 = vcmask 1044480  }
 0x6c6   : > { %v2111_v41 = vsel %vm2107_vm15, %v2103_v39, -inf }
 0x6c7   : > { %2112 = vmax.xlane.f32.xlu0 %v2111_v41 }
 0x6ca   : > { %v2045_v45 = vpop.f32.mrb[8].mxu1 }
 0x6cb   : > { %v2104_v46 = vsel %vm5937_vm5, %v2045_v45, -1e+30  ;;  %v4551_v47 = vpop.f32.mrb[9].mxu1 }
 0x6cc   : > { %v2048_v48 = vpop.f32.mrb[10].mxu1  ;;  %v2114_v50 = vsel %vm2107_vm15, %v2104_v46, -inf }
 0x6cd   : > { %v2105_v51 = vsel %vm5944_vm11, %v2048_v48, -1e+30  ;;  %v4552_v52 = vpop.f32.mrb[11].mxu1  ;;  %2115 = vmax.xlane.f32.xlu0 %v2114_v50 }
 0x6ce   : > { %v2117_v53 = vsel %vm2107_vm15, %v2105_v51, -inf }
 0x6cf   : > { %2118 = vmax.xlane.f32.xlu1 %v2117_v53 }
 0x6d2   : > { %v2053_v54 = vpop.f32.mrb[12].mxu1 }
 0x6d3   : > { %v2106_v55 = vsel %vm6339_vm12, %v2053_v54, -1e+30  ;;  %v4555_v56 = vpop.f32.mrb[13].mxu1  ;;  %vm2256_vm12 = vcmask 1045504  }
 0x6d4   : > { %v2056_v57 = vpop.f32.mrb[14].mxu1  ;;  %v2121_v58 = vsel %vm6338_vm13, %v2106_v55, -inf  ;;  %v4963_v56 = vld [vmem:[%s6427_s15 + $0x8] sm:$0xff]  }
 0x6d5   : > { %v4556_v59 = vpop.f32.mrb[15].mxu1  ;;  %2122 = vmax.xlane.f32.xlu0 %v2121_v58 }
 0x752   : > { %v2110_v60 = vpop.xlane.xlu1 %2109 }
 0x753   : > { %v2124_v61 = vsub.f32 %v2102_v31, %v2110_v60 }
 0x754   : > { %v2113_v62 = vpop.xlane.xlu0 %2112 }
 0x755   : > { %v2129_v63 = vmul.f32 1.442695, %v2124_v61  ;;  %v2125_v1 = vsub.f32 %v2103_v39, %v2113_v62 }
 0x757   : > { %5006 = vpow2.f32 %v2129_v63  ;;  %v2131_v2 = vmul.f32 1.442695, %v2125_v1 }
 0x759   : > { %5008 = vpow2.f32 %v2131_v2 }
 0x75a   : > { %v2116_v4 = vpop.xlane.xlu0 %2115 }
 0x75b   : > { %v2126_v5 = vsub.f32 %v2104_v46, %v2116_v4 }
 0x75c   : > { %v2119_v6 = vpop.xlane.xlu1 %2118 }
 0x75d   : > { %v2133_v7 = vmul.f32 1.442695, %v2126_v5  ;;  %v2127_v8 = vsub.f32 %v2105_v51, %v2119_v6  ;;  %v4962_v51 = vld [vmem:[%s6427_s15] sm:$0xff]  }
 0x75f   : > { %5010 = vpow2.f32 %v2133_v7  ;;  %v2135_v9 = vmul.f32 1.442695, %v2127_v8 }
 0x761   : > { %v5007_v10 = vpop.eup %5006  ;;  %5012 = vpow2.f32 %v2135_v9 }
 0x762   : > { %v2139_v11 = vsel %vm2107_vm15, %v5007_v10, 0.0  ;;  %v2123_v18 = vpop.xlane.xlu0 %2122 }
 0x763   : > { %v5009_v12 = vpop.eup %5008  ;;  %2140 = vadd.xlane.f32.xlu1 %v2139_v11  ;;  %v2128_v19 = vsub.f32 %v2106_v55, %v2123_v18 }
 0x764   : > { %v2142_v13 = vsel %vm2107_vm15, %v5009_v12, 0.0 }
 0x765   : > { %2143 = vadd.xlane.f32.xlu0 %v2142_v13  ;;  %v2137_v20 = vmul.f32 1.442695, %v2128_v19 }
 0x767   : > { %5014 = vpow2.f32 %v2137_v20 }
 0x769   : > { %v5011_v14 = vpop.eup %5010 }
 0x76a   : > { %v2145_v15 = vsel %vm2107_vm15, %v5011_v14, 0.0 }
 0x76b   : > { %v5013_v16 = vpop.eup %5012  ;;  %2146 = vadd.xlane.f32.xlu1 %v2145_v15 }
 0x76c   : > { %v2148_v17 = vsel %vm2107_vm15, %v5013_v16, 0.0 }
 0x76d   : > { %2149 = vadd.xlane.f32.xlu0 %v2148_v17 }
 0x771   : > { %v5015_v21 = vpop.eup %5014 }
 0x772   : > { %v2151_v22 = vsel %vm6338_vm13, %v5015_v21, 0.0  ;;  %vm2245_vm13 = vcmask 1046528  }
 0x77c   : > { %2169 = vrot.lane.b32.xlu1 %v5880_v44, %s6347_s16 }
 0x783   : > { %2167 = vrot.lane.b32.xlu0 %v5862_v27, %s6347_s16 }
 0x7a0   : > { %2152 = vadd.xlane.f32.xlu1 %v2151_v22 }
 0x7b1   : > { %2171 = vrot.lane.b32.xlu1 %v5870_v32, %s6347_s16  ;;  %s6432_s16 = sld [smem:[#allocation33_spill]] }
 0x7f0   : > { %v2141_v24 = vpop.xlane.xlu1 %2140 }
 0x7f2   : > { %v2144_v23 = vpop.xlane.xlu0 %2143 }
 0x7f3   : > { %5016 = vrcp.f32 %v2144_v23 }
 0x7f4   : > { %5018 = vrcp.f32 %v2141_v24 }
 0x7f8   : > { %v2147_v29 = vpop.xlane.xlu1 %2146 }
 0x7fa   : > { %v2150_v25 = vpop.xlane.xlu0 %2149 }
 0x7fb   : > { %5020 = vrcp.f32 %v2150_v25 }
 0x7fc   : > { %v2170_v27 = vpop.permute.xlu1 %2169  ;;  %5022 = vrcp.f32 %v2147_v29 }
 0x7fd   : > { %v5017_v44 = vpop.eup %5016 }
 0x7fe   : > { %v2168_v30 = vpop.permute.xlu0 %2167  ;;  %v5019_v33 = vpop.eup %5018  ;;  %v2157_v32 = vmul.f32 %v5017_v44, %v5009_v12 }
 0x7ff   : > { %4558 = vmatpush3.bf16.msra.mxu0 %v2168_v30  ;;  %v2155_v36 = vmul.f32 %v5019_v33, %v5007_v10 }
 0x800   : > { %4559 = vmatprep.subr.bf16.mxu0 %v5373_v0 }
 0x801   : > { %v2164_v39 = vpack.c.bf16 %v2157_v32, %v2155_v36 }
 0x803   : > { %4560 = vmatpush3.bf16.msra.mxu0 %v2170_v27 }
 0x804   : > { %4561 = vmatprep.subr.bf16.mxu0 %v5373_v0 }
 0x805   : > { %v5021_v40 = vpop.eup %5020 }
 0x806   : > { %v5023_v41 = vpop.eup %5022  ;;  %v2161_v42 = vmul.f32 %v5021_v40, %v5013_v16 }
 0x807   : > { %v2159_v45 = vmul.f32 %v5023_v41, %v5011_v14 }
 0x809   : > { %v2165_v46 = vpack.c.bf16 %v2161_v42, %v2159_v45 }
 0x82d   : > { %v2153_v31 = vpop.xlane.xlu1 %2152 }
 0x82e   : > { %5024 = vrcp.f32 %v2153_v31 }
 0x831   : > { %v2172_v34 = vpop.permute.xlu1 %2171 }
 0x832   : > { %v2185_v37 = vsel %vm1560_vm1, %v2172_v34, 0 }
 0x833   : > { %4562 = vmatpush3.bf16.msra.mxu0 %v2185_v37 }
 0x834   : > { %4575 = vmatprep.subr.bf16.mxu0 %v5373_v0 }
 0x836   : > { %4564 = vmatmul.mubr.msk.bf16.vlgmr.msra.gmra.mrb[12].mxu0 %vm2107_vm15, %v2164_v39 }
 0x837   : > { %4567 = vmatprep.mubr.msk.bf16.mxu0 %vm5375_vm2, %v5373_v0  ;;  %4576 = vmatpush3.bf16.msra.mxu0 %v4962_v51 }
 0x838   : > { %v5025_v47 = vpop.eup %5024  ;;  %4577 = vmatprep.subr.bf16.mxu0 %v5373_v0 }
 0x839   : > { %v2163_v48 = vmul.f32 %v5025_v47, %v5015_v21 }
 0x83b   : > { %v2166_v50 = vpack.c.bf16 %v2163_v48, %v2163_v48  ;;  %4578 = vmatpush3.bf16.msra.mxu0 %v4963_v56 }
 0x83c   : > { %4591 = vmatprep.subr.bf16.mxu0 %v5373_v0 }
 0x83e   : > { %4568 = vmatmul.mubr.msk.bf16.gmra.mrb[16].mxu0 %vm2107_vm15, %v2165_v46 }
 0x83f   : > { %4571 = vmatprep.mubr.msk.bf16.mxu0 %vm5375_vm2, %v5373_v0 }
 0x846   : > { %4572 = vmatmul.mubr.msk.bf16.gmra.mrb[20].mxu0 %vm2107_vm15, %v2166_v50 }
 0x847   : > { %4579 = vmatprep.mubr.msk.bf16.mxu0 %vm5375_vm2, %v5373_v0 }
 0x909   : > { %v2221_v52 = vpop.f32.mrb[12].mxu0 }
 0x90a   : > { %v4565_v53 = vpop.f32.mrb[13].mxu0 }
 0x90b   : > { %v2224_v54 = vpop.f32.mrb[14].mxu0 }
 0x90c   : > { %v4566_v55 = vpop.f32.mrb[15].mxu0  ;;  %v2246_v58 = vrot.slane %v2224_v54, 1 }
 0x911   : > { %v2229_v57 = vpop.f32.mrb[16].mxu0 }
 0x912   : > { %v2247_v59 = vrot.slane %v2229_v57, 1  ;;  %v4569_v60 = vpop.f32.mrb[17].mxu0  ;;  %v2257_v63 = vrot.slane %v2229_v57, 2 }
 0x913   : > { %v2232_v61 = vpop.f32.mrb[18].mxu0 }
 0x914   : > { %v2248_v62 = vsel %vm2245_vm13, %v2246_v58, %v2247_v59  ;;  %v2258_v1 = vrot.slane %v2232_v61, 2  ;;  %v4570_v2 = vpop.f32.mrb[19].mxu0  ;;  %v2268_v8 = vrot.slane %v2232_v61, 3 }
 0x915   : > { %v4919_v4 = vpack.i.bf16 %v2247_v59, %v2248_v62 }
 0x916   : > { %v2259_v5 = vsel %vm2256_vm12, %v2257_v63, %v2258_v1 }
 0x917   : > { %v4924_v6 = vpack.i.bf16 %v2258_v1, %v2259_v5  ;;  %4920 = vrot.lane.b32.xlu1 %v4919_v4, %s6341_s11  ;;  %s6428_s11 = sld [smem:[#allocation28_spill]] }
 0x919   : > { %4925 = vrot.lane.b32.xlu0 %v4924_v6, %s6345_s26  ;;  %v2237_v7 = vpop.f32.mrb[20].mxu0  ;;  %s6431_s26 = sld [smem:[#allocation30_spill]] }
 0x91a   : > { %v2269_v9 = vrot.slane %v2237_v7, 3  ;;  %v4573_v10 = vpop.f32.mrb[21].mxu0 }
 0x91b   : > { %v2240_v11 = vpop.f32.mrb[22].mxu0 }
 0x91c   : > { %v2270_v12 = vsel %vm2267_vm3, %v2268_v8, %v2269_v9  ;;  %v4574_v13 = vpop.f32.mrb[23].mxu0 }
 0x91d   : > { %v4929_v14 = vpack.i.bf16 %v2269_v9, %v2270_v12  ;;  %v4328_v33 = vld [vmem:[%s6428_s11] ss:$0 sm:$0xff]  ;;  %s6430_s11 = sld [smem:[#allocation29_spill]] }
 0x91e   : > { %v4966_v13 = vld [vmem:[%s6432_s16] sm:$0xff]  }
 0x91f   : > { %4930 = vrot.lane.b32.xlu1 %v4929_v14, %s6343_s23  ;;  %s6429_s23 = sld [smem:[#allocation31_spill]]  ;;  %v4333_v8 = vld [vmem:[%s6431_s26] ss:$0 sm:$0xff]  ;;  %v4967_v14 = vld [vmem:[%s6432_s16 + $0x8] sm:$0xff]   ;;  %s6433_s26 = sld [smem:[#allocation32_spill]] }
 0x923   : > { %v4332_v4 = vld [vmem:[%s6430_s11] ss:$0 sm:$0xff]  ;;  %s6434_s11 = sld [smem:[#allocation34_spill]] }
 0x925   : > { %v4964_v56 = vld [vmem:[%s6429_s23] sm:$0xff]   ;;  %v4965_v57 = vld [vmem:[%s6429_s23 + $0x8] sm:$0xff]  }
 0x926   : > { %4584 = vmatpush3.bf16.msra.mxu1 %v4964_v56 }
 0x927   : > { %4585 = vmatprep.subr.bf16.mxu1 %v5373_v0 }
 0x92a   : > { %4586 = vmatpush3.bf16.msra.mxu1 %v4965_v57 }
 0x92b   : > { %4611 = vmatprep.subr.bf16.mxu1 %v5373_v0 }
 0x989   : > { %v4921_v15 = vpop.permute.xlu1 %4920 }
 0x98a   : > { %v4923_v16 = vunpack.i.h.bf16 %v4921_v15  ;;  %v4922_v17 = vunpack.i.l.bf16 %v4921_v15  ;;  %v4968_v15 = vld [vmem:[%s6432_s16 + $0x10] sm:$0xff]  }
 0x98b   : > { %v4926_v18 = vpop.permute.xlu0 %4925 }
 0x98c   : > { %v4928_v19 = vunpack.i.h.bf16 %v4926_v18  ;;  %v4927_v20 = vunpack.i.l.bf16 %v4926_v18  ;;  %v2278_v21 = vsel %vm1616_vm6, %v2224_v54, %v4923_v16  ;;  %v2277_v22 = vsel %vm1616_vm6, %v2221_v52, %v4922_v17  ;;  %v4969_v16 = vld [vmem:[%s6432_s16 + $0x18] sm:$0xff]   ;;  %v4970_v17 = vld [vmem:[%s6432_s16 + $0x20] sm:$0xff]   ;;  %v4971_v18 = vld [vmem:[%s6432_s16 + $0x28] sm:$0xff]  }
 0x98e   : > { %v2280_v29 = vsel %vm6350_vm4, %v2278_v21, %v4928_v19  ;;  %v2279_v30 = vsel %vm6350_vm4, %v2277_v22, %v4927_v20  ;;  %v4972_v19 = vld [vmem:[%s6432_s16 + $0x30] sm:$0xff]   ;;  %v4973_v20 = vld [vmem:[%s6432_s16 + $0x38] sm:$0xff]   ;;  %v4334_v21 = vld [vmem:[%s6433_s26] ss:$0 sm:$0xff]  ;;  %s6435_s26 = sld [smem:[#allocation37_spill]] }
 0x991   : > { %v4931_v23 = vpop.permute.xlu1 %4930 }
 0x992   : > { %v4933_v24 = vunpack.i.h.bf16 %v4931_v23  ;;  %v4932_v25 = vunpack.i.l.bf16 %v4931_v23 }
 0x994   : > { %v2283_v27 = vsel %vm6349_vm10, %v2280_v29, %v4933_v24  ;;  %v2282_v44 = vsel %vm6349_vm10, %v2279_v30, %v4932_v25 }
 0x995   : > { %v2284_v31 = vpack.c.bf16 %v2283_v27, %v2282_v44 }
 0x997   : > { %4580 = vmatmul.mubr.msk.bf16.vlgmr.msra.gmra.mrb[24].mxu0 %vm1785_vm7, %v2284_v31 }
 0x998   : > { %4607 = vmatprep.mubr.msk.bf16.mxu0 %vm5375_vm2, %v5373_v0  ;;  %4592 = vmatpush3.bf16.msra.mxu0 %v4966_v13 }
 0x999   : > { %4593 = vmatprep.subr.bf16.mxu0 %v5373_v0 }
 0x99c   : > { %4594 = vmatpush3.bf16.msra.mxu0 %v4967_v14 }
 0x99d   : > { %4595 = vmatprep.subr.bf16.mxu0 %v5373_v0 }
 0x9a0   : > { %4596 = vmatpush3.bf16.msra.mxu0 %v4968_v15 }
 0x9a1   : > { %4597 = vmatprep.subr.bf16.mxu0 %v5373_v0 }
 0x9a4   : > { %4598 = vmatpush3.bf16.msra.mxu0 %v4969_v16 }
 0x9a5   : > { %4599 = vmatprep.subr.bf16.mxu0 %v5373_v0 }
 0x9a8   : > { %4600 = vmatpush3.bf16.msra.mxu0 %v4970_v17 }
 0x9a9   : > { %4601 = vmatprep.subr.bf16.mxu0 %v5373_v0 }
 0x9ac   : > { %4602 = vmatpush3.bf16.msra.mxu0 %v4971_v18 }
 0x9ad   : > { %4603 = vmatprep.subr.bf16.mxu0 %v5373_v0 }
 0x9b0   : > { %4604 = vmatpush3.bf16.msra.mxu0 %v4972_v19 }
 0x9b1   : > { %4605 = vmatprep.subr.bf16.mxu0 %v5373_v0 }
 0x9b4   : > { %4606 = vmatpush3.bf16.msra.mxu0 %v4973_v20 }
 0x9b5   : > { %4637 = vmatprep.subr.bf16.mxu0 %v5373_v0 }
 0xa6a   : > { %v2340_v32 = vpop.f32.mrb[24].mxu0 }
 0xa6b   : > { %v2341_v34 = vadd.f32 %v4328_v33, %v2340_v32  ;;  %v4581_v36 = vpop.f32.mrb[25].mxu0 }
 0xa6c   : > { %v2343_v37 = vpop.f32.mrb[26].mxu0 }
 0xa6d   : > { %v6001_v39 = vadd.f32 %v5830_v35, %v2341_v34  ;;  %v2344_v40 = vadd.f32 %v4328_v33, %v2343_v37  ;;  %v4582_v41 = vpop.f32.mrb[27].mxu0 }
 0xa6f   : > { %v6004_v42 = vadd.f32 %v2344_v40, %v5833_v38  ;;  %v2351_v45 = vsel %vm1785_vm7, %v6001_v39, 0.0 }
 0xa70   : > { %2352 = vadd.xlane.f32.xlu0 %v2351_v45 }
 0xa71   : > { %v2354_v46 = vsel %vm1789_vm8, %v6004_v42, 0.0 }
 0xa72   : > { %2355 = vadd.xlane.f32.xlu1 %v2354_v46 }
 0xafd   : > { %v2353_v47 = vpop.xlane.xlu0 %2352 }
 0xafe   : > { %v2357_v48 = vmul.f32 0.03125, %v2353_v47 }
 0xaff   : > { %v2356_v50 = vpop.xlane.xlu1 %2355 }
 0xb00   : > { %v2359_v35 = vsub.f32 %v6001_v39, %v2357_v48  ;;  %v2358_v51 = vmul.f32 0.03125, %v2356_v50 }
 0xb02   : > { %v2360_v52 = vsub.f32 %v6004_v42, %v2358_v51  ;;  %v2361_v38 = vmul.f32 %v2359_v35, %v2359_v35 }
 0xb04   : > { %v2363_v53 = vsel %vm1785_vm7, %v2361_v38, 0.0  ;;  %v2362_v54 = vmul.f32 %v2360_v52, %v2360_v52 }
 0xb05   : > { %2364 = vadd.xlane.f32.xlu0 %v2363_v53 }
 0xb06   : > { %v2366_v55 = vsel %vm1789_vm8, %v2362_v54, 0.0 }
 0xb09   : > { %2367 = vadd.xlane.f32.xlu0 %v2366_v55 }
 0xb92   : > { %v2365_v58 = vpop.xlane.xlu0 %2364 }
 0xb93   : > { %v2369_v59 = vmul.f32 0.03125, %v2365_v58 }
 0xb95   : > { %v2371_v60 = vadd.f32 1e-05, %v2369_v59 }
 0xb96   : > { %v2368_v61 = vpop.xlane.xlu0 %2367 }
 0xb97   : > { %5026 = vrsqrt.f32 %v2371_v60  ;;  %v2370_v62 = vmul.f32 0.03125, %v2368_v61 }
 0xb99   : > { %v2372_v63 = vadd.f32 1e-05, %v2370_v62 }
 0xb9b   : > { %5028 = vrsqrt.f32 %v2372_v63 }
 0xba1   : > { %v5027_v1 = vpop.eup %5026 }
 0xba2   : > { %v2375_v2 = vmul.f32 %v5027_v1, %v2359_v35 }
 0xba4   : > { %v2383_v6 = vmul.f32 %v4332_v4, %v2375_v2 }
 0xba5   : > { %v5029_v5 = vpop.eup %5028 }
 0xba6   : > { %v2376_v7 = vmul.f32 %v5029_v5, %v2360_v52  ;;  %v2391_v10 = vadd.f32 %v4333_v8, %v2383_v6 }
 0xba8   : > { %v2384_v9 = vmul.f32 %v4332_v4, %v2376_v7 }
 0xbaa   : > { %v2392_v11 = vadd.f32 %v4333_v8, %v2384_v9 }
 0xbac   : > { %v2397_v12 = vpack.c.bf16 %v2392_v11, %v2391_v10 }
 0xbae   : > { %4588 = vmatmul.mubr.msk.bf16.vlgmr.msra.gmra.mrb[16].mxu1 %vm1785_vm7, %v2397_v12 }
 0xbaf   : > { %4615 = vmatprep.mubr.msk.bf16.mxu1 %vm5375_vm2, %v5373_v0 }
 0xc81   : > { %v2454_v22 = vpop.f32.mrb[16].mxu1 }
 0xc82   : > { %v2455_v23 = vadd.f32 %v4334_v21, %v2454_v22  ;;  %v4589_v24 = vpop.f32.mrb[17].mxu1 }
 0xc83   : > { %v2457_v25 = vpop.f32.mrb[18].mxu1  ;;  %v4338_v24 = vld [vmem:[%s6434_s11] ss:$0 sm:$0xff]  ;;  %s6436_s11 = sld [smem:[#allocation35_spill]] }
 0xc84   : > { %v2461_v29 = vmul.f32 0.70710677, %v2455_v23  ;;  %v2458_v30 = vadd.f32 %v4334_v21, %v2457_v25  ;;  %v4590_v27 = vpop.f32.mrb[19].mxu1  ;;  %v2509_v17 = vmul.f32 0.5, %v2455_v23 }
 0xc86   : > { %v2463_v44 = vand.u32 2147483647, %v2461_v29  ;;  %v2462_v31 = vmul.f32 0.70710677, %v2458_v30  ;;  %vm2503_vm10 = vcmp.ge.f32.partialorder %v2461_v29, 0.0  ;;  %v2510_v18 = vmul.f32 0.5, %v2458_v30 }
 0xc88   : > { %v2465_v33 = vmul.f32 0.3275911, %v2463_v44  ;;  %v2464_v32 = vand.u32 2147483647, %v2462_v31  ;;  %v2491_v40 = vsub.f32 0.0, %v2463_v44  ;;  %vm2504_vm4 = vcmp.ge.f32.partialorder %v2462_v31, 0.0 }
 0xc8a   : > { %v2467_v34 = vadd.f32 1.0, %v2465_v33  ;;  %v2466_v36 = vmul.f32 0.3275911, %v2464_v32  ;;  %v2492_v41 = vsub.f32 0.0, %v2464_v32  ;;  %v2493_v46 = vmul.f32 %v2491_v40, %v2463_v44 }
 0xc8c   : > { %5030 = vrcp.f32 %v2467_v34  ;;  %v2468_v37 = vadd.f32 1.0, %v2466_v36  ;;  %v2494_v35 = vmul.f32 %v2492_v41, %v2464_v32  ;;  %v2495_v51 = vmul.f32 1.442695, %v2493_v46 }
 0xc8e   : > { %5032 = vrcp.f32 %v2468_v37  ;;  %v2497_v55 = vmul.f32 1.442695, %v2494_v35  ;;  %v4975_v35 = vld [vmem:[%s6435_s26 + $0x8] sm:$0xff]  }
 0xc8f   : > { %5034 = vpow2.f32 %v2495_v51 }
 0xc90   : > { %5036 = vpow2.f32 %v2497_v55 }
 0xc96   : > { %v5031_v45 = vpop.eup %5030 }
 0xc97   : > { %v2473_v47 = vmul.f32 1.0614054, %v5031_v45 }
 0xc98   : > { %v5033_v48 = vpop.eup %5032 }
 0xc99   : > { %v2475_v50 = vadd.f32 -1.4531521, %v2473_v47  ;;  %v2474_v52 = vmul.f32 1.0614054, %v5033_v48  ;;  %v5035_v4 = vpop.eup %5034 }
 0xc9a   : > { %v5037_v8 = vpop.eup %5036 }
 0xc9b   : > { %v2477_v38 = vmul.f32 %v5031_v45, %v2475_v50  ;;  %v2476_v53 = vadd.f32 -1.4531521, %v2474_v52  ;;  %v4974_v50 = vld [vmem:[%s6435_s26] sm:$0xff]  }
 0xc9c   : > { %4612 = vmatpush3.bf16.msra.mxu1 %v4974_v50 }
 0xc9d   : > { %v2479_v54 = vadd.f32 1.4214138, %v2477_v38  ;;  %v2478_v56 = vmul.f32 %v5033_v48, %v2476_v53  ;;  %4613 = vmatprep.subr.bf16.mxu1 %v5373_v0 }
 0xc9f   : > { %v2481_v57 = vmul.f32 %v5031_v45, %v2479_v54  ;;  %v2480_v58 = vadd.f32 1.4214138, %v2478_v56 }
 0xca0   : > { %4614 = vmatpush3.bf16.msra.mxu1 %v4975_v35 }
 0xca1   : > { %v2483_v59 = vadd.f32 -0.28449672, %v2481_v57  ;;  %v2482_v60 = vmul.f32 %v5033_v48, %v2480_v58  ;;  %4619 = vmatprep.subr.bf16.mxu1 %v5373_v0  ;;  %v4347_v57 = vld [vmem:[%s6436_s11] ss:$0 sm:$0xff]  ;;  %s6444_s11 = smov 64  }
 0xca3   : > { %v2485_v61 = vmul.f32 %v5031_v45, %v2483_v59  ;;  %v2484_v62 = vadd.f32 -0.28449672, %v2482_v60 }
 0xca5   : > { %v2487_v63 = vadd.f32 0.2548296, %v2485_v61  ;;  %v2486_v1 = vmul.f32 %v5033_v48, %v2484_v62  ;;  %v4348_v62 = vld [vmem:[%s6437_s22] ss:$0 sm:$0xff]  ;;  %s6440_s22 = smov 96  }
 0xca7   : > { %v2489_v2 = vmul.f32 %v5031_v45, %v2487_v63  ;;  %v2488_v5 = vadd.f32 0.2548296, %v2486_v1 }
 0xca9   : > { %v2499_v6 = vmul.f32 %v5035_v4, %v2489_v2  ;;  %v2490_v7 = vmul.f32 %v5033_v48, %v2488_v5  ;;  %v4349_v5 = vld [vmem:[%s6438_s1] ss:$0 sm:$0xff]  ;;  %s6439_s1 = smov 112  }
 0xcab   : > { %v2501_v9 = vsub.f32 1.0, %v2499_v6  ;;  %v2500_v10 = vmul.f32 %v5037_v8, %v2490_v7 }
 0xcad   : > { %v2505_v11 = vsub.f32 0.0, %v2501_v9  ;;  %v2502_v12 = vsub.f32 1.0, %v2500_v10 }
 0xcaf   : > { %v2507_v13 = vsel %vm2503_vm10, %v2501_v9, %v2505_v11  ;;  %v2506_v14 = vsub.f32 0.0, %v2502_v12 }
 0xcb0   : > { %v2511_v15 = vadd.f32 1.0, %v2507_v13 }
 0xcb1   : > { %v2508_v16 = vsel %vm2504_vm4, %v2502_v12, %v2506_v14  ;;  %vm6442_vm4 = vcmp.eq.f32.partialorder %v5922_v26, 3.0 }
 0xcb2   : > { %v2512_v19 = vadd.f32 1.0, %v2508_v16  ;;  %v2513_v20 = vmul.f32 %v2511_v15, %v2509_v17 }
 0xcb4   : > { %v2514_v21 = vmul.f32 %v2512_v19, %v2510_v18 }
 0xcb6   : > { %v2531_v22 = vpack.c.bf16 %v2514_v21, %v2513_v20 }
 0xcb8   : > { %4608 = vmatmul.mubr.bf16.vlgmr.msra.gmra.mrb[28].mxu0 %v2531_v22 }
 0xcb9   : > { %4643 = vmatprep.mubr.msk.bf16.mxu0 %vm5375_vm2, %v5373_v0 }
 0xd8b   : > { %v2621_v25 = vpop.f32.mrb[28].mxu0 }
 0xd8c   : > { %v2622_v27 = vadd.f32 %v4338_v24, %v2621_v25  ;;  %v4609_v29 = vpop.f32.mrb[29].mxu0 }
 0xd8d   : > { %v2624_v44 = vpop.f32.mrb[30].mxu0 }
 0xd8e   : > { %v6044_v33 = vadd.f32 %v2622_v27, %v6001_v39  ;;  %v2625_v31 = vadd.f32 %v4338_v24, %v2624_v44  ;;  %v4610_v32 = vpop.f32.mrb[31].mxu0 }
 0xd90   : > { %v6047_v23 = vadd.f32 %v2625_v31, %v6004_v42  ;;  %v2632_v30 = vsel %vm1785_vm7, %v6044_v33, 0.0 }
 0xd91   : > { %2633 = vadd.xlane.f32.xlu0 %v2632_v30 }
 0xd92   : > { %v2635_v34 = vsel %vm1789_vm8, %v6047_v23, 0.0 }
 0xd93   : > { %2636 = vadd.xlane.f32.xlu1 %v2635_v34 }
 0xe1e   : > { %v2634_v36 = vpop.xlane.xlu0 %2633 }
 0xe1f   : > { %v2638_v37 = vmul.f32 0.03125, %v2634_v36 }
 0xe20   : > { %v2637_v40 = vpop.xlane.xlu1 %2636 }
 0xe21   : > { %v2640_v39 = vsub.f32 %v6044_v33, %v2638_v37  ;;  %v2639_v41 = vmul.f32 0.03125, %v2637_v40 }
 0xe23   : > { %v2641_v45 = vsub.f32 %v6047_v23, %v2639_v41  ;;  %v2642_v42 = vmul.f32 %v2640_v39, %v2640_v39 }
 0xe25   : > { %v2644_v46 = vsel %vm1785_vm7, %v2642_v42, 0.0  ;;  %v2643_v47 = vmul.f32 %v2641_v45, %v2641_v45 }
 0xe26   : > { %2645 = vadd.xlane.f32.xlu0 %v2644_v46 }
 0xe27   : > { %v2647_v48 = vsel %vm1789_vm8, %v2643_v47, 0.0 }
 0xe28   : > { %2648 = vadd.xlane.f32.xlu1 %v2647_v48 }
 0xeb3   : > { %v2646_v51 = vpop.xlane.xlu0 %2645 }
 0xeb4   : > { %v2650_v52 = vmul.f32 0.03125, %v2646_v51 }
 0xeb5   : > { %v2649_v38 = vpop.xlane.xlu1 %2648 }
 0xeb6   : > { %v2652_v53 = vadd.f32 1e-05, %v2650_v52  ;;  %v2651_v54 = vmul.f32 0.03125, %v2649_v38 }
 0xeb8   : > { %5038 = vrsqrt.f32 %v2652_v53  ;;  %v2653_v55 = vadd.f32 1e-05, %v2651_v54 }
 0xeba   : > { %5040 = vrsqrt.f32 %v2653_v55 }
 0xec2   : > { %v5039_v56 = vpop.eup %5038 }
 0xec3   : > { %v2656_v58 = vmul.f32 %v5039_v56, %v2640_v39 }
 0xec4   : > { %v5041_v59 = vpop.eup %5040 }
 0xec5   : > { %v2664_v60 = vmul.f32 %v4347_v57, %v2656_v58  ;;  %v2657_v61 = vmul.f32 %v5041_v59, %v2641_v45 }
 0xec7   : > { %v2665_v63 = vmul.f32 %v4347_v57, %v2657_v61  ;;  %v2672_v1 = vadd.f32 %v4348_v62, %v2664_v60 }
 0xec9   : > { %v2673_v2 = vadd.f32 %v4348_v62, %v2665_v63 }
 0xecb   : > { %v2684_v4 = vpack.c.bf16 %v2673_v2, %v2672_v1 }
 0xecd   : > { %4616 = vmatmul.mubr.msk.bf16.vlgmr.msra.gmra.mrb[20].mxu1 %vm1785_vm7, %v2684_v4 }
 0xece   : > { %4625 = vmatprep.mubr.msk.bf16.mxu1 %vm5375_vm2, %v5373_v0 }
 0xfa0   : > { %v2740_v6 = vpop.f32.mrb[20].mxu1 }
 0xfa1   : > { %v2741_v7 = vadd.f32 %v4349_v5, %v2740_v6  ;;  %v4617_v8 = vpop.f32.mrb[21].mxu1 }
 0xfa2   : > { %v2743_v9 = vpop.f32.mrb[22].mxu1 }
 0xfa3   : > { %v2744_v10 = vadd.f32 %v4349_v5, %v2743_v9  ;;  %v4618_v11 = vpop.f32.mrb[23].mxu1  ;;  %v2783_v12 = vrot.slane %v2741_v7, 7  ;;  %v2801_v13 = vrot.slane %v2741_v7, 5  ;;  %v2792_v16 = vrot.slane %v2741_v7, 6 }
 0xfa4   : > { %v2747_v31 = vmul.f32 0.35355338, %v2741_v7 }
 0xfa5   : > { %2786 = vrot.lane.b32.xlu0 %v2783_v12, %s6357_s10  ;;  %v2784_v14 = vrot.slane %v2744_v10, 7  ;;  %v2802_v15 = vrot.slane %v2744_v10, 5  ;;  %v2793_v17 = vrot.slane %v2744_v10, 6  ;;  %v2748_v27 = vmul.f32 0.35355338, %v2744_v10 }
 0xfa6   : > { %v2751_v37 = vrot.slane %v2747_v31, 7  ;;  %v2769_v47 = vrot.slane %v2747_v31, 5  ;;  %v2760_v50 = vrot.slane %v2747_v31, 6 }
 0xfa7   : > { %v2785_v18 = vsel %vm1559_vm0, %v2783_v12, %v2784_v14  ;;  %v2803_v19 = vsel %vm1925_vm9, %v2801_v13, %v2802_v15  ;;  %v2794_v20 = vsel %vm1560_vm1, %v2792_v16, %v2793_v17  ;;  %v2752_v34 = vrot.slane %v2748_v27, 7 }
 0xfa8   : > { %2788 = vrot.lane.b32.xlu1 %v2785_v18, %s6357_s10  ;;  %v4934_v21 = vpack.i.bf16 %v2794_v20, %v2792_v16  ;;  %v2761_v48 = vrot.slane %v2748_v27, 6  ;;  %v2770_v52 = vrot.slane %v2748_v27, 5 }
 0xfa9   : > { %2806 = vrot.lane.b32.xlu0 %v2803_v19, %s6355_s18  ;;  %v2753_v41 = vsel %vm1559_vm0, %v2751_v37, %v2752_v34 }
 0xfaa   : > { %v2762_v35 = vsel %vm1560_vm1, %v2760_v50, %v2761_v48  ;;  %v2771_v38 = vsel %vm1925_vm9, %v2769_v47, %v2770_v52 }
 0xfab   : > { %v4939_v51 = vpack.i.bf16 %v2762_v35, %v2760_v50 }
 0xfac   : > { %4935 = vrot.lane.b32.xlu1 %v4934_v21, %s6439_s1 }
 0xfb0   : > { %2804 = vrot.lane.b32.xlu1 %v2801_v13, %s6355_s18 }
0x1017   : > { %v2787_v22 = vpop.permute.xlu0 %2786 }
0x1018   : > { %v2810_v24 = vsel %vm1559_vm0, %v2744_v10, %v2787_v22 }
0x1019   : > { %v6076_v25 = vpack.c.bf16 %v2810_v24, %v2741_v7 }
0x101a   : > { %v2789_v29 = vpop.permute.xlu1 %2788 }
0x101b   : > { %v2807_v44 = vpop.permute.xlu0 %2806  ;;  %2822 = vrot.lane.b32.xlu1 %v6076_v25, %s6440_s22 }
0x101c   : > { %v6080_v32 = vpack.c.bf16 %v2807_v44, %v2807_v44 }
0x101e   : > { %v4936_v30 = vpop.permute.xlu1 %4935 }
0x101f   : > { %v4937_v36 = vunpack.i.l.bf16 %v4936_v30  ;;  %2826 = vrot.lane.b32.xlu1 %v6080_v32, %s6440_s22  ;;  %v4938_v40 = vunpack.i.h.bf16 %v4936_v30 }
0x1021   : > { %v2811_v45 = vsel %vm1560_vm1, %v2789_v29, %v4937_v36 }
0x1022   : > { %v2805_v39 = vpop.permute.xlu1 %2804 }
0x1023   : > { %v2812_v42 = vsel %vm1925_vm9, %v4938_v40, %v2805_v39  ;;  %2756 = vrot.lane.b32.xlu1 %v2753_v41, %s6357_s10 }
0x1024   : > { %v6088_v46 = vpack.c.bf16 %v2812_v42, %v2811_v45 }
0x1026   : > { %2824 = vrot.lane.b32.xlu0 %v6088_v46, %s6440_s22 }
0x1027   : > { %2772 = vrot.lane.b32.xlu1 %v2769_v47, %s6355_s18 }
0x102a   : > { %2754 = vrot.lane.b32.xlu0 %v2751_v37, %s6357_s10  ;;  %s6447_s10 = smov 8  }
0x102e   : > { %4940 = vrot.lane.b32.xlu0 %v4939_v51, %s6439_s1 }
0x1032   : > { %2774 = vrot.lane.b32.xlu0 %v2771_v38, %s6355_s18  ;;  %s6446_s18 = sld [smem:[#allocation39_spill]] }
0x108d   : > { %v2823_v53 = vpop.permute.xlu1 %2822 }
0x108e   : > { %v2838_v54 = vsel %vm1616_vm6, %v2823_v53, 0 }
0x108f   : > { %4620 = vmatpush3.bf16.xpose.msra.mxu1 %v2838_v54 }
0x1090   : > { %4621 = vmatprep.subr.bf16.mxu1 %v5373_v0 }
0x1091   : > { %v2827_v57 = vpop.permute.xlu1 %2826 }
0x1092   : > { %v2844_v59 = vsel %vm1616_vm6, %v2827_v57, 0 }
0x1095   : > { %v2757_v61 = vpop.permute.xlu1 %2756 }
0x1098   : > { %v2825_v55 = vpop.permute.xlu0 %2824 }
0x1099   : > { %v2841_v56 = vsel %vm1616_vm6, %v2825_v55, 0  ;;  %v2773_v4 = vpop.permute.xlu1 %2772 }
0x109a   : > { %4622 = vmatpush3.bf16.xpose.msra.mxu1 %v2841_v56 }
0x109b   : > { %4623 = vmatprep.subr.bf16.mxu1 %v5373_v0 }
0x109c   : > { %v2755_v58 = vpop.permute.xlu0 %2754 }
0x109d   : > { %v2778_v60 = vsel %vm1559_vm0, %v2748_v27, %v2755_v58  ;;  %vm6441_vm0 = vcmp.eq.f32.partialorder %v5924_v28, %v5922_v26 }
0x109e   : > { %v2813_v63 = vpack.c.bf16 %v2778_v60, %v2747_v31 }
0x10a0   : > { %v4941_v62 = vpop.permute.xlu0 %4940 }
0x10a1   : > { %v4943_v1 = vunpack.i.h.bf16 %v4941_v62  ;;  %v4942_v2 = vunpack.i.l.bf16 %v4941_v62 }
0x10a2   : > { %4624 = vmatpush3.bf16.xpose.msra.mxu1 %v2844_v59 }
0x10a3   : > { %4671 = vmatprep.subr.bf16.mxu1 %v5373_v0  ;;  %v2779_v5 = vsel %vm1560_vm1, %v2757_v61, %v4942_v2  ;;  %v2780_v6 = vsel %vm1925_vm9, %v4943_v1, %v2773_v4  ;;  %vm6443_vm9 = vcmask 289792  }
0x10a4   : > { %v2814_v7 = vpack.c.bf16 %v2780_v6, %v2779_v5  ;;  %v2775_v8 = vpop.permute.xlu0 %2774  ;;  %vm6445_vm10 = vmmov %vm6443_vm9 }
0x10a5   : > { %v2815_v9 = vpack.c.bf16 %v2775_v8, %v2775_v8 }
0x10a9   : > { %4626 = vmatmul.mubr.msk.bf16.vlgmr.msra.gmra.mrb[24].mxu1 %vm1616_vm6, %v2813_v63 }
0x10aa   : > { %4629 = vmatprep.mubr.msk.bf16.mxu1 %vm5375_vm2, %v5373_v0 }
0x10b1   : > { %4630 = vmatmul.mubr.msk.bf16.gmra.mrb[28].mxu1 %vm1616_vm6, %v2814_v7 }
0x10b2   : > { %4633 = vmatprep.mubr.msk.bf16.mxu1 %vm5375_vm2, %v5373_v0 }
0x10b9   : > { %4634 = vmatmul.mubr.msk.bf16.gmra.mrb[32].mxu1 %vm1616_vm6, %v2815_v9 }
0x10ba   : > { %4687 = vmatprep.mubr.msk.bf16.mxu1 %vm5375_vm2, %v5373_v0 }
0x117c   : > { %v2880_v10 = vpop.f32.mrb[24].mxu1 }
0x117d   : > { %v2902_v11 = vsel %vm4323_vm14, %v2880_v10, -1e+30  ;;  %v4627_v12 = vpop.f32.mrb[25].mxu1 }
0x117e   : > { %v2883_v13 = vpop.f32.mrb[26].mxu1  ;;  %v2907_v14 = vsel %vm2107_vm15, %v2902_v11, -inf }
0x117f   : > { %v2903_v15 = vsel %vm6441_vm0, %v2883_v13, -1e+30  ;;  %2908 = vmax.xlane.f32.xlu1 %v2907_v14  ;;  %v4628_v16 = vpop.f32.mrb[27].mxu1  ;;  %vm4387_vm0 = vcmp.eq.f32.partialorder %v5900_v3, 1.0 }
0x1180   : > { %v2910_v17 = vsel %vm2107_vm15, %v2903_v15, -inf }
0x1181   : > { %2911 = vmax.xlane.f32.xlu0 %v2910_v17 }
0x1184   : > { %v2888_v18 = vpop.f32.mrb[28].mxu1 }
0x1185   : > { %v2904_v19 = vsel %vm5937_vm5, %v2888_v18, -1e+30  ;;  %v4631_v20 = vpop.f32.mrb[29].mxu1 }
0x1186   : > { %v2891_v21 = vpop.f32.mrb[30].mxu1  ;;  %v2913_v22 = vsel %vm2107_vm15, %v2904_v19, -inf }
0x1187   : > { %v2905_v24 = vsel %vm5944_vm11, %v2891_v21, -1e+30  ;;  %2914 = vmax.xlane.f32.xlu0 %v2913_v22  ;;  %v4632_v27 = vpop.f32.mrb[31].mxu1 }
0x1188   : > { %v2916_v28 = vsel %vm2107_vm15, %v2905_v24, -inf  ;;  %v4977_v27 = vld [vmem:[%s6446_s18 + $0x8] sm:$0xff]  }
0x118b   : > { %2917 = vmax.xlane.f32.xlu0 %v2916_v28 }
0x118c   : > { %v2896_v29 = vpop.f32.mrb[32].mxu1 }
0x118d   : > { %v2906_v44 = vsel %vm6442_vm4, %v2896_v29, -1e+30  ;;  %v4635_v31 = vpop.f32.mrb[33].mxu1 }
0x118e   : > { %v2899_v30 = vpop.f32.mrb[34].mxu1  ;;  %v2919_v43 = vsel %vm6443_vm9, %v2906_v44, -inf }
0x118f   : > { %2920 = vmax.xlane.f32.xlu1 %v2919_v43  ;;  %v4636_v34 = vpop.f32.mrb[35].mxu1 }
0x11a0   : > { %2965 = vrot.lane.b32.xlu1 %v6076_v25, %s6444_s11 }
0x120c   : > { %v2909_v49 = vpop.xlane.xlu1 %2908 }
0x120d   : > { %v2922_v36 = vsub.f32 %v2902_v11, %v2909_v49 }
0x120e   : > { %v2912_v37 = vpop.xlane.xlu0 %2911 }
0x120f   : > { %v2927_v40 = vmul.f32 1.442695, %v2922_v36  ;;  %v2923_v39 = vsub.f32 %v2903_v15, %v2912_v37 }
0x1211   : > { %5042 = vpow2.f32 %v2927_v40  ;;  %v2929_v41 = vmul.f32 1.442695, %v2923_v39 }
0x1213   : > { %5044 = vpow2.f32 %v2929_v41 }
0x1214   : > { %v2915_v45 = vpop.xlane.xlu0 %2914 }
0x1215   : > { %v2924_v26 = vsub.f32 %v2904_v19, %v2915_v45  ;;  %v4976_v19 = vld [vmem:[%s6446_s18] sm:$0xff]  }
0x1217   : > { %v2931_v42 = vmul.f32 1.442695, %v2924_v26 }
0x1218   : > { %v2918_v47 = vpop.xlane.xlu0 %2917 }
0x1219   : > { %5046 = vpow2.f32 %v2931_v42  ;;  %v2925_v48 = vsub.f32 %v2905_v24, %v2918_v47 }
0x121b   : > { %v5043_v50 = vpop.eup %5042  ;;  %v2933_v35 = vmul.f32 1.442695, %v2925_v48 }
0x121c   : > { %v2921_v51 = vpop.xlane.xlu1 %2920  ;;  %v2937_v52 = vsel %vm2107_vm15, %v5043_v50, 0.0 }
0x121d   : > { %v5045_v25 = vpop.eup %5044  ;;  %5048 = vpow2.f32 %v2933_v35  ;;  %v2926_v38 = vsub.f32 %v2906_v44, %v2921_v51  ;;  %2938 = vadd.xlane.f32.xlu0 %v2937_v52 }
0x121e   : > { %v2940_v53 = vsel %vm2107_vm15, %v5045_v25, 0.0 }
0x121f   : > { %v2935_v54 = vmul.f32 1.442695, %v2926_v38  ;;  %2941 = vadd.xlane.f32.xlu1 %v2940_v53 }
0x1220   : > { %v2966_v55 = vpop.permute.xlu1 %2965 }
0x1221   : > { %5050 = vpow2.f32 %v2935_v54  ;;  %4638 = vmatpush3.bf16.msra.mxu0 %v2966_v55 }
0x1222   : > { %4639 = vmatprep.subr.bf16.mxu0 %v5373_v0 }
0x1223   : > { %v5047_v56 = vpop.eup %5046 }
0x1224   : > { %v2943_v57 = vsel %vm2107_vm15, %v5047_v56, 0.0 }
0x1225   : > { %2944 = vadd.xlane.f32.xlu0 %v2943_v57 }
0x1227   : > { %v5049_v58 = vpop.eup %5048 }
0x1228   : > { %v2946_v59 = vsel %vm2107_vm15, %v5049_v58, 0.0 }
0x1229   : > { %2947 = vadd.xlane.f32.xlu1 %v2946_v59 }
0x122b   : > { %v5051_v60 = vpop.eup %5050 }
0x122c   : > { %v2949_v61 = vsel %vm6445_vm10, %v5051_v60, 0.0 }
0x122d   : > { %2950 = vadd.xlane.f32.xlu0 %v2949_v61 }
0x123a   : > { %2969 = vrot.lane.b32.xlu1 %v6080_v32, %s6444_s11 }
0x1243   : > { %2967 = vrot.lane.b32.xlu0 %v6088_v46, %s6444_s11 }
0x12aa   : > { %v2939_v63 = vpop.xlane.xlu0 %2938 }
0x12ac   : > { %v2942_v62 = vpop.xlane.xlu1 %2941 }
0x12ad   : > { %5052 = vrcp.f32 %v2942_v62 }
0x12ae   : > { %5054 = vrcp.f32 %v2939_v63 }
0x12b2   : > { %v2945_v1 = vpop.xlane.xlu0 %2944 }
0x12b6   : > { %v2948_v2 = vpop.xlane.xlu1 %2947 }
0x12b7   : > { %5056 = vrcp.f32 %v2948_v2  ;;  %v5053_v5 = vpop.eup %5052  ;;  %v4359_v2 = vld [vmem:[%s6450_s4] ss:$0 sm:$0xff]  ;;  %s6456_s4 = sld [smem:[#allocation41_spill]] }
0x12b8   : > { %5058 = vrcp.f32 %v2945_v1  ;;  %v5055_v7 = vpop.eup %5054  ;;  %v2955_v9 = vmul.f32 %v5053_v5, %v5045_v25 }
0x12b9   : > { %v2953_v32 = vmul.f32 %v5055_v7, %v5043_v50 }
0x12ba   : > { %v2951_v4 = vpop.xlane.xlu0 %2950  ;;  %v2970_v8 = vpop.permute.xlu1 %2969 }
0x12bb   : > { %v2983_v46 = vsel %vm1560_vm1, %v2970_v8, 0  ;;  %5060 = vrcp.f32 %v2951_v4  ;;  %v2962_v10 = vpack.c.bf16 %v2955_v9, %v2953_v32  ;;  %vm6451_vm1 = vcmask 130048  }
0x12bc   : > { %vm6452_vm14 = vmmov %vm6451_vm1 }
0x12bd   : > { %vm6466_vm4 = vmmov %vm6451_vm1 }
0x12be   : > { %v2968_v6 = vpop.permute.xlu0 %2967 }
0x12bf   : > { %4640 = vmatpush3.bf16.msra.mxu0 %v2968_v6 }
0x12c0   : > { %4641 = vmatprep.subr.bf16.mxu0 %v5373_v0 }
0x12c1   : > { %v5057_v11 = vpop.eup %5056 }
0x12c2   : > { %v5059_v12 = vpop.eup %5058  ;;  %v2959_v13 = vmul.f32 %v5057_v11, %v5049_v58 }
0x12c3   : > { %4642 = vmatpush3.bf16.msra.mxu0 %v2983_v46  ;;  %v2957_v14 = vmul.f32 %v5059_v12, %v5047_v56 }
0x12c4   : > { %4655 = vmatprep.subr.bf16.mxu0 %v5373_v0 }
0x12c5   : > { %v2963_v15 = vpack.c.bf16 %v2959_v13, %v2957_v14  ;;  %v5061_v16 = vpop.eup %5060 }
0x12c6   : > { %4644 = vmatmul.mubr.msk.bf16.vlgmr.msra.gmra.mrb[32].mxu0 %vm2107_vm15, %v2962_v10  ;;  %v2961_v17 = vmul.f32 %v5061_v16, %v5051_v60 }
0x12c7   : > { %4647 = vmatprep.mubr.msk.bf16.mxu0 %vm5375_vm2, %v5373_v0  ;;  %4656 = vmatpush3.bf16.msra.mxu0 %v4976_v19 }
0x12c8   : > { %v2964_v18 = vpack.c.bf16 %v2961_v17, %v2961_v17  ;;  %4657 = vmatprep.subr.bf16.mxu0 %v5373_v0 }
0x12cb   : > { %4658 = vmatpush3.bf16.msra.mxu0 %v4977_v27 }
0x12cc   : > { %4663 = vmatprep.subr.bf16.mxu0 %v5373_v0 }
0x12ce   : > { %4648 = vmatmul.mubr.msk.bf16.gmra.mrb[36].mxu0 %vm2107_vm15, %v2963_v15 }
0x12cf   : > { %4651 = vmatprep.mubr.msk.bf16.mxu0 %vm5375_vm2, %v5373_v0 }
0x12d6   : > { %4652 = vmatmul.mubr.msk.bf16.gmra.mrb[40].mxu0 %vm2107_vm15, %v2964_v18  ;;  %vm6453_vm15 = vcmask 195584  }
0x12d7   : > { %4659 = vmatprep.mubr.msk.bf16.mxu0 %vm5375_vm2, %v5373_v0 }
0x1399   : > { %v3019_v20 = vpop.f32.mrb[32].mxu0 }
0x139a   : > { %v4645_v21 = vpop.f32.mrb[33].mxu0 }
0x139b   : > { %v3022_v22 = vpop.f32.mrb[34].mxu0  ;;  %v4979_v21 = vld [vmem:[%s6455_s5 + $0x8] sm:$0xff]  }
0x139c   : > { %v4646_v24 = vpop.f32.mrb[35].mxu0  ;;  %v3043_v29 = vrot.slane %v3022_v22, 1 }
0x13a1   : > { %v3027_v28 = vpop.f32.mrb[36].mxu0 }
0x13a2   : > { %v3044_v44 = vrot.slane %v3027_v28, 1  ;;  %v4649_v31 = vpop.f32.mrb[37].mxu0  ;;  %v3053_v34 = vrot.slane %v3027_v28, 2 }
0x13a3   : > { %v3030_v30 = vpop.f32.mrb[38].mxu0 }
0x13a4   : > { %v3045_v43 = vsel %vm2245_vm13, %v3043_v29, %v3044_v44  ;;  %v3054_v49 = vrot.slane %v3030_v30, 2  ;;  %v4650_v36 = vpop.f32.mrb[39].mxu0  ;;  %v3063_v45 = vrot.slane %v3030_v30, 3  ;;  %vm4389_vm13 = vcmp.eq.f32.partialorder %v5900_v3, 3.0 }
0x13a5   : > { %v4944_v37 = vpack.i.bf16 %v3044_v44, %v3045_v43  ;;  %v4363_v43 = vld [vmem:[%s6456_s4] ss:$0 sm:$0xff]  ;;  %s6460_s4 = sld [smem:[#allocation46_spill]] }
0x13a6   : > { %v3055_v40 = vsel %vm2256_vm12, %v3053_v34, %v3054_v49  ;;  %vm4386_vm12 = vcmp.eq.f32.partialorder %v5900_v3, 0.0 }
0x13a7   : > { %v4949_v39 = vpack.i.bf16 %v3054_v49, %v3055_v40  ;;  %4945 = vrot.lane.b32.xlu1 %v4944_v37, %s6447_s10  ;;  %v4364_v37 = vld [vmem:[%s6457_s6] ss:$0 sm:$0xff]  ;;  %s6459_s6 = sld [smem:[#allocation44_spill]] }
0x13a9   : > { %v3035_v41 = vpop.f32.mrb[40].mxu0 }
0x13aa   : > { %v3064_v26 = vrot.slane %v3035_v41, 3  ;;  %v4653_v42 = vpop.f32.mrb[41].mxu0 }
0x13ab   : > { %4950 = vrot.lane.b32.xlu1 %v4949_v39, %s6448_s2  ;;  %v3038_v47 = vpop.f32.mrb[42].mxu0  ;;  %v4981_v42 = vld [vmem:[%s6458_s8 + $0x8] sm:$0xff]  }
0x13ac   : > { %v3065_v48 = vsel %vm2267_vm3, %v3063_v45, %v3064_v26  ;;  %v4654_v50 = vpop.f32.mrb[43].mxu0  ;;  %vm6454_vm3 = vmmov %vm6453_vm15  ;;  %v4982_v47 = vld [vmem:[%s6458_s8 + $0x10] sm:$0xff]  }
0x13ad   : > { %v4954_v35 = vpack.i.bf16 %v3064_v26, %v3065_v48  ;;  %v4980_v26 = vld [vmem:[%s6458_s8] sm:$0xff]   ;;  %v4983_v48 = vld [vmem:[%s6458_s8 + $0x18] sm:$0xff]   ;;  %vm6467_vm9 = vmmov %vm6454_vm3 }
0x13ae   : > { %4672 = vmatpush3.bf16.msra.mxu1 %v4980_v26  ;;  %v4984_v50 = vld [vmem:[%s6458_s8 + $0x20] sm:$0xff]  }
0x13af   : > { %4955 = vrot.lane.b32.xlu0 %v4954_v35, %s6449_s3  ;;  %4673 = vmatprep.subr.bf16.mxu1 %v5373_v0  ;;  %v4985_v35 = vld [vmem:[%s6458_s8 + $0x28] sm:$0xff]  }
0x13b2   : > { %4674 = vmatpush3.bf16.msra.mxu1 %v4981_v42 }
0x13b3   : > { %4675 = vmatprep.subr.bf16.mxu1 %v5373_v0 }
0x13b6   : > { %4676 = vmatpush3.bf16.msra.mxu1 %v4982_v47 }
0x13b7   : > { %4677 = vmatprep.subr.bf16.mxu1 %v5373_v0 }
0x13ba   : > { %4678 = vmatpush3.bf16.msra.mxu1 %v4983_v48 }
0x13bb   : > { %4679 = vmatprep.subr.bf16.mxu1 %v5373_v0 }
0x13be   : > { %4680 = vmatpush3.bf16.msra.mxu1 %v4984_v50 }
0x13bf   : > { %4681 = vmatprep.subr.bf16.mxu1 %v5373_v0 }
0x13c2   : > { %4682 = vmatpush3.bf16.msra.mxu1 %v4985_v35 }
0x13c3   : > { %4683 = vmatprep.subr.bf16.mxu1 %v5373_v0 }
0x1419   : > { %v4946_v51 = vpop.permute.xlu1 %4945 }
0x141a   : > { %v4948_v25 = vunpack.i.h.bf16 %v4946_v51  ;;  %v4947_v38 = vunpack.i.l.bf16 %v4946_v51  ;;  %v4986_v51 = vld [vmem:[%s6458_s8 + $0x30] sm:$0xff]  }
0x141b   : > { %4684 = vmatpush3.bf16.msra.mxu1 %v4986_v51  ;;  %v4369_v51 = vld [vmem:[%s6460_s4] ss:$0 sm:$0xff]  ;;  %s6462_s4 = sld [smem:[#allocation47_spill]] }
0x141c   : > { %v3073_v56 = vsel %vm1616_vm6, %v3022_v22, %v4948_v25  ;;  %v3072_v57 = vsel %vm1616_vm6, %v3019_v20, %v4947_v38  ;;  %v4978_v20 = vld [vmem:[%s6455_s5] sm:$0xff]   ;;  %4685 = vmatprep.subr.bf16.mxu1 %v5373_v0  ;;  %s1543_s5 = scalar_lea.vmem %s5637_s29, %s6470_s7  ;;  %s6464_s7 = smov 104  }
0x141d   : > { %v4951_v52 = vpop.permute.xlu1 %4950  ;;  %v4365_v25 = vld [vmem:[%s6459_s6] ss:$0 sm:$0xff]  ;;  %s6461_s6 = sld [smem:[#allocation48_spill]] }
0x141e   : > { %v4953_v53 = vunpack.i.h.bf16 %v4951_v52  ;;  %v4952_v54 = vunpack.i.l.bf16 %v4951_v52  ;;  %v4987_v52 = vld [vmem:[%s6458_s8 + $0x38] sm:$0xff]  }
0x141f   : > { %4686 = vmatpush3.bf16.msra.mxu1 %v4987_v52 }
0x1420   : > { %v3075_v60 = vsel %vm6451_vm1, %v3073_v56, %v4953_v53  ;;  %v3074_v61 = vsel %vm6452_vm14, %v3072_v57, %v4952_v54  ;;  %4715 = vmatprep.subr.bf16.mxu1 %v5373_v0 }
0x1421   : > { %v4956_v55 = vpop.permute.xlu0 %4955 }
0x1422   : > { %v4958_v58 = vunpack.i.h.bf16 %v4956_v55  ;;  %v4957_v59 = vunpack.i.l.bf16 %v4956_v55 }
0x1424   : > { %v3077_v62 = vsel %vm6453_vm15, %v3075_v60, %v4958_v58  ;;  %v3076_v63 = vsel %vm6454_vm3, %v3074_v61, %v4957_v59 }
0x1425   : > { %v3078_v1 = vpack.c.bf16 %v3077_v62, %v3076_v63 }
0x1427   : > { %4660 = vmatmul.mubr.msk.bf16.vlgmr.msra.gmra.mrb[44].mxu0 %vm1785_vm7, %v3078_v1 }
0x1428   : > { %4667 = vmatprep.mubr.msk.bf16.mxu0 %vm5375_vm2, %v5373_v0  ;;  %4664 = vmatpush3.bf16.msra.mxu0 %v4978_v20 }
0x1429   : > { %4665 = vmatprep.subr.bf16.mxu0 %v5373_v0 }
0x142c   : > { %4666 = vmatpush3.bf16.msra.mxu0 %v4979_v21 }
0x142d   : > { %4691 = vmatprep.subr.bf16.mxu0 %v5373_v0 }
0x14fa   : > { %v3134_v4 = vpop.f32.mrb[44].mxu0 }
0x14fb   : > { %v3135_v5 = vadd.f32 %v4359_v2, %v3134_v4  ;;  %v4661_v6 = vpop.f32.mrb[45].mxu0 }
0x14fc   : > { %v3137_v7 = vpop.f32.mrb[46].mxu0 }
0x14fd   : > { %v6177_v8 = vadd.f32 %v3135_v5, %v6044_v33  ;;  %v3138_v9 = vadd.f32 %v4359_v2, %v3137_v7  ;;  %v4662_v32 = vpop.f32.mrb[47].mxu0 }
0x14ff   : > { %v6180_v46 = vadd.f32 %v3138_v9, %v6047_v23  ;;  %v3145_v10 = vsel %vm1785_vm7, %v6177_v8, 0.0 }
0x1500   : > { %3146 = vadd.xlane.f32.xlu1 %v3145_v10 }
0x1501   : > { %v3148_v11 = vsel %vm1789_vm8, %v6180_v46, 0.0 }
0x1502   : > { %3149 = vadd.xlane.f32.xlu0 %v3148_v11 }
0x158d   : > { %v3147_v12 = vpop.xlane.xlu1 %3146 }
0x158e   : > { %v3151_v13 = vmul.f32 0.03125, %v3147_v12 }
0x158f   : > { %v3150_v14 = vpop.xlane.xlu0 %3149 }
0x1590   : > { %v3153_v33 = vsub.f32 %v6177_v8, %v3151_v13  ;;  %v3152_v15 = vmul.f32 0.03125, %v3150_v14 }
0x1592   : > { %v3154_v16 = vsub.f32 %v6180_v46, %v3152_v15  ;;  %v3155_v23 = vmul.f32 %v3153_v33, %v3153_v33 }
0x1594   : > { %v3157_v17 = vsel %vm1785_vm7, %v3155_v23, 0.0  ;;  %v3156_v18 = vmul.f32 %v3154_v16, %v3154_v16 }
0x1595   : > { %3158 = vadd.xlane.f32.xlu0 %v3157_v17 }
0x1596   : > { %v3160_v19 = vsel %vm1789_vm8, %v3156_v18, 0.0 }
0x1599   : > { %3161 = vadd.xlane.f32.xlu0 %v3160_v19 }
0x1622   : > { %v3159_v22 = vpop.xlane.xlu0 %3158 }
0x1623   : > { %v3163_v24 = vmul.f32 0.03125, %v3159_v22 }
0x1625   : > { %v3165_v27 = vadd.f32 1e-05, %v3163_v24 }
0x1626   : > { %v3162_v28 = vpop.xlane.xlu0 %3161 }
0x1627   : > { %5062 = vrsqrt.f32 %v3165_v27  ;;  %v3164_v29 = vmul.f32 0.03125, %v3162_v28 }
0x1629   : > { %v3166_v44 = vadd.f32 1e-05, %v3164_v29 }
0x162b   : > { %5064 = vrsqrt.f32 %v3166_v44 }
0x1631   : > { %v5063_v31 = vpop.eup %5062 }
0x1632   : > { %v3169_v30 = vmul.f32 %v5063_v31, %v3153_v33 }
0x1634   : > { %v3177_v49 = vmul.f32 %v4363_v43, %v3169_v30 }
0x1635   : > { %v5065_v34 = vpop.eup %5064 }
0x1636   : > { %v3170_v36 = vmul.f32 %v5065_v34, %v3154_v16  ;;  %v3185_v39 = vadd.f32 %v4364_v37, %v3177_v49 }
0x1638   : > { %v3178_v40 = vmul.f32 %v4363_v43, %v3170_v36 }
0x163a   : > { %v3186_v41 = vadd.f32 %v4364_v37, %v3178_v40 }
0x163c   : > { %v3191_v45 = vpack.c.bf16 %v3186_v41, %v3185_v39 }
0x163e   : > { %4668 = vmatmul.mubr.msk.bf16.vlgmr.msra.gmra.mrb[48].mxu0 %vm1785_vm7, %v3191_v45 }
0x163f   : > { %4695 = vmatprep.mubr.msk.bf16.mxu0 %vm5375_vm2, %v5373_v0 }
0x1711   : > { %v3248_v38 = vpop.f32.mrb[48].mxu0 }
0x1712   : > { %v3249_v53 = vadd.f32 %v4365_v25, %v3248_v38  ;;  %v4669_v54 = vpop.f32.mrb[49].mxu0 }
0x1713   : > { %v3251_v55 = vpop.f32.mrb[50].mxu0 }
0x1714   : > { %v3255_v56 = vmul.f32 0.70710677, %v3249_v53  ;;  %v3252_v57 = vadd.f32 %v4365_v25, %v3251_v55  ;;  %v4670_v58 = vpop.f32.mrb[51].mxu0  ;;  %v3303_v26 = vmul.f32 0.5, %v3249_v53 }
0x1716   : > { %v3257_v59 = vand.u32 2147483647, %v3255_v56  ;;  %v3256_v60 = vmul.f32 0.70710677, %v3252_v57  ;;  %vm3297_vm5 = vcmp.ge.f32.partialorder %v3255_v56, 0.0  ;;  %v3304_v42 = vmul.f32 0.5, %v3252_v57 }
0x1718   : > { %v3259_v61 = vmul.f32 0.3275911, %v3257_v59  ;;  %v3258_v62 = vand.u32 2147483647, %v3256_v60  ;;  %v3285_v4 = vsub.f32 0.0, %v3257_v59  ;;  %vm3298_vm11 = vcmp.ge.f32.partialorder %v3256_v60, 0.0 }
0x171a   : > { %v3261_v63 = vadd.f32 1.0, %v3259_v61  ;;  %v3260_v1 = vmul.f32 0.3275911, %v3258_v62  ;;  %v3286_v5 = vsub.f32 0.0, %v3258_v62  ;;  %v3287_v7 = vmul.f32 %v3285_v4, %v3257_v59 }
0x171c   : > { %5066 = vrcp.f32 %v3261_v63  ;;  %v3262_v2 = vadd.f32 1.0, %v3260_v1  ;;  %v3288_v11 = vmul.f32 %v3286_v5, %v3258_v62  ;;  %v3289_v12 = vmul.f32 1.442695, %v3287_v7  ;;  %v4988_v63 = vld [vmem:[%s6461_s6] sm:$0xff]   ;;  %v4989_v1 = vld [vmem:[%s6461_s6 + $0x8] sm:$0xff]  }
0x171d   : > { %4692 = vmatpush3.bf16.msra.mxu0 %v4988_v63 }
0x171e   : > { %5068 = vrcp.f32 %v3262_v2  ;;  %v3291_v16 = vmul.f32 1.442695, %v3288_v11  ;;  %4693 = vmatprep.subr.bf16.mxu0 %v5373_v0 }
0x171f   : > { %5070 = vpow2.f32 %v3289_v12  ;;  %v4380_v12 = vld [vmem:[#allocation4] ss:$0 sm:$0xff] }
0x1720   : > { %5072 = vpow2.f32 %v3291_v16 }
0x1721   : > { %4694 = vmatpush3.bf16.msra.mxu0 %v4989_v1 }
0x1726   : > { %v5067_v6 = vpop.eup %5066 }
0x1727   : > { %v3267_v9 = vmul.f32 1.0614054, %v5067_v6 }
0x1728   : > { %v5069_v32 = vpop.eup %5068 }
0x1729   : > { %v3269_v10 = vadd.f32 -1.4531521, %v3267_v9  ;;  %v3268_v13 = vmul.f32 1.0614054, %v5069_v32  ;;  %v5071_v29 = vpop.eup %5070  ;;  %v4379_v9 = vld [vmem:[#allocation2] ss:$0 sm:$0xff] }
0x172a   : > { %v5073_v43 = vpop.eup %5072 }
0x172b   : > { %v3271_v14 = vmul.f32 %v5067_v6, %v3269_v10  ;;  %v3270_v33 = vadd.f32 -1.4531521, %v3268_v13 }
0x172d   : > { %v3273_v15 = vadd.f32 1.4214138, %v3271_v14  ;;  %v3272_v23 = vmul.f32 %v5069_v32, %v3270_v33 }
0x172f   : > { %v3275_v17 = vmul.f32 %v5067_v6, %v3273_v15  ;;  %v3274_v18 = vadd.f32 1.4214138, %v3272_v23 }
0x1731   : > { %v3277_v19 = vadd.f32 -0.28449672, %v3275_v17  ;;  %v3276_v20 = vmul.f32 %v5069_v32, %v3274_v18 }
0x1733   : > { %v3279_v21 = vmul.f32 %v5067_v6, %v3277_v19  ;;  %v3278_v22 = vadd.f32 -0.28449672, %v3276_v20 }
0x1735   : > { %v3281_v24 = vadd.f32 0.2548296, %v3279_v21  ;;  %v3280_v27 = vmul.f32 %v5069_v32, %v3278_v22 }
0x1737   : > { %v3283_v28 = vmul.f32 %v5067_v6, %v3281_v24  ;;  %v3282_v44 = vadd.f32 0.2548296, %v3280_v27  ;;  %v4378_v6 = vld [vmem:[%s6462_s4] ss:$0 sm:$0xff] }
0x1739   : > { %v3293_v31 = vmul.f32 %v5071_v29, %v3283_v28  ;;  %v3284_v30 = vmul.f32 %v5069_v32, %v3282_v44 }
0x173b   : > { %v3295_v34 = vsub.f32 1.0, %v3293_v31  ;;  %v3294_v49 = vmul.f32 %v5073_v43, %v3284_v30 }
0x173d   : > { %v3299_v36 = vsub.f32 0.0, %v3295_v34  ;;  %v3296_v37 = vsub.f32 1.0, %v3294_v49 }
0x173f   : > { %v3301_v40 = vsel %vm3297_vm5, %v3295_v34, %v3299_v36  ;;  %v3300_v39 = vsub.f32 0.0, %v3296_v37 }
0x1740   : > { %v3305_v41 = vadd.f32 1.0, %v3301_v40 }
0x1741   : > { %v3302_v45 = vsel %vm3298_vm11, %v3296_v37, %v3300_v39 }
0x1742   : > { %v3306_v47 = vadd.f32 1.0, %v3302_v45  ;;  %v3307_v48 = vmul.f32 %v3305_v41, %v3303_v26 }
0x1744   : > { %v3308_v50 = vmul.f32 %v3306_v47, %v3304_v42 }
0x1746   : > { %v3325_v35 = vpack.c.bf16 %v3308_v50, %v3307_v48 }
0x1748   : > { %4688 = vmatmul.mubr.bf16.vlgmr.msra.gmra.mrb[36].mxu1 %v3325_v35 }
0x1749   : > { %4719 = vmatprep.mubr.msk.bf16.mxu1 %vm5375_vm2, %v5373_v0 }
0x181b   : > { %v3415_v52 = vpop.f32.mrb[36].mxu1 }
0x181c   : > { %v3416_v25 = vadd.f32 %v4369_v51, %v3415_v52  ;;  %v4689_v38 = vpop.f32.mrb[37].mxu1 }
0x181d   : > { %v3418_v54 = vpop.f32.mrb[38].mxu1 }
0x181e   : > { %v6220_v55 = vadd.f32 %v3416_v25, %v6177_v8  ;;  %v3419_v53 = vadd.f32 %v4369_v51, %v3418_v54  ;;  %v4690_v56 = vpop.f32.mrb[39].mxu1 }
0x1820   : > { %v3423_v57 = vadd.f32 %v3419_v53, %v6180_v46  ;;  %v3427_v58 = vsel %vm1785_vm7, %v6220_v55, 0.0 }
0x1821   : > { %3428 = vadd.xlane.f32.xlu1 %v3427_v58 }
0x1822   : > { %3424 = vst.msk [vmem:[%s1543_s5] sm:$0x1] %vm1789_vm8, %v3423_v57  ;;  %s6463_s5 = smov 120   ;;  %vm4388_vm8 = vcmp.eq.f32.partialorder %v5900_v3, 2.0 }
0x18ae   : > { %v3429_v59 = vpop.xlane.xlu1 %3428 }
0x18af   : > { %v3430_v60 = vmul.f32 0.03125, %v3429_v59 }
0x18b1   : > { %v3431_v61 = vsub.f32 %v6220_v55, %v3430_v60 }
0x18b3   : > { %v3432_v62 = vmul.f32 %v3431_v61, %v3431_v61 }
0x18b5   : > { %v3433_v8 = vsel %vm1785_vm7, %v3432_v62, 0.0 }
0x18b6   : > { %3434 = vadd.xlane.f32.xlu0 %v3433_v8 }
0x1943   : > { %v3435_v46 = vpop.xlane.xlu0 %3434 }
0x1944   : > { %v3436_v2 = vmul.f32 0.03125, %v3435_v46 }
0x1946   : > { %v3437_v4 = vadd.f32 1e-05, %v3436_v2 }
0x1948   : > { %5074 = vrsqrt.f32 %v3437_v4 }
0x1952   : > { %v5075_v5 = vpop.eup %5074 }
0x1953   : > { %v3439_v7 = vmul.f32 %v5075_v5, %v3431_v61 }
0x1955   : > { %v3446_v32 = vmul.f32 %v4378_v6, %v3439_v7 }
0x1957   : > { %v3453_v10 = vadd.f32 %v4379_v9, %v3446_v32 }
0x1959   : > { %v3464_v11 = vpack.c.bf16 %v3453_v10, %v3453_v10 }
0x195b   : > { %4696 = vmatmul.mubr.msk.bf16.vlgmr.msra.gmra.mrb[52].mxu0 %vm1785_vm7, %v3464_v11 }
0x1a2e   : > { %v3520_v13 = vpop.f32.mrb[52].mxu0 }
0x1a2f   : > { %v3521_v14 = vadd.f32 %v4380_v12, %v3520_v13  ;;  %v4697_v33 = vpop.f32.mrb[53].mxu0 }
0x1a30   : > { %v3523_v15 = vpop.f32.mrb[54].mxu0 }
0x1a31   : > { %3541 = vrot.lane.b32.xlu0 %v3521_v14, %s6439_s1  ;;  %3538 = vrot.lane.b32.xlu1 %v3521_v14, %s6463_s5  ;;  %v4698_v16 = vpop.f32.mrb[55].mxu0  ;;  %v3526_v23 = vmul.f32 0.35355338, %v3521_v14 }
0x1a35   : > { %3544 = vrot.lane.b32.xlu1 %v3521_v14, %s6464_s7  ;;  %3528 = vrot.lane.b32.xlu0 %v3526_v23, %s6463_s5 }
0x1a39   : > { %3534 = vrot.lane.b32.xlu0 %v3526_v23, %s6464_s7 }
0x1aa3   : > { %v3542_v17 = vpop.permute.xlu0 %3541  ;;  %v3539_v18 = vpop.permute.xlu1 %3538 }
0x1aa4   : > { %v6240_v19 = vpack.c.bf16 %v3539_v18, %v3521_v14 }
0x1aa6   : > { %3553 = vrot.lane.b32.xlu1 %v6240_v19, %s6440_s22 }
0x1aa7   : > { %v3545_v20 = vpop.permute.xlu1 %3544  ;;  %v3529_v21 = vpop.permute.xlu0 %3528 }
0x1aa8   : > { %v6244_v22 = vpack.c.bf16 %v3545_v20, %v3542_v17  ;;  %v3547_v24 = vpack.c.bf16 %v3529_v21, %v3526_v23 }
0x1aaa   : > { %3555 = vrot.lane.b32.xlu1 %v6244_v22, %s6440_s22  ;;  %4703 = vmatprep.mubr.msk.bf16.mxu0 %vm1616_vm6, %v3547_v24 }
0x1aab   : > { %v3535_v30 = vpop.permute.xlu0 %3534 }
0x1aae   : > { %3531 = vrot.lane.b32.xlu1 %v3526_v23, %s6439_s1  ;;  %s6465_s1 = sld [smem:[#allocation49_spill]] }
0x1ab4   : > { %v4990_v17 = vld [vmem:[%s6465_s1] sm:$0xff]   ;;  %v4991_v18 = vld [vmem:[%s6465_s1 + $0x8] sm:$0xff]  }
0x1ab5   : > { %4716 = vmatpush3.bf16.msra.mxu1 %v4990_v17 }
0x1ab6   : > { %4717 = vmatprep.subr.bf16.mxu1 %v5373_v0 }
0x1ab9   : > { %4718 = vmatpush3.bf16.msra.mxu1 %v4991_v18 }
0x1aba   : > { %4731 = vmatprep.subr.bf16.mxu1 %v5373_v0 }
0x1b18   : > { %v3554_v27 = vpop.permute.xlu1 %3553 }
0x1b19   : > { %v3564_v28 = vsel %vm1616_vm6, %v3554_v27, 0  ;;  %4757 = vmatprep.subr.msk.bf16.mxu0 %vm1616_vm6, %v3554_v27 }
0x1b1a   : > { %4700 = vmatpush3.bf16.xpose.msra.mxu0 %v3564_v28 }
0x1b1c   : > { %v3556_v29 = vpop.permute.xlu1 %3555 }
0x1b1d   : > { %4758 = vmatprep.subr.msk.bf16.mxu0 %vm1616_vm6, %v3556_v29  ;;  %v3567_v44 = vsel %vm1616_vm6, %v3556_v29, 0 }
0x1b20   : > { %v3532_v31 = vpop.permute.xlu1 %3531 }
0x1b21   : > { %v3548_v43 = vpack.c.bf16 %v3535_v30, %v3532_v31 }
0x1b22   : > { %4702 = vmatpush3.bf16.xpose.msra.mxu0 %v3567_v44 }
0x1b29   : > { %4704 = vmatmul.mubr.msk.bf16.vlgmr.msra.gmra.mrb[56].mxu0 %vm1616_vm6, %v3548_v43  ;;  %v4392_v43 = vld [vmem:[#allocation6] ss:$0 sm:$0xff] }
0x1bfc   : > { %v4705_v34 = vpop.f32.mrb[56].mxu0 }
0x1bfd   : > { %v3641_v49 = vsel %vm4388_vm8, %v4705_v34, -1e+30  ;;  %v3603_v36 = vpop.f32.mrb[57].mxu0 }
0x1bfe   : > { %v3639_v37 = vsel %vm4386_vm12, %v3603_v36, -1e+30  ;;  %v4706_v40 = vpop.f32.mrb[58].mxu0  ;;  %v3649_v39 = vsel %vm1785_vm7, %v3641_v49, -inf }
0x1bff   : > { %v3642_v41 = vsel %vm4389_vm13, %v4706_v40, -1e+30  ;;  %3650 = vmax.xlane.f32.xlu0 %v3649_v39  ;;  %v3606_v45 = vpop.f32.mrb[59].mxu0  ;;  %v3643_v26 = vsel %vm1785_vm7, %v3639_v37, -inf }
0x1c00   : > { %v3640_v42 = vsel %vm4387_vm0, %v3606_v45, -1e+30  ;;  %3644 = vmax.xlane.f32.xlu1 %v3643_v26  ;;  %v3652_v48 = vsel %vm1785_vm7, %v3642_v41, -inf }
0x1c01   : > { %v3646_v47 = vsel %vm1785_vm7, %v3640_v42, -inf }
0x1c03   : > { %3647 = vmax.xlane.f32.xlu0 %v3646_v47 }
0x1c07   : > { %3653 = vmax.xlane.f32.xlu0 %v3652_v48 }
0x1c8c   : > { %v3651_v50 = vpop.xlane.xlu0 %3650 }
0x1c8d   : > { %v3657_v35 = vsub.f32 %v3641_v49, %v3651_v50  ;;  %v3645_v3 = vpop.xlane.xlu1 %3644 }
0x1c8e   : > { %v3655_v51 = vsub.f32 %v3639_v37, %v3645_v3 }
0x1c8f   : > { %v3663_v52 = vmul.f32 1.442695, %v3657_v35 }
0x1c90   : > { %v3659_v25 = vmul.f32 1.442695, %v3655_v51  ;;  %v3648_v38 = vpop.xlane.xlu0 %3647 }
0x1c91   : > { %5076 = vpow2.f32 %v3663_v52  ;;  %v3656_v54 = vsub.f32 %v3640_v42, %v3648_v38 }
0x1c92   : > { %5078 = vpow2.f32 %v3659_v25  ;;  %v4396_v25 = vld [vmem:[#allocation7] ss:$0 sm:$0xff] }
0x1c93   : > { %v3661_v57 = vmul.f32 1.442695, %v3656_v54  ;;  %v4397_v54 = vld [vmem:[#allocation9] ss:$0 sm:$0xff] }
0x1c94   : > { %v3654_v53 = vpop.xlane.xlu0 %3653 }
0x1c95   : > { %v3658_v56 = vsub.f32 %v3642_v41, %v3654_v53 }
0x1c97   : > { %v3665_v58 = vmul.f32 1.442695, %v3658_v56 }
0x1c99   : > { %5080 = vpow2.f32 %v3665_v58  ;;  %v4994_v58 = vld [vmem:[%s5622_s13] sm:$0xff]  }
0x1c9a   : > { %5082 = vpow2.f32 %v3661_v57 }
0x1c9b   : > { %v5077_v59 = vpop.eup %5076 }
0x1c9c   : > { %v3673_v60 = vsel %vm1785_vm7, %v5077_v59, 0.0  ;;  %v5079_v61 = vpop.eup %5078 }
0x1c9d   : > { %3674 = vadd.xlane.f32.xlu1 %v3673_v60  ;;  %v3667_v62 = vsel %vm1785_vm7, %v5079_v61, 0.0  ;;  %v4996_v60 = vld [vmem:[%s5622_s13 + $0x10] sm:$0xff]  }
0x1ca1   : > { %3668 = vadd.xlane.f32.xlu1 %v3667_v62  ;;  %v4998_v62 = vld [vmem:[%s5622_s13 + $0x20] sm:$0xff]  }
0x1ca3   : > { %v5081_v8 = vpop.eup %5080 }
0x1ca4   : > { %v3676_v63 = vsel %vm1785_vm7, %v5081_v8, 0.0  ;;  %v5083_v1 = vpop.eup %5082 }
0x1ca5   : > { %3677 = vadd.xlane.f32.xlu0 %v3676_v63  ;;  %v3670_v46 = vsel %vm1785_vm7, %v5083_v1, 0.0  ;;  %v5000_v63 = vld [vmem:[%s5622_s13 + $0x30] sm:$0xff]  }
0x1ca9   : > { %3671 = vadd.xlane.f32.xlu0 %v3670_v46  ;;  %v4398_v46 = vld [vmem:[#allocation10] ss:$0 sm:$0xff] }
0x1cb2   : > { %3689 = vrot.lane.b32.xlu1 %v6240_v19, %s6444_s11 }
0x1cbf   : > { %3691 = vrot.lane.b32.xlu0 %v6244_v22, %s6444_s11 }
0x1d2a   : > { %v3675_v2 = vpop.xlane.xlu1 %3674 }
0x1d2e   : > { %v3669_v4 = vpop.xlane.xlu1 %3668 }
0x1d32   : > { %v3690_v5 = vpop.permute.xlu1 %3689  ;;  %v3678_v6 = vpop.xlane.xlu0 %3677 }
0x1d33   : > { %4707 = vmatprep.subr.bf16.mxu0 %v3690_v5  ;;  %5084 = vrcp.f32 %v3678_v6 }
0x1d34   : > { %4708 = vmatpush3.bf16.msra.mxu0 %v3690_v5  ;;  %5086 = vrcp.f32 %v3669_v4 }
0x1d35   : > { %5088 = vrcp.f32 %v3675_v2 }
0x1d36   : > { %v3672_v7 = vpop.xlane.xlu0 %3671 }
0x1d37   : > { %5090 = vrcp.f32 %v3672_v7 }
0x1d3a   : > { %v3692_v9 = vpop.permute.xlu0 %3691 }
0x1d3b   : > { %4709 = vmatprep.subr.bf16.mxu0 %v3692_v9 }
0x1d3c   : > { %4710 = vmatpush3.bf16.msra.mxu0 %v3692_v9 }
0x1d3d   : > { %4723 = vmatprep.subr.bf16.mxu0 %v5373_v0  ;;  %v5085_v32 = vpop.eup %5084 }
0x1d3e   : > { %v5087_v10 = vpop.eup %5086  ;;  %v3686_v13 = vmul.f32 %v5085_v32, %v5081_v8  ;;  %v4999_v8 = vld [vmem:[%s5622_s13 + $0x28] sm:$0xff]  }
0x1d3f   : > { %v5089_v11 = vpop.eup %5088  ;;  %v3680_v14 = vmul.f32 %v5087_v10, %v5079_v61  ;;  %v4997_v61 = vld [vmem:[%s5622_s13 + $0x18] sm:$0xff]  }
0x1d40   : > { %v3684_v15 = vmul.f32 %v5089_v11, %v5077_v59  ;;  %v4995_v59 = vld [vmem:[%s5622_s13 + $0x8] sm:$0xff]  }
0x1d41   : > { %v5091_v12 = vpop.eup %5090 }
0x1d42   : > { %v3682_v33 = vmul.f32 %v5091_v12, %v5083_v1  ;;  %v3688_v23 = vpack.c.bf16 %v3686_v13, %v3684_v15  ;;  %v5001_v1 = vld [vmem:[%s5622_s13 + $0x38] sm:$0xff]  }
0x1d44   : > { %v3687_v16 = vpack.c.bf16 %v3682_v33, %v3680_v14 }
0x1d46   : > { %4711 = vmatprep.mubr.msk.bf16.mxu0 %vm1785_vm7, %v3687_v16 }
0x1d47   : > { %4712 = vmatmul.mubr.msk.bf16.vlgmr.msra.gmra.mrb[60].mxu0 %vm1785_vm7, %v3688_v23 }
0x1d48   : > { %4727 = vmatprep.mubr.msk.bf16.mxu0 %vm5375_vm2, %v5373_v0 }
0x1e1a   : > { %v4713_v19 = vpop.f32.mrb[60].mxu0 }
0x1e1b   : > { %3755 = vrot.lane.b32.xlu1 %v4713_v19, %s6448_s2  ;;  %v3735_v20 = vpop.f32.mrb[61].mxu0  ;;  %s6468_s2 = sld [smem:[#allocation51_spill]] }
0x1e1c   : > { %v4714_v21 = vpop.f32.mrb[62].mxu0 }
0x1e1d   : > { %v3738_v22 = vpop.f32.mrb[63].mxu0 }
0x1e1f   : > { %3751 = vrot.lane.b32.xlu1 %v3738_v22, %s6447_s10  ;;  %s5388_s10 = smov 32  }
0x1e21   : > { %v4992_v50 = vld [vmem:[%s6468_s2] sm:$0xff]   ;;  %v4993_v35 = vld [vmem:[%s6468_s2 + $0x8] sm:$0xff]  }
0x1e22   : > { %4724 = vmatpush3.bf16.msra.mxu0 %v4992_v50 }
0x1e23   : > { %3759 = vrot.lane.b32.xlu1 %v4714_v21, %s6449_s3  ;;  %4725 = vmatprep.subr.bf16.mxu0 %v5373_v0  ;;  %s1540_s3 = scalar_lea.vmem %s5632_s20, %s5801_s0 }
0x1e26   : > { %4726 = vmatpush3.bf16.msra.mxu0 %v4993_v35 }
0x1e8d   : > { %v3756_v24 = vpop.permute.xlu1 %3755 }
0x1e91   : > { %v3752_v27 = vpop.permute.xlu1 %3751 }
0x1e92   : > { %v3762_v28 = vsel %vm1616_vm6, %v3735_v20, %v3752_v27  ;;  %vm4074_vm6 = vcmask 523520  }
0x1e93   : > { %v3763_v29 = vsel %vm6466_vm4, %v3762_v28, %v3756_v24 }
0x1e95   : > { %v3760_v44 = vpop.permute.xlu1 %3759 }
0x1e96   : > { %v3764_v31 = vsel %vm6467_vm9, %v3763_v29, %v3760_v44 }
0x1e97   : > { %v3765_v30 = vpack.c.bf16 %v3764_v31, %v3764_v31 }
0x1e99   : > { %4720 = vmatmul.mubr.msk.bf16.vlgmr.msra.gmra.mrb[40].mxu1 %vm1785_vm7, %v3765_v30 }
0x1e9a   : > { %4747 = vmatprep.mubr.msk.bf16.mxu1 %vm5375_vm2, %v5373_v0  ;;  %4732 = vmatpush3.bf16.msra.mxu1 %v4994_v58 }
0x1e9b   : > { %4733 = vmatprep.subr.bf16.mxu1 %v5373_v0 }
0x1e9e   : > { %4734 = vmatpush3.bf16.msra.mxu1 %v4995_v59 }
0x1e9f   : > { %4735 = vmatprep.subr.bf16.mxu1 %v5373_v0 }
0x1ea2   : > { %4736 = vmatpush3.bf16.msra.mxu1 %v4996_v60 }
0x1ea3   : > { %4737 = vmatprep.subr.bf16.mxu1 %v5373_v0 }
0x1ea6   : > { %4738 = vmatpush3.bf16.msra.mxu1 %v4997_v61 }
0x1ea7   : > { %4739 = vmatprep.subr.bf16.mxu1 %v5373_v0 }
0x1eaa   : > { %4740 = vmatpush3.bf16.msra.mxu1 %v4998_v62 }
0x1eab   : > { %4741 = vmatprep.subr.bf16.mxu1 %v5373_v0 }
0x1eae   : > { %4742 = vmatpush3.bf16.msra.mxu1 %v4999_v8 }
0x1eaf   : > { %4743 = vmatprep.subr.bf16.mxu1 %v5373_v0 }
0x1eb2   : > { %4744 = vmatpush3.bf16.msra.mxu1 %v5000_v63 }
0x1eb3   : > { %4745 = vmatprep.subr.bf16.mxu1 %v5373_v0 }
0x1eb6   : > { %4746 = vmatpush3.bf16.msra.mxu1 %v5001_v1 }
0x1f6c   : > { %v3821_v34 = vpop.f32.mrb[40].mxu1 }
0x1f6d   : > { %v3822_v49 = vadd.f32 %v4392_v43, %v3821_v34  ;;  %v4721_v36 = vpop.f32.mrb[41].mxu1  ;;  %v4402_v34 = vld [vmem:[#allocation12] ss:$0 sm:$0xff] }
0x1f6e   : > { %v3824_v37 = vpop.f32.mrb[42].mxu1 }
0x1f6f   : > { %v6290_v40 = vadd.f32 %v3822_v49, %v6220_v55  ;;  %v4722_v39 = vpop.f32.mrb[43].mxu1 }
0x1f71   : > { %v3830_v41 = vsel %vm1785_vm7, %v6290_v40, 0.0 }
0x1f72   : > { %3831 = vadd.xlane.f32.xlu0 %v3830_v41 }
0x1fff   : > { %v3832_v45 = vpop.xlane.xlu0 %3831 }
0x2000   : > { %v3833_v26 = vmul.f32 0.03125, %v3832_v45 }
0x2002   : > { %v3834_v42 = vsub.f32 %v6290_v40, %v3833_v26 }
0x2004   : > { %v3835_v47 = vmul.f32 %v3834_v42, %v3834_v42 }
0x2006   : > { %v3836_v48 = vsel %vm1785_vm7, %v3835_v47, 0.0 }
0x2007   : > { %3837 = vadd.xlane.f32.xlu1 %v3836_v48 }
0x2094   : > { %v3838_v55 = vpop.xlane.xlu1 %3837 }
0x2095   : > { %v3839_v3 = vmul.f32 0.03125, %v3838_v55 }
0x2097   : > { %v3840_v51 = vadd.f32 1e-05, %v3839_v3 }
0x2099   : > { %5092 = vrsqrt.f32 %v3840_v51 }
0x20a3   : > { %v5093_v52 = vpop.eup %5092 }
0x20a4   : > { %v3842_v38 = vmul.f32 %v5093_v52, %v3834_v42 }
0x20a6   : > { %v3849_v53 = vmul.f32 %v4396_v25, %v3842_v38 }
0x20a8   : > { %v3856_v56 = vadd.f32 %v4397_v54, %v3849_v53 }
0x20aa   : > { %v3861_v57 = vpack.c.bf16 %v3856_v56, %v3856_v56 }
0x20ac   : > { %4728 = vmatmul.mubr.msk.bf16.vlgmr.msra.gmra.mrb[64].mxu0 %vm1785_vm7, %v3861_v57 }
0x217f   : > { %v3918_v2 = vpop.f32.mrb[64].mxu0 }
0x2180   : > { %v3919_v4 = vadd.f32 %v4398_v46, %v3918_v2  ;;  %v4729_v5 = vpop.f32.mrb[65].mxu0 }
0x2181   : > { %v3921_v6 = vpop.f32.mrb[66].mxu0 }
0x2182   : > { %v3924_v7 = vmul.f32 0.70710677, %v3919_v4  ;;  %v4730_v9 = vpop.f32.mrb[67].mxu0  ;;  %v3948_v44 = vmul.f32 0.5, %v3919_v4 }
0x2184   : > { %v3925_v32 = vand.u32 2147483647, %v3924_v7  ;;  %vm3945_vm2 = vcmp.ge.f32.partialorder %v3924_v7, 0.0 }
0x2186   : > { %v3926_v10 = vmul.f32 0.3275911, %v3925_v32  ;;  %v3939_v12 = vsub.f32 0.0, %v3925_v32 }
0x2188   : > { %v3927_v11 = vadd.f32 1.0, %v3926_v10  ;;  %v3940_v14 = vmul.f32 %v3939_v12, %v3925_v32 }
0x218a   : > { %5094 = vrcp.f32 %v3927_v11  ;;  %v3941_v16 = vmul.f32 1.442695, %v3940_v14 }
0x218c   : > { %5096 = vpow2.f32 %v3941_v16 }
0x2194   : > { %v5095_v13 = vpop.eup %5094 }
0x2195   : > { %v3930_v33 = vmul.f32 1.0614054, %v5095_v13 }
0x2196   : > { %v5097_v22 = vpop.eup %5096 }
0x2197   : > { %v3931_v15 = vadd.f32 -1.4531521, %v3930_v33 }
0x2199   : > { %v3932_v0 = vmul.f32 %v5095_v13, %v3931_v15 }
0x219b   : > { %v3933_v23 = vadd.f32 1.4214138, %v3932_v0 }
0x219d   : > { %v3934_v17 = vmul.f32 %v5095_v13, %v3933_v23 }
0x219f   : > { %v3935_v18 = vadd.f32 -0.28449672, %v3934_v17 }
0x21a1   : > { %v3936_v19 = vmul.f32 %v5095_v13, %v3935_v18 }
0x21a3   : > { %v3937_v20 = vadd.f32 0.2548296, %v3936_v19 }
0x21a5   : > { %v3938_v21 = vmul.f32 %v5095_v13, %v3937_v20 }
0x21a7   : > { %v3943_v24 = vmul.f32 %v5097_v22, %v3938_v21 }
0x21a9   : > { %v3944_v27 = vsub.f32 1.0, %v3943_v24 }
0x21ab   : > { %v3946_v28 = vsub.f32 0.0, %v3944_v27 }
0x21ad   : > { %v3947_v29 = vsel %vm3945_vm2, %v3944_v27, %v3946_v28 }
0x21ae   : > { %v3949_v31 = vadd.f32 1.0, %v3947_v29 }
0x21b0   : > { %v3950_v30 = vmul.f32 %v3949_v31, %v3948_v44 }
0x21b2   : > { %v3967_v43 = vpack.c.bf16 %v3950_v30, %v3950_v30 }
0x21b4   : > { %4748 = vmatmul.mubr.bf16.vlgmr.msra.gmra.mrb[44].mxu1 %v3967_v43 }
0x2287   : > { %v4057_v49 = vpop.f32.mrb[44].mxu1 }
0x2288   : > { %v4058_v36 = vadd.f32 %v4402_v34, %v4057_v49  ;;  %v4749_v37 = vpop.f32.mrb[45].mxu1 }
0x2289   : > { %v4060_v39 = vpop.f32.mrb[46].mxu1 }
0x228a   : > { %v4063_v41 = vadd.f32 %v4058_v36, %v6290_v40  ;;  %4066 = vrot.lane.b32.xlu0 %v4058_v36, %s6440_s22  ;;  %v4750_v45 = vpop.f32.mrb[47].mxu1 }
0x228c   : > { %4064 = vst.msk [vmem:[%s1540_s3] sm:$0xff] %vm1785_vm7, %v4063_v41 }
0x22fc   : > { %v4067_v26 = vpop.permute.xlu0 %4066 }
0x22fd   : > { %v4069_v42 = vadd.f32 %v4067_v26, %v6290_v40 }
0x22ff   : > { %4071 = vrot.lane.b32.xlu1 %v4069_v42, %s5388_s10 }
0x2371   : > { %v4072_v47 = vpop.permute.xlu1 %4071 }
0x2372   : > { %4075 = vst.msk [vmem:[%s1540_s3] sm:$0xff] %vm4074_vm6, %v4072_v47 }
0x2373 PF: > { %s112_s28 = sadd.s32 1, %s5316_s28  }
0x2374   : > { %p109_p6 = scmp.ge.s32.totalorder %s112_s28, 4  }
0x2376   :  { %111 = sbr.rel (!%p109_p6) target bundleno = 90 (0x5a), region = 330 }
0x237d   :  { %4107 = vsyncpa [#allocation3], 1 }
0x237e   :  { %4109 = vsyncpa [#allocation3 + $0x1], 1 }
0x237f   :  { %4110 = vsyncpa [#allocation5], 1 }
0x2380   :  { %4111 = vsyncpa [#allocation8], 1 }
0x2381   :  { %4112 = vsyncpa [#allocation11], 1 }

</bundles_post_ra>
